<compile_context>
chip_gen: v7x
topology: tpu7x:2x2x1
jax: 0.10.0
libtpu: 0.0.40
codegen_flags: <defaults>
</compile_context>

<pallas_src>
import functools

import jax
import jax.numpy as jnp
from jax import lax
from jax.experimental import pallas as pl
from jax.experimental.pallas import tpu as pltpu


def _round_up(x, m):
    return ((x + m - 1) // m) * m


# ---------------------------------------------------------------------------
# Fused multi-layer LSTM + final Linear kernel (single invocation, no grid).
# ---------------------------------------------------------------------------
def _fused_lstm_kernel(*refs, T, B, Hp, nl):
    """refs = [x_flat, (w_ih_T, w_hh_T, bias) * nl, proj_w_T, proj_b,   inputs
               y,                                                        output
               gate_slab_0[, gate_slab_1]]                               scratch

    Shapes: x_flat (T*B, Din); w_ih_T (Din_l, 4*Hp); w_hh_T (Hp, 4*Hp);
            bias (1, 4*Hp); proj_w_T (Hp, out_w); proj_b (1, out_w);
            y (B, out_w); gate slabs (T*B, 4*Hp).
    Slab row layout is time-major: row = t*B + b.  Hp is the 128-lane-padded
    hidden width; gate k occupies lanes [k*Hp, k*Hp + Hp).
    """
    idx = 0
    x_ref = refs[idx]; idx += 1
    layer_refs = []
    for _ in range(nl):
        layer_refs.append((refs[idx], refs[idx + 1], refs[idx + 2]))
        idx += 3
    wp_ref = refs[idx]; bp_ref = refs[idx + 1]; out_ref = refs[idx + 2]
    slab_refs = list(refs[idx + 3:])          # 1 (nl==1) or 2 gate slabs

    # ---- layer 0: hoist the input projection for ALL time steps -------------
    slab_refs[0][...] = (
        jnp.dot(x_ref[...], layer_refs[0][0][...],
                preferred_element_type=jnp.float32)
        + layer_refs[0][2][...])                               # (T*B, 4*Hp)

    h_last = jnp.zeros((B, Hp), jnp.float32)
    for l in range(nl):
        whh_ref = layer_refs[l][1]
        last_layer = (l == nl - 1)
        src_ref = slab_refs[l % len(slab_refs)]
        if not last_layer:
            dst_ref = slab_refs[(l + 1) % len(slab_refs)]
            wih_next_ref = layer_refs[l + 1][0]
            b_next_ref = layer_refs[l + 1][2]

        # ---- serial recurrence: h/c live in vregs (fori_loop carry) ---------
        def step(t, carry):
            h, c = carry
            row = pl.multiple_of(t * B, B)
            g = (src_ref[pl.ds(row, B), :]
                 + jnp.dot(h, whh_ref[...],
                           preferred_element_type=jnp.float32))   # (B, 4*Hp)
            # PyTorch gate order i, f, g, o; each gate is a 128-lane block,
            # so these slices are lane-block aligned (no XLU shuffles).
            i_g = jax.nn.sigmoid(g[:, 0 * Hp:1 * Hp])
            f_g = jax.nn.sigmoid(g[:, 1 * Hp:2 * Hp])
            g_g = jnp.tanh(g[:, 2 * Hp:3 * Hp])
            o_g = jax.nn.sigmoid(g[:, 3 * Hp:4 * Hp])
            c_new = f_g * c + i_g * g_g
            h_new = o_g * jnp.tanh(c_new)
            if not last_layer:
                # Wavefront: next layer's input projection for step t.  It is
                # off this layer's dependence chain, so the MXU push is free
                # filler under the elementwise/EUP gate chain.
                dst_ref[pl.ds(row, B), :] = (
                    jnp.dot(h_new, wih_next_ref[...],
                            preferred_element_type=jnp.float32)
                    + b_next_ref[...])
            return h_new, c_new

        h0 = jnp.zeros((B, Hp), jnp.float32)
        c0 = jnp.zeros((B, Hp), jnp.float32)
        # Sequential by definition; bounded unroll keeps code size sane at
        # large T while keeping LLO scheduler visibility.
        h_last, _ = lax.fori_loop(0, T, step, (h0, c0), unroll=min(T, 8))

    # ---- final Linear on the last hidden state only (the only HBM write) ----
    out_ref[...] = (
        jnp.dot(h_last, wp_ref[...], preferred_element_type=jnp.float32)
        + bp_ref[...])


# ---------------------------------------------------------------------------
# Wrapper
# ---------------------------------------------------------------------------
def time_series_model_forward(prepared, x):
    """x: (B, T, inp_sz) batch_first, float32. Returns (B, out_w)."""
    B, T, Din = x.shape
    Hp = prepared["layers"][0]["whh_t"].shape[0]          # lane-padded hidden
    out_w = prepared["proj_w_t"].shape[1]
    nl = len(prepared["layers"])

    # Pad batch to the f32 sublane tile (8).  Padded rows evolve independently
    # (the recurrence is row-wise) and are sliced off at the end.
    B_pad = max(8, _round_up(B, 8))

    x_tm = jnp.transpose(x, (1, 0, 2))                    # time-major (T, B, Din)
    if B_pad != B:
        x_tm = jnp.pad(x_tm, ((0, 0), (0, B_pad - B), (0, 0)))
    x_flat = x_tm.reshape(T * B_pad, Din)                 # row = t*B_pad + b

    inputs = [x_flat]
    for lyr in prepared["layers"]:
        inputs += [lyr["wih_t"], lyr["whh_t"], lyr["bias"]]
    inputs += [prepared["proj_w_t"], prepared["proj_b"]]

    n_slabs = 2 if nl > 1 else 1
    kernel = functools.partial(_fused_lstm_kernel, T=T, B=B_pad, Hp=Hp, nl=nl)

    # No grid: a single invocation, every operand staged once (single-buffered)
    # into VMEM.  Example-shape footprint: 2 gate slabs 64x512 f32 (256 KiB)
    # + weights (< 1 MiB), far under every generation's scoped VMEM.
    y_pad = pl.pallas_call(
        kernel,
        out_shape=jax.ShapeDtypeStruct((B_pad, out_w), jnp.float32),
        in_specs=[pl.BlockSpec(memory_space=pltpu.MemorySpace.VMEM)] * len(inputs),
        out_specs=pl.BlockSpec(memory_space=pltpu.MemorySpace.VMEM),
        scratch_shapes=[pltpu.VMEM((T * B_pad, 4 * Hp), jnp.float32)
                        for _ in range(n_slabs)],
        compiler_params=pltpu.CompilerParams(vmem_limit_bytes=32 * 1024 * 1024),
    )(*inputs)
    return y_pad[:B]


# ---------------------------------------------------------------------------
# Parameter init (PyTorch layout) + one-time preparation for the kernel
# ---------------------------------------------------------------------------
def init_params(key, inp_sz, hid, nl, out_w):
    """Deterministic init mirroring PyTorch's U(-1/sqrt(hid), 1/sqrt(hid))."""
    bound = 1.0 / jnp.sqrt(jnp.float32(hid))
    params = {"layers": []}
    for l in range(nl):
        din = inp_sz if l == 0 else hid
        key, k1, k2, k3, k4 = jax.random.split(key, 5)
        params["layers"].append({
            "w_ih": jax.random.uniform(k1, (4 * hid, din), jnp.float32, -bound, bound),
            "w_hh": jax.random.uniform(k2, (4 * hid, hid), jnp.float32, -bound, bound),
            "b_ih": jax.random.uniform(k3, (4 * hid,), jnp.float32, -bound, bound),
            "b_hh": jax.random.uniform(k4, (4 * hid,), jnp.float32, -bound, bound),
        })
    key, k1, k2 = jax.random.split(key, 3)
    params["proj_w"] = jax.random.uniform(k1, (out_w, hid), jnp.float32, -bound, bound)
    params["proj_b"] = jax.random.uniform(k2, (out_w,), jnp.float32, -bound, bound)
    return params


def prepare_params(params):
    """One-time relayout: transpose, sum biases, and pad the hidden width so each
    gate occupies its own 128-lane block (lane-aligned gate slices in-kernel).
    Zero padding keeps the padded lanes of h/c exactly 0 throughout."""
    H = params["layers"][0]["w_hh"].shape[1]
    Hp = max(128, _round_up(H, 128))
    prep = {"layers": []}
    for l, lyr in enumerate(params["layers"]):
        din = lyr["w_ih"].shape[1]
        din_p = din if l == 0 else Hp
        wih_t = jnp.zeros((din_p, 4 * Hp), jnp.float32)
        whh_t = jnp.zeros((Hp, 4 * Hp), jnp.float32)
        bias = jnp.zeros((1, 4 * Hp), jnp.float32)
        wih_src = jnp.transpose(lyr["w_ih"])                # (din, 4H)
        whh_src = jnp.transpose(lyr["w_hh"])                # (H,   4H)
        b_src = lyr["b_ih"] + lyr["b_hh"]                   # (4H,)
        for k in range(4):                                  # PyTorch order i,f,g,o
            wih_t = wih_t.at[:din, k * Hp:k * Hp + H].set(wih_src[:, k * H:(k + 1) * H])
            whh_t = whh_t.at[:H, k * Hp:k * Hp + H].set(whh_src[:, k * H:(k + 1) * H])
            bias = bias.at[0, k * Hp:k * Hp + H].set(b_src[k * H:(k + 1) * H])
        prep["layers"].append({"wih_t": wih_t, "whh_t": whh_t, "bias": bias})
    out_w = params["proj_w"].shape[0]
    proj_w_t = jnp.zeros((Hp, out_w), jnp.float32)
    prep["proj_w_t"] = proj_w_t.at[:H, :].set(jnp.transpose(params["proj_w"]))
    prep["proj_b"] = params["proj_b"][None, :]
    return prep


# ---------------------------------------------------------------------------
# Pure-JAX reference (PyTorch LSTM semantics) for the correctness check
# ---------------------------------------------------------------------------
def _lstm_reference(params, x):
    hi = jax.lax.Precision.HIGHEST
    B, T, _ = x.shape
    h_seq = x
    for lyr in params["layers"]:
        H = lyr["w_hh"].shape[1]
        h = jnp.zeros((B, H), jnp.float32)
        c = jnp.zeros((B, H), jnp.float32)
        outs = []
        for t in range(T):
            g = (jnp.dot(h_seq[:, t, :], lyr["w_ih"].T, precision=hi)
                 + jnp.dot(h, lyr["w_hh"].T, precision=hi)
                 + lyr["b_ih"] + lyr["b_hh"])
            i = jax.nn.sigmoid(g[:, 0 * H:1 * H])
            f = jax.nn.sigmoid(g[:, 1 * H:2 * H])
            gg = jnp.tanh(g[:, 2 * H:3 * H])
            o = jax.nn.sigmoid(g[:, 3 * H:4 * H])
            c = f * c + i * gg
            h = o * jnp.tanh(c)
            outs.append(h)
        h_seq = jnp.stack(outs, axis=1)
    return (jnp.dot(h_seq[:, -1, :], params["proj_w"].T, precision=hi)
            + params["proj_b"])


if __name__ == "__main__":
    # Small shapes consistent with the module's forward.
    B, T, INP, HID, NL, OUT_W = 2, 8, 16, 32, 2, 4
    DO = 0.0   # dropout (skipped in eval semantics; see TODO above)

    key = jax.random.PRNGKey(0)
    key, pkey, xkey = jax.random.split(key, 3)

    params = init_params(pkey, INP, HID, NL, OUT_W)
    prepared = prepare_params(params)          # one-time weight relayout/padding
    x = jax.random.normal(xkey, (B, T, INP), jnp.float32)

    y = jax.jit(time_series_model_forward)(prepared, x)
    jax.block_until_ready(y)
    assert y.shape == (B, OUT_W)

    y_ref = _lstm_reference(params, x)
    # f32 vs f32; tolerance leaves headroom only for MXU multi-pass rounding /
    # accumulation-order differences, so any lane/padding/layout bug fails.
    max_err = jnp.max(jnp.abs(y - y_ref))
    assert jnp.allclose(y, y_ref, rtol=1e-4, atol=1e-4), (
        f"mismatch vs reference, max abs err {max_err}")
    print("KERNEL_OK")
</pallas_src>

<mosaic_0001>
module attributes {stable_mosaic.version = 11 : i64} {
  func.func @_fused_lstm_kernel(%arg0: memref<64x16xf32, #tpu.memory_space<vmem>>, %arg1: memref<16x512xf32, #tpu.memory_space<vmem>>, %arg2: memref<128x512xf32, #tpu.memory_space<vmem>>, %arg3: memref<1x512xf32, #tpu.memory_space<vmem>>, %arg4: memref<128x512xf32, #tpu.memory_space<vmem>>, %arg5: memref<128x512xf32, #tpu.memory_space<vmem>>, %arg6: memref<1x512xf32, #tpu.memory_space<vmem>>, %arg7: memref<128x4xf32, #tpu.memory_space<vmem>>, %arg8: memref<1x4xf32, #tpu.memory_space<vmem>>, %arg9: memref<8x4xf32, #tpu.memory_space<vmem>>, %arg10: memref<64x512xf32, #tpu.memory_space<vmem>>, %arg11: memref<64x512xf32, #tpu.memory_space<vmem>>) attributes {dimension_semantics = [], scalar_prefetch = 0 : i64, scratch_operands = 2 : i64, tpu.core_type = #tpu.core_type<tc>} {
    %c0 = arith.constant 0 : index
    %c0_0 = arith.constant 0 : index
    %0 = vector.load %arg0[%c0, %c0_0] : memref<64x16xf32, #tpu.memory_space<vmem>>, vector<64x16xf32>
    %c0_1 = arith.constant 0 : index
    %c0_2 = arith.constant 0 : index
    %1 = vector.load %arg1[%c0_1, %c0_2] : memref<16x512xf32, #tpu.memory_space<vmem>>, vector<16x512xf32>
    %cst = arith.constant dense<0.000000e+00> : vector<64x512xf32>
    %2 = tpu.matmul %0, %1, %cst {dimension_numbers = #tpu.dot_dimension_numbers<[1], [0], [0], [1], [0, 0, 1, 1], [], []>} : vector<64x16xf32>, vector<16x512xf32>, vector<64x512xf32> -> vector<64x512xf32>
    %c0_3 = arith.constant 0 : index
    %c0_4 = arith.constant 0 : index
    %3 = vector.load %arg3[%c0_3, %c0_4] : memref<1x512xf32, #tpu.memory_space<vmem>>, vector<1x512xf32>
    %4 = vector.broadcast %3 : vector<1x512xf32> to vector<64x512xf32>
    %5 = arith.addf %2, %4 : vector<64x512xf32>
    %c0_5 = arith.constant 0 : index
    %c0_6 = arith.constant 0 : index
    %6 = vector.load %arg10[%c0_5, %c0_6] : memref<64x512xf32, #tpu.memory_space<vmem>>, vector<64x512xf32>
    tpu.vector_store %arg10[%c0_5, %c0_6], %5 {strides = array<i32>} : memref<64x512xf32, #tpu.memory_space<vmem>>, vector<64x512xf32>,
    %cst_7 = arith.constant 0.000000e+00 : f32
    %7 = vector.broadcast %cst_7 : f32 to vector<8x128xf32>
    %cst_8 = arith.constant 0.000000e+00 : f32
    %8 = vector.broadcast %cst_8 : f32 to vector<8x128xf32>
    %c0_i32 = arith.constant 0 : i32
    %c8_i32 = arith.constant 8 : i32
    %9 = arith.muli %c0_i32, %c8_i32 : i32
    %10 = tpu.assume_multiple %9, 8 : i32
    %11 = arith.index_cast %10 : i32 to index
    %c0_9 = arith.constant 0 : index
    %12 = vector.load %arg10[%11, %c0_9] : memref<64x512xf32, #tpu.memory_space<vmem>>, vector<8x512xf32>
    %c0_10 = arith.constant 0 : index
    %c0_11 = arith.constant 0 : index
    %13 = vector.load %arg2[%c0_10, %c0_11] : memref<128x512xf32, #tpu.memory_space<vmem>>, vector<128x512xf32>
    %cst_12 = arith.constant dense<0.000000e+00> : vector<8x512xf32>
    %14 = tpu.matmul %7, %13, %cst_12 {dimension_numbers = #tpu.dot_dimension_numbers<[1], [0], [0], [1], [0, 0, 1, 1], [], []>} : vector<8x128xf32>, vector<128x512xf32>, vector<8x512xf32> -> vector<8x512xf32>
    %15 = arith.addf %12, %14 : vector<8x512xf32>
    %16 = vector.extract_strided_slice %15 {offsets = [0, 0], sizes = [8, 128], strides = [1, 1]} : vector<8x512xf32> to vector<8x128xf32>
    %17 = arith.negf %16 : vector<8x128xf32>
    %18 = math.exp %17 : vector<8x128xf32>
    %cst_13 = arith.constant 1.000000e+00 : f32
    %19 = vector.broadcast %cst_13 : f32 to vector<8x128xf32>
    %20 = arith.addf %19, %18 : vector<8x128xf32>
    %21 = arith.divf %19, %20 : vector<8x128xf32>
    %22 = vector.extract_strided_slice %15 {offsets = [0, 128], sizes = [8, 128], strides = [1, 1]} : vector<8x512xf32> to vector<8x128xf32>
    %23 = arith.negf %22 : vector<8x128xf32>
    %24 = math.exp %23 : vector<8x128xf32>
    %cst_14 = arith.constant 1.000000e+00 : f32
    %25 = vector.broadcast %cst_14 : f32 to vector<8x128xf32>
    %26 = arith.addf %25, %24 : vector<8x128xf32>
    %27 = arith.divf %25, %26 : vector<8x128xf32>
    %28 = vector.extract_strided_slice %15 {offsets = [0, 256], sizes = [8, 128], strides = [1, 1]} : vector<8x512xf32> to vector<8x128xf32>
    %29 = math.tanh %28 : vector<8x128xf32>
    %30 = vector.extract_strided_slice %15 {offsets = [0, 384], sizes = [8, 128], strides = [1, 1]} : vector<8x512xf32> to vector<8x128xf32>
    %31 = arith.negf %30 : vector<8x128xf32>
    %32 = math.exp %31 : vector<8x128xf32>
    %cst_15 = arith.constant 1.000000e+00 : f32
    %33 = vector.broadcast %cst_15 : f32 to vector<8x128xf32>
    %34 = arith.addf %33, %32 : vector<8x128xf32>
    %35 = arith.divf %33, %34 : vector<8x128xf32>
    %36 = arith.mulf %27, %8 : vector<8x128xf32>
    %37 = arith.mulf %21, %29 : vector<8x128xf32>
    %38 = arith.addf %36, %37 : vector<8x128xf32>
    %39 = math.tanh %38 : vector<8x128xf32>
    %40 = arith.mulf %35, %39 : vector<8x128xf32>
    %c0_16 = arith.constant 0 : index
    %c0_17 = arith.constant 0 : index
    %41 = vector.load %arg4[%c0_16, %c0_17] : memref<128x512xf32, #tpu.memory_space<vmem>>, vector<128x512xf32>
    %cst_18 = arith.constant dense<0.000000e+00> : vector<8x512xf32>
    %42 = tpu.matmul %40, %41, %cst_18 {dimension_numbers = #tpu.dot_dimension_numbers<[1], [0], [0], [1], [0, 0, 1, 1], [], []>} : vector<8x128xf32>, vector<128x512xf32>, vector<8x512xf32> -> vector<8x512xf32>
    %c0_19 = arith.constant 0 : index
    %c0_20 = arith.constant 0 : index
    %43 = vector.load %arg6[%c0_19, %c0_20] : memref<1x512xf32, #tpu.memory_space<vmem>>, vector<1x512xf32>
    %44 = vector.broadcast %43 : vector<1x512xf32> to vector<8x512xf32>
    %45 = arith.addf %42, %44 : vector<8x512xf32>
    %46 = arith.index_cast %10 : i32 to index
    %c0_21 = arith.constant 0 : index
    %47 = vector.load %arg11[%46, %c0_21] : memref<64x512xf32, #tpu.memory_space<vmem>>, vector<8x512xf32>
    tpu.vector_store %arg11[%46, %c0_21], %45 {strides = array<i32>} : memref<64x512xf32, #tpu.memory_space<vmem>>, vector<8x512xf32>,
    %c1_i32 = arith.constant 1 : i32
    %c8_i32_22 = arith.constant 8 : i32
    %48 = arith.muli %c1_i32, %c8_i32_22 : i32
    %49 = tpu.assume_multiple %48, 8 : i32
    %50 = arith.index_cast %49 : i32 to index
    %c0_23 = arith.constant 0 : index
    %51 = vector.load %arg10[%50, %c0_23] : memref<64x512xf32, #tpu.memory_space<vmem>>, vector<8x512xf32>
    %c0_24 = arith.constant 0 : index
    %c0_25 = arith.constant 0 : index
    %52 = vector.load %arg2[%c0_24, %c0_25] : memref<128x512xf32, #tpu.memory_space<vmem>>, vector<128x512xf32>
    %cst_26 = arith.constant dense<0.000000e+00> : vector<8x512xf32>
    %53 = tpu.matmul %40, %52, %cst_26 {dimension_numbers = #tpu.dot_dimension_numbers<[1], [0], [0], [1], [0, 0, 1, 1], [], []>} : vector<8x128xf32>, vector<128x512xf32>, vector<8x512xf32> -> vector<8x512xf32>
    %54 = arith.addf %51, %53 : vector<8x512xf32>
    %55 = vector.extract_strided_slice %54 {offsets = [0, 0], sizes = [8, 128], strides = [1, 1]} : vector<8x512xf32> to vector<8x128xf32>
    %56 = arith.negf %55 : vector<8x128xf32>
    %57 = math.exp %56 : vector<8x128xf32>
    %cst_27 = arith.constant 1.000000e+00 : f32
    %58 = vector.broadcast %cst_27 : f32 to vector<8x128xf32>
    %59 = arith.addf %58, %57 : vector<8x128xf32>
    %60 = arith.divf %58, %59 : vector<8x128xf32>
    %61 = vector.extract_strided_slice %54 {offsets = [0, 128], sizes = [8, 128], strides = [1, 1]} : vector<8x512xf32> to vector<8x128xf32>
    %62 = arith.negf %61 : vector<8x128xf32>
    %63 = math.exp %62 : vector<8x128xf32>
    %cst_28 = arith.constant 1.000000e+00 : f32
    %64 = vector.broadcast %cst_28 : f32 to vector<8x128xf32>
    %65 = arith.addf %64, %63 : vector<8x128xf32>
    %66 = arith.divf %64, %65 : vector<8x128xf32>
    %67 = vector.extract_strided_slice %54 {offsets = [0, 256], sizes = [8, 128], strides = [1, 1]} : vector<8x512xf32> to vector<8x128xf32>
    %68 = math.tanh %67 : vector<8x128xf32>
    %69 = vector.extract_strided_slice %54 {offsets = [0, 384], sizes = [8, 128], strides = [1, 1]} : vector<8x512xf32> to vector<8x128xf32>
    %70 = arith.negf %69 : vector<8x128xf32>
    %71 = math.exp %70 : vector<8x128xf32>
    %cst_29 = arith.constant 1.000000e+00 : f32
    %72 = vector.broadcast %cst_29 : f32 to vector<8x128xf32>
    %73 = arith.addf %72, %71 : vector<8x128xf32>
    %74 = arith.divf %72, %73 : vector<8x128xf32>
    %75 = arith.mulf %66, %38 : vector<8x128xf32>
    %76 = arith.mulf %60, %68 : vector<8x128xf32>
    %77 = arith.addf %75, %76 : vector<8x128xf32>
    %78 = math.tanh %77 : vector<8x128xf32>
    %79 = arith.mulf %74, %78 : vector<8x128xf32>
    %c0_30 = arith.constant 0 : index
    %c0_31 = arith.constant 0 : index
    %80 = vector.load %arg4[%c0_30, %c0_31] : memref<128x512xf32, #tpu.memory_space<vmem>>, vector<128x512xf32>
    %cst_32 = arith.constant dense<0.000000e+00> : vector<8x512xf32>
    %81 = tpu.matmul %79, %80, %cst_32 {dimension_numbers = #tpu.dot_dimension_numbers<[1], [0], [0], [1], [0, 0, 1, 1], [], []>} : vector<8x128xf32>, vector<128x512xf32>, vector<8x512xf32> -> vector<8x512xf32>
    %c0_33 = arith.constant 0 : index
    %c0_34 = arith.constant 0 : index
    %82 = vector.load %arg6[%c0_33, %c0_34] : memref<1x512xf32, #tpu.memory_space<vmem>>, vector<1x512xf32>
    %83 = vector.broadcast %82 : vector<1x512xf32> to vector<8x512xf32>
    %84 = arith.addf %81, %83 : vector<8x512xf32>
    %85 = arith.index_cast %49 : i32 to index
    %c0_35 = arith.constant 0 : index
    %86 = vector.load %arg11[%85, %c0_35] : memref<64x512xf32, #tpu.memory_space<vmem>>, vector<8x512xf32>
    tpu.vector_store %arg11[%85, %c0_35], %84 {strides = array<i32>} : memref<64x512xf32, #tpu.memory_space<vmem>>, vector<8x512xf32>,
    %c2_i32 = arith.constant 2 : i32
    %c8_i32_36 = arith.constant 8 : i32
    %87 = arith.muli %c2_i32, %c8_i32_36 : i32
    %88 = tpu.assume_multiple %87, 8 : i32
    %89 = arith.index_cast %88 : i32 to index
    %c0_37 = arith.constant 0 : index
    %90 = vector.load %arg10[%89, %c0_37] : memref<64x512xf32, #tpu.memory_space<vmem>>, vector<8x512xf32>
    %c0_38 = arith.constant 0 : index
    %c0_39 = arith.constant 0 : index
    %91 = vector.load %arg2[%c0_38, %c0_39] : memref<128x512xf32, #tpu.memory_space<vmem>>, vector<128x512xf32>
    %cst_40 = arith.constant dense<0.000000e+00> : vector<8x512xf32>
    %92 = tpu.matmul %79, %91, %cst_40 {dimension_numbers = #tpu.dot_dimension_numbers<[1], [0], [0], [1], [0, 0, 1, 1], [], []>} : vector<8x128xf32>, vector<128x512xf32>, vector<8x512xf32> -> vector<8x512xf32>
    %93 = arith.addf %90, %92 : vector<8x512xf32>
    %94 = vector.extract_strided_slice %93 {offsets = [0, 0], sizes = [8, 128], strides = [1, 1]} : vector<8x512xf32> to vector<8x128xf32>
    %95 = arith.negf %94 : vector<8x128xf32>
    %96 = math.exp %95 : vector<8x128xf32>
    %cst_41 = arith.constant 1.000000e+00 : f32
    %97 = vector.broadcast %cst_41 : f32 to vector<8x128xf32>
    %98 = arith.addf %97, %96 : vector<8x128xf32>
    %99 = arith.divf %97, %98 : vector<8x128xf32>
    %100 = vector.extract_strided_slice %93 {offsets = [0, 128], sizes = [8, 128], strides = [1, 1]} : vector<8x512xf32> to vector<8x128xf32>
    %101 = arith.negf %100 : vector<8x128xf32>
    %102 = math.exp %101 : vector<8x128xf32>
    %cst_42 = arith.constant 1.000000e+00 : f32
    %103 = vector.broadcast %cst_42 : f32 to vector<8x128xf32>
    %104 = arith.addf %103, %102 : vector<8x128xf32>
    %105 = arith.divf %103, %104 : vector<8x128xf32>
    %106 = vector.extract_strided_slice %93 {offsets = [0, 256], sizes = [8, 128], strides = [1, 1]} : vector<8x512xf32> to vector<8x128xf32>
    %107 = math.tanh %106 : vector<8x128xf32>
    %108 = vector.extract_strided_slice %93 {offsets = [0, 384], sizes = [8, 128], strides = [1, 1]} : vector<8x512xf32> to vector<8x128xf32>
    %109 = arith.negf %108 : vector<8x128xf32>
    %110 = math.exp %109 : vector<8x128xf32>
    %cst_43 = arith.constant 1.000000e+00 : f32
    %111 = vector.broadcast %cst_43 : f32 to vector<8x128xf32>
    %112 = arith.addf %111, %110 : vector<8x128xf32>
    %113 = arith.divf %111, %112 : vector<8x128xf32>
    %114 = arith.mulf %105, %77 : vector<8x128xf32>
    %115 = arith.mulf %99, %107 : vector<8x128xf32>
    %116 = arith.addf %114, %115 : vector<8x128xf32>
    %117 = math.tanh %116 : vector<8x128xf32>
    %118 = arith.mulf %113, %117 : vector<8x128xf32>
    %c0_44 = arith.constant 0 : index
    %c0_45 = arith.constant 0 : index
    %119 = vector.load %arg4[%c0_44, %c0_45] : memref<128x512xf32, #tpu.memory_space<vmem>>, vector<128x512xf32>
    %cst_46 = arith.constant dense<0.000000e+00> : vector<8x512xf32>
    %120 = tpu.matmul %118, %119, %cst_46 {dimension_numbers = #tpu.dot_dimension_numbers<[1], [0], [0], [1], [0, 0, 1, 1], [], []>} : vector<8x128xf32>, vector<128x512xf32>, vector<8x512xf32> -> vector<8x512xf32>
    %c0_47 = arith.constant 0 : index
    %c0_48 = arith.constant 0 : index
    %121 = vector.load %arg6[%c0_47, %c0_48] : memref<1x512xf32, #tpu.memory_space<vmem>>, vector<1x512xf32>
    %122 = vector.broadcast %121 : vector<1x512xf32> to vector<8x512xf32>
    %123 = arith.addf %120, %122 : vector<8x512xf32>
    %124 = arith.index_cast %88 : i32 to index
    %c0_49 = arith.constant 0 : index
    %125 = vector.load %arg11[%124, %c0_49] : memref<64x512xf32, #tpu.memory_space<vmem>>, vector<8x512xf32>
    tpu.vector_store %arg11[%124, %c0_49], %123 {strides = array<i32>} : memref<64x512xf32, #tpu.memory_space<vmem>>, vector<8x512xf32>,
    %c3_i32 = arith.constant 3 : i32
    %c8_i32_50 = arith.constant 8 : i32
    %126 = arith.muli %c3_i32, %c8_i32_50 : i32
    %127 = tpu.assume_multiple %126, 8 : i32
    %128 = arith.index_cast %127 : i32 to index
    %c0_51 = arith.constant 0 : index
    %129 = vector.load %arg10[%128, %c0_51] : memref<64x512xf32, #tpu.memory_space<vmem>>, vector<8x512xf32>
    %c0_52 = arith.constant 0 : index
    %c0_53 = arith.constant 0 : index
    %130 = vector.load %arg2[%c0_52, %c0_53] : memref<128x512xf32, #tpu.memory_space<vmem>>, vector<128x512xf32>
    %cst_54 = arith.constant dense<0.000000e+00> : vector<8x512xf32>
    %131 = tpu.matmul %118, %130, %cst_54 {dimension_numbers = #tpu.dot_dimension_numbers<[1], [0], [0], [1], [0, 0, 1, 1], [], []>} : vector<8x128xf32>, vector<128x512xf32>, vector<8x512xf32> -> vector<8x512xf32>
    %132 = arith.addf %129, %131 : vector<8x512xf32>
    %133 = vector.extract_strided_slice %132 {offsets = [0, 0], sizes = [8, 128], strides = [1, 1]} : vector<8x512xf32> to vector<8x128xf32>
    %134 = arith.negf %133 : vector<8x128xf32>
    %135 = math.exp %134 : vector<8x128xf32>
    %cst_55 = arith.constant 1.000000e+00 : f32
    %136 = vector.broadcast %cst_55 : f32 to vector<8x128xf32>
    %137 = arith.addf %136, %135 : vector<8x128xf32>
    %138 = arith.divf %136, %137 : vector<8x128xf32>
    %139 = vector.extract_strided_slice %132 {offsets = [0, 128], sizes = [8, 128], strides = [1, 1]} : vector<8x512xf32> to vector<8x128xf32>
    %140 = arith.negf %139 : vector<8x128xf32>
    %141 = math.exp %140 : vector<8x128xf32>
    %cst_56 = arith.constant 1.000000e+00 : f32
    %142 = vector.broadcast %cst_56 : f32 to vector<8x128xf32>
    %143 = arith.addf %142, %141 : vector<8x128xf32>
    %144 = arith.divf %142, %143 : vector<8x128xf32>
    %145 = vector.extract_strided_slice %132 {offsets = [0, 256], sizes = [8, 128], strides = [1, 1]} : vector<8x512xf32> to vector<8x128xf32>
    %146 = math.tanh %145 : vector<8x128xf32>
    %147 = vector.extract_strided_slice %132 {offsets = [0, 384], sizes = [8, 128], strides = [1, 1]} : vector<8x512xf32> to vector<8x128xf32>
    %148 = arith.negf %147 : vector<8x128xf32>
    %149 = math.exp %148 : vector<8x128xf32>
    %cst_57 = arith.constant 1.000000e+00 : f32
    %150 = vector.broadcast %cst_57 : f32 to vector<8x128xf32>
    %151 = arith.addf %150, %149 : vector<8x128xf32>
    %152 = arith.divf %150, %151 : vector<8x128xf32>
    %153 = arith.mulf %144, %116 : vector<8x128xf32>
    %154 = arith.mulf %138, %146 : vector<8x128xf32>
    %155 = arith.addf %153, %154 : vector<8x128xf32>
    %156 = math.tanh %155 : vector<8x128xf32>
    %157 = arith.mulf %152, %156 : vector<8x128xf32>
    %c0_58 = arith.constant 0 : index
    %c0_59 = arith.constant 0 : index
    %158 = vector.load %arg4[%c0_58, %c0_59] : memref<128x512xf32, #tpu.memory_space<vmem>>, vector<128x512xf32>
    %cst_60 = arith.constant dense<0.000000e+00> : vector<8x512xf32>
    %159 = tpu.matmul %157, %158, %cst_60 {dimension_numbers = #tpu.dot_dimension_numbers<[1], [0], [0], [1], [0, 0, 1, 1], [], []>} : vector<8x128xf32>, vector<128x512xf32>, vector<8x512xf32> -> vector<8x512xf32>
    %c0_61 = arith.constant 0 : index
    %c0_62 = arith.constant 0 : index
    %160 = vector.load %arg6[%c0_61, %c0_62] : memref<1x512xf32, #tpu.memory_space<vmem>>, vector<1x512xf32>
    %161 = vector.broadcast %160 : vector<1x512xf32> to vector<8x512xf32>
    %162 = arith.addf %159, %161 : vector<8x512xf32>
    %163 = arith.index_cast %127 : i32 to index
    %c0_63 = arith.constant 0 : index
    %164 = vector.load %arg11[%163, %c0_63] : memref<64x512xf32, #tpu.memory_space<vmem>>, vector<8x512xf32>
    tpu.vector_store %arg11[%163, %c0_63], %162 {strides = array<i32>} : memref<64x512xf32, #tpu.memory_space<vmem>>, vector<8x512xf32>,
    %c4_i32 = arith.constant 4 : i32
    %c8_i32_64 = arith.constant 8 : i32
    %165 = arith.muli %c4_i32, %c8_i32_64 : i32
    %166 = tpu.assume_multiple %165, 8 : i32
    %167 = arith.index_cast %166 : i32 to index
    %c0_65 = arith.constant 0 : index
    %168 = vector.load %arg10[%167, %c0_65] : memref<64x512xf32, #tpu.memory_space<vmem>>, vector<8x512xf32>
    %c0_66 = arith.constant 0 : index
    %c0_67 = arith.constant 0 : index
    %169 = vector.load %arg2[%c0_66, %c0_67] : memref<128x512xf32, #tpu.memory_space<vmem>>, vector<128x512xf32>
    %cst_68 = arith.constant dense<0.000000e+00> : vector<8x512xf32>
    %170 = tpu.matmul %157, %169, %cst_68 {dimension_numbers = #tpu.dot_dimension_numbers<[1], [0], [0], [1], [0, 0, 1, 1], [], []>} : vector<8x128xf32>, vector<128x512xf32>, vector<8x512xf32> -> vector<8x512xf32>
    %171 = arith.addf %168, %170 : vector<8x512xf32>
    %172 = vector.extract_strided_slice %171 {offsets = [0, 0], sizes = [8, 128], strides = [1, 1]} : vector<8x512xf32> to vector<8x128xf32>
    %173 = arith.negf %172 : vector<8x128xf32>
    %174 = math.exp %173 : vector<8x128xf32>
    %cst_69 = arith.constant 1.000000e+00 : f32
    %175 = vector.broadcast %cst_69 : f32 to vector<8x128xf32>
    %176 = arith.addf %175, %174 : vector<8x128xf32>
    %177 = arith.divf %175, %176 : vector<8x128xf32>
    %178 = vector.extract_strided_slice %171 {offsets = [0, 128], sizes = [8, 128], strides = [1, 1]} : vector<8x512xf32> to vector<8x128xf32>
    %179 = arith.negf %178 : vector<8x128xf32>
    %180 = math.exp %179 : vector<8x128xf32>
    %cst_70 = arith.constant 1.000000e+00 : f32
    %181 = vector.broadcast %cst_70 : f32 to vector<8x128xf32>
    %182 = arith.addf %181, %180 : vector<8x128xf32>
    %183 = arith.divf %181, %182 : vector<8x128xf32>
    %184 = vector.extract_strided_slice %171 {offsets = [0, 256], sizes = [8, 128], strides = [1, 1]} : vector<8x512xf32> to vector<8x128xf32>
    %185 = math.tanh %184 : vector<8x128xf32>
    %186 = vector.extract_strided_slice %171 {offsets = [0, 384], sizes = [8, 128], strides = [1, 1]} : vector<8x512xf32> to vector<8x128xf32>
    %187 = arith.negf %186 : vector<8x128xf32>
    %188 = math.exp %187 : vector<8x128xf32>
    %cst_71 = arith.constant 1.000000e+00 : f32
    %189 = vector.broadcast %cst_71 : f32 to vector<8x128xf32>
    %190 = arith.addf %189, %188 : vector<8x128xf32>
    %191 = arith.divf %189, %190 : vector<8x128xf32>
    %192 = arith.mulf %183, %155 : vector<8x128xf32>
    %193 = arith.mulf %177, %185 : vector<8x128xf32>
    %194 = arith.addf %192, %193 : vector<8x128xf32>
    %195 = math.tanh %194 : vector<8x128xf32>
    %196 = arith.mulf %191, %195 : vector<8x128xf32>
    %c0_72 = arith.constant 0 : index
    %c0_73 = arith.constant 0 : index
    %197 = vector.load %arg4[%c0_72, %c0_73] : memref<128x512xf32, #tpu.memory_space<vmem>>, vector<128x512xf32>
    %cst_74 = arith.constant dense<0.000000e+00> : vector<8x512xf32>
    %198 = tpu.matmul %196, %197, %cst_74 {dimension_numbers = #tpu.dot_dimension_numbers<[1], [0], [0], [1], [0, 0, 1, 1], [], []>} : vector<8x128xf32>, vector<128x512xf32>, vector<8x512xf32> -> vector<8x512xf32>
    %c0_75 = arith.constant 0 : index
    %c0_76 = arith.constant 0 : index
    %199 = vector.load %arg6[%c0_75, %c0_76] : memref<1x512xf32, #tpu.memory_space<vmem>>, vector<1x512xf32>
    %200 = vector.broadcast %199 : vector<1x512xf32> to vector<8x512xf32>
    %201 = arith.addf %198, %200 : vector<8x512xf32>
    %202 = arith.index_cast %166 : i32 to index
    %c0_77 = arith.constant 0 : index
    %203 = vector.load %arg11[%202, %c0_77] : memref<64x512xf32, #tpu.memory_space<vmem>>, vector<8x512xf32>
    tpu.vector_store %arg11[%202, %c0_77], %201 {strides = array<i32>} : memref<64x512xf32, #tpu.memory_space<vmem>>, vector<8x512xf32>,
    %c5_i32 = arith.constant 5 : i32
    %c8_i32_78 = arith.constant 8 : i32
    %204 = arith.muli %c5_i32, %c8_i32_78 : i32
    %205 = tpu.assume_multiple %204, 8 : i32
    %206 = arith.index_cast %205 : i32 to index
    %c0_79 = arith.constant 0 : index
    %207 = vector.load %arg10[%206, %c0_79] : memref<64x512xf32, #tpu.memory_space<vmem>>, vector<8x512xf32>
    %c0_80 = arith.constant 0 : index
    %c0_81 = arith.constant 0 : index
    %208 = vector.load %arg2[%c0_80, %c0_81] : memref<128x512xf32, #tpu.memory_space<vmem>>, vector<128x512xf32>
    %cst_82 = arith.constant dense<0.000000e+00> : vector<8x512xf32>
    %209 = tpu.matmul %196, %208, %cst_82 {dimension_numbers = #tpu.dot_dimension_numbers<[1], [0], [0], [1], [0, 0, 1, 1], [], []>} : vector<8x128xf32>, vector<128x512xf32>, vector<8x512xf32> -> vector<8x512xf32>
    %210 = arith.addf %207, %209 : vector<8x512xf32>
    %211 = vector.extract_strided_slice %210 {offsets = [0, 0], sizes = [8, 128], strides = [1, 1]} : vector<8x512xf32> to vector<8x128xf32>
    %212 = arith.negf %211 : vector<8x128xf32>
    %213 = math.exp %212 : vector<8x128xf32>
    %cst_83 = arith.constant 1.000000e+00 : f32
    %214 = vector.broadcast %cst_83 : f32 to vector<8x128xf32>
    %215 = arith.addf %214, %213 : vector<8x128xf32>
    %216 = arith.divf %214, %215 : vector<8x128xf32>
    %217 = vector.extract_strided_slice %210 {offsets = [0, 128], sizes = [8, 128], strides = [1, 1]} : vector<8x512xf32> to vector<8x128xf32>
    %218 = arith.negf %217 : vector<8x128xf32>
    %219 = math.exp %218 : vector<8x128xf32>
    %cst_84 = arith.constant 1.000000e+00 : f32
    %220 = vector.broadcast %cst_84 : f32 to vector<8x128xf32>
    %221 = arith.addf %220, %219 : vector<8x128xf32>
    %222 = arith.divf %220, %221 : vector<8x128xf32>
    %223 = vector.extract_strided_slice %210 {offsets = [0, 256], sizes = [8, 128], strides = [1, 1]} : vector<8x512xf32> to vector<8x128xf32>
    %224 = math.tanh %223 : vector<8x128xf32>
    %225 = vector.extract_strided_slice %210 {offsets = [0, 384], sizes = [8, 128], strides = [1, 1]} : vector<8x512xf32> to vector<8x128xf32>
    %226 = arith.negf %225 : vector<8x128xf32>
    %227 = math.exp %226 : vector<8x128xf32>
    %cst_85 = arith.constant 1.000000e+00 : f32
    %228 = vector.broadcast %cst_85 : f32 to vector<8x128xf32>
    %229 = arith.addf %228, %227 : vector<8x128xf32>
    %230 = arith.divf %228, %229 : vector<8x128xf32>
    %231 = arith.mulf %222, %194 : vector<8x128xf32>
    %232 = arith.mulf %216, %224 : vector<8x128xf32>
    %233 = arith.addf %231, %232 : vector<8x128xf32>
    %234 = math.tanh %233 : vector<8x128xf32>
    %235 = arith.mulf %230, %234 : vector<8x128xf32>
    %c0_86 = arith.constant 0 : index
    %c0_87 = arith.constant 0 : index
    %236 = vector.load %arg4[%c0_86, %c0_87] : memref<128x512xf32, #tpu.memory_space<vmem>>, vector<128x512xf32>
    %cst_88 = arith.constant dense<0.000000e+00> : vector<8x512xf32>
    %237 = tpu.matmul %235, %236, %cst_88 {dimension_numbers = #tpu.dot_dimension_numbers<[1], [0], [0], [1], [0, 0, 1, 1], [], []>} : vector<8x128xf32>, vector<128x512xf32>, vector<8x512xf32> -> vector<8x512xf32>
    %c0_89 = arith.constant 0 : index
    %c0_90 = arith.constant 0 : index
    %238 = vector.load %arg6[%c0_89, %c0_90] : memref<1x512xf32, #tpu.memory_space<vmem>>, vector<1x512xf32>
    %239 = vector.broadcast %238 : vector<1x512xf32> to vector<8x512xf32>
    %240 = arith.addf %237, %239 : vector<8x512xf32>
    %241 = arith.index_cast %205 : i32 to index
    %c0_91 = arith.constant 0 : index
    %242 = vector.load %arg11[%241, %c0_91] : memref<64x512xf32, #tpu.memory_space<vmem>>, vector<8x512xf32>
    tpu.vector_store %arg11[%241, %c0_91], %240 {strides = array<i32>} : memref<64x512xf32, #tpu.memory_space<vmem>>, vector<8x512xf32>,
    %c6_i32 = arith.constant 6 : i32
    %c8_i32_92 = arith.constant 8 : i32
    %243 = arith.muli %c6_i32, %c8_i32_92 : i32
    %244 = tpu.assume_multiple %243, 8 : i32
    %245 = arith.index_cast %244 : i32 to index
    %c0_93 = arith.constant 0 : index
    %246 = vector.load %arg10[%245, %c0_93] : memref<64x512xf32, #tpu.memory_space<vmem>>, vector<8x512xf32>
    %c0_94 = arith.constant 0 : index
    %c0_95 = arith.constant 0 : index
    %247 = vector.load %arg2[%c0_94, %c0_95] : memref<128x512xf32, #tpu.memory_space<vmem>>, vector<128x512xf32>
    %cst_96 = arith.constant dense<0.000000e+00> : vector<8x512xf32>
    %248 = tpu.matmul %235, %247, %cst_96 {dimension_numbers = #tpu.dot_dimension_numbers<[1], [0], [0], [1], [0, 0, 1, 1], [], []>} : vector<8x128xf32>, vector<128x512xf32>, vector<8x512xf32> -> vector<8x512xf32>
    %249 = arith.addf %246, %248 : vector<8x512xf32>
    %250 = vector.extract_strided_slice %249 {offsets = [0, 0], sizes = [8, 128], strides = [1, 1]} : vector<8x512xf32> to vector<8x128xf32>
    %251 = arith.negf %250 : vector<8x128xf32>
    %252 = math.exp %251 : vector<8x128xf32>
    %cst_97 = arith.constant 1.000000e+00 : f32
    %253 = vector.broadcast %cst_97 : f32 to vector<8x128xf32>
    %254 = arith.addf %253, %252 : vector<8x128xf32>
    %255 = arith.divf %253, %254 : vector<8x128xf32>
    %256 = vector.extract_strided_slice %249 {offsets = [0, 128], sizes = [8, 128], strides = [1, 1]} : vector<8x512xf32> to vector<8x128xf32>
    %257 = arith.negf %256 : vector<8x128xf32>
    %258 = math.exp %257 : vector<8x128xf32>
    %cst_98 = arith.constant 1.000000e+00 : f32
    %259 = vector.broadcast %cst_98 : f32 to vector<8x128xf32>
    %260 = arith.addf %259, %258 : vector<8x128xf32>
    %261 = arith.divf %259, %260 : vector<8x128xf32>
    %262 = vector.extract_strided_slice %249 {offsets = [0, 256], sizes = [8, 128], strides = [1, 1]} : vector<8x512xf32> to vector<8x128xf32>
    %263 = math.tanh %262 : vector<8x128xf32>
    %264 = vector.extract_strided_slice %249 {offsets = [0, 384], sizes = [8, 128], strides = [1, 1]} : vector<8x512xf32> to vector<8x128xf32>
    %265 = arith.negf %264 : vector<8x128xf32>
    %266 = math.exp %265 : vector<8x128xf32>
    %cst_99 = arith.constant 1.000000e+00 : f32
    %267 = vector.broadcast %cst_99 : f32 to vector<8x128xf32>
    %268 = arith.addf %267, %266 : vector<8x128xf32>
    %269 = arith.divf %267, %268 : vector<8x128xf32>
    %270 = arith.mulf %261, %233 : vector<8x128xf32>
    %271 = arith.mulf %255, %263 : vector<8x128xf32>
    %272 = arith.addf %270, %271 : vector<8x128xf32>
    %273 = math.tanh %272 : vector<8x128xf32>
    %274 = arith.mulf %269, %273 : vector<8x128xf32>
    %c0_100 = arith.constant 0 : index
    %c0_101 = arith.constant 0 : index
    %275 = vector.load %arg4[%c0_100, %c0_101] : memref<128x512xf32, #tpu.memory_space<vmem>>, vector<128x512xf32>
    %cst_102 = arith.constant dense<0.000000e+00> : vector<8x512xf32>
    %276 = tpu.matmul %274, %275, %cst_102 {dimension_numbers = #tpu.dot_dimension_numbers<[1], [0], [0], [1], [0, 0, 1, 1], [], []>} : vector<8x128xf32>, vector<128x512xf32>, vector<8x512xf32> -> vector<8x512xf32>
    %c0_103 = arith.constant 0 : index
    %c0_104 = arith.constant 0 : index
    %277 = vector.load %arg6[%c0_103, %c0_104] : memref<1x512xf32, #tpu.memory_space<vmem>>, vector<1x512xf32>
    %278 = vector.broadcast %277 : vector<1x512xf32> to vector<8x512xf32>
    %279 = arith.addf %276, %278 : vector<8x512xf32>
    %280 = arith.index_cast %244 : i32 to index
    %c0_105 = arith.constant 0 : index
    %281 = vector.load %arg11[%280, %c0_105] : memref<64x512xf32, #tpu.memory_space<vmem>>, vector<8x512xf32>
    tpu.vector_store %arg11[%280, %c0_105], %279 {strides = array<i32>} : memref<64x512xf32, #tpu.memory_space<vmem>>, vector<8x512xf32>,
    %c7_i32 = arith.constant 7 : i32
    %c8_i32_106 = arith.constant 8 : i32
    %282 = arith.muli %c7_i32, %c8_i32_106 : i32
    %283 = tpu.assume_multiple %282, 8 : i32
    %284 = arith.index_cast %283 : i32 to index
    %c0_107 = arith.constant 0 : index
    %285 = vector.load %arg10[%284, %c0_107] : memref<64x512xf32, #tpu.memory_space<vmem>>, vector<8x512xf32>
    %c0_108 = arith.constant 0 : index
    %c0_109 = arith.constant 0 : index
    %286 = vector.load %arg2[%c0_108, %c0_109] : memref<128x512xf32, #tpu.memory_space<vmem>>, vector<128x512xf32>
    %cst_110 = arith.constant dense<0.000000e+00> : vector<8x512xf32>
    %287 = tpu.matmul %274, %286, %cst_110 {dimension_numbers = #tpu.dot_dimension_numbers<[1], [0], [0], [1], [0, 0, 1, 1], [], []>} : vector<8x128xf32>, vector<128x512xf32>, vector<8x512xf32> -> vector<8x512xf32>
    %288 = arith.addf %285, %287 : vector<8x512xf32>
    %289 = vector.extract_strided_slice %288 {offsets = [0, 0], sizes = [8, 128], strides = [1, 1]} : vector<8x512xf32> to vector<8x128xf32>
    %290 = arith.negf %289 : vector<8x128xf32>
    %291 = math.exp %290 : vector<8x128xf32>
    %cst_111 = arith.constant 1.000000e+00 : f32
    %292 = vector.broadcast %cst_111 : f32 to vector<8x128xf32>
    %293 = arith.addf %292, %291 : vector<8x128xf32>
    %294 = arith.divf %292, %293 : vector<8x128xf32>
    %295 = vector.extract_strided_slice %288 {offsets = [0, 128], sizes = [8, 128], strides = [1, 1]} : vector<8x512xf32> to vector<8x128xf32>
    %296 = arith.negf %295 : vector<8x128xf32>
    %297 = math.exp %296 : vector<8x128xf32>
    %cst_112 = arith.constant 1.000000e+00 : f32
    %298 = vector.broadcast %cst_112 : f32 to vector<8x128xf32>
    %299 = arith.addf %298, %297 : vector<8x128xf32>
    %300 = arith.divf %298, %299 : vector<8x128xf32>
    %301 = vector.extract_strided_slice %288 {offsets = [0, 256], sizes = [8, 128], strides = [1, 1]} : vector<8x512xf32> to vector<8x128xf32>
    %302 = math.tanh %301 : vector<8x128xf32>
    %303 = vector.extract_strided_slice %288 {offsets = [0, 384], sizes = [8, 128], strides = [1, 1]} : vector<8x512xf32> to vector<8x128xf32>
    %304 = arith.negf %303 : vector<8x128xf32>
    %305 = math.exp %304 : vector<8x128xf32>
    %cst_113 = arith.constant 1.000000e+00 : f32
    %306 = vector.broadcast %cst_113 : f32 to vector<8x128xf32>
    %307 = arith.addf %306, %305 : vector<8x128xf32>
    %308 = arith.divf %306, %307 : vector<8x128xf32>
    %309 = arith.mulf %300, %272 : vector<8x128xf32>
    %310 = arith.mulf %294, %302 : vector<8x128xf32>
    %311 = arith.addf %309, %310 : vector<8x128xf32>
    %312 = math.tanh %311 : vector<8x128xf32>
    %313 = arith.mulf %308, %312 : vector<8x128xf32>
    %c0_114 = arith.constant 0 : index
    %c0_115 = arith.constant 0 : index
    %314 = vector.load %arg4[%c0_114, %c0_115] : memref<128x512xf32, #tpu.memory_space<vmem>>, vector<128x512xf32>
    %cst_116 = arith.constant dense<0.000000e+00> : vector<8x512xf32>
    %315 = tpu.matmul %313, %314, %cst_116 {dimension_numbers = #tpu.dot_dimension_numbers<[1], [0], [0], [1], [0, 0, 1, 1], [], []>} : vector<8x128xf32>, vector<128x512xf32>, vector<8x512xf32> -> vector<8x512xf32>
    %c0_117 = arith.constant 0 : index
    %c0_118 = arith.constant 0 : index
    %316 = vector.load %arg6[%c0_117, %c0_118] : memref<1x512xf32, #tpu.memory_space<vmem>>, vector<1x512xf32>
    %317 = vector.broadcast %316 : vector<1x512xf32> to vector<8x512xf32>
    %318 = arith.addf %315, %317 : vector<8x512xf32>
    %319 = arith.index_cast %283 : i32 to index
    %c0_119 = arith.constant 0 : index
    %320 = vector.load %arg11[%319, %c0_119] : memref<64x512xf32, #tpu.memory_space<vmem>>, vector<8x512xf32>
    tpu.vector_store %arg11[%319, %c0_119], %318 {strides = array<i32>} : memref<64x512xf32, #tpu.memory_space<vmem>>, vector<8x512xf32>,
    %c8_i32_120 = arith.constant 8 : i32
    %cst_121 = arith.constant 0.000000e+00 : f32
    %321 = vector.broadcast %cst_121 : f32 to vector<8x128xf32>
    %cst_122 = arith.constant 0.000000e+00 : f32
    %322 = vector.broadcast %cst_122 : f32 to vector<8x128xf32>
    %c0_i32_123 = arith.constant 0 : i32
    %c8_i32_124 = arith.constant 8 : i32
    %323 = arith.muli %c0_i32_123, %c8_i32_124 : i32
    %324 = tpu.assume_multiple %323, 8 : i32
    %325 = arith.index_cast %324 : i32 to index
    %c0_125 = arith.constant 0 : index
    %326 = vector.load %arg11[%325, %c0_125] : memref<64x512xf32, #tpu.memory_space<vmem>>, vector<8x512xf32>
    %c0_126 = arith.constant 0 : index
    %c0_127 = arith.constant 0 : index
    %327 = vector.load %arg5[%c0_126, %c0_127] : memref<128x512xf32, #tpu.memory_space<vmem>>, vector<128x512xf32>
    %cst_128 = arith.constant dense<0.000000e+00> : vector<8x512xf32>
    %328 = tpu.matmul %321, %327, %cst_128 {dimension_numbers = #tpu.dot_dimension_numbers<[1], [0], [0], [1], [0, 0, 1, 1], [], []>} : vector<8x128xf32>, vector<128x512xf32>, vector<8x512xf32> -> vector<8x512xf32>
    %329 = arith.addf %326, %328 : vector<8x512xf32>
    %330 = vector.extract_strided_slice %329 {offsets = [0, 0], sizes = [8, 128], strides = [1, 1]} : vector<8x512xf32> to vector<8x128xf32>
    %331 = arith.negf %330 : vector<8x128xf32>
    %332 = math.exp %331 : vector<8x128xf32>
    %cst_129 = arith.constant 1.000000e+00 : f32
    %333 = vector.broadcast %cst_129 : f32 to vector<8x128xf32>
    %334 = arith.addf %333, %332 : vector<8x128xf32>
    %335 = arith.divf %333, %334 : vector<8x128xf32>
    %336 = vector.extract_strided_slice %329 {offsets = [0, 128], sizes = [8, 128], strides = [1, 1]} : vector<8x512xf32> to vector<8x128xf32>
    %337 = arith.negf %336 : vector<8x128xf32>
    %338 = math.exp %337 : vector<8x128xf32>
    %cst_130 = arith.constant 1.000000e+00 : f32
    %339 = vector.broadcast %cst_130 : f32 to vector<8x128xf32>
    %340 = arith.addf %339, %338 : vector<8x128xf32>
    %341 = arith.divf %339, %340 : vector<8x128xf32>
    %342 = vector.extract_strided_slice %329 {offsets = [0, 256], sizes = [8, 128], strides = [1, 1]} : vector<8x512xf32> to vector<8x128xf32>
    %343 = math.tanh %342 : vector<8x128xf32>
    %344 = vector.extract_strided_slice %329 {offsets = [0, 384], sizes = [8, 128], strides = [1, 1]} : vector<8x512xf32> to vector<8x128xf32>
    %345 = arith.negf %344 : vector<8x128xf32>
    %346 = math.exp %345 : vector<8x128xf32>
    %cst_131 = arith.constant 1.000000e+00 : f32
    %347 = vector.broadcast %cst_131 : f32 to vector<8x128xf32>
    %348 = arith.addf %347, %346 : vector<8x128xf32>
    %349 = arith.divf %347, %348 : vector<8x128xf32>
    %350 = arith.mulf %341, %322 : vector<8x128xf32>
    %351 = arith.mulf %335, %343 : vector<8x128xf32>
    %352 = arith.addf %350, %351 : vector<8x128xf32>
    %353 = math.tanh %352 : vector<8x128xf32>
    %354 = arith.mulf %349, %353 : vector<8x128xf32>
    %c1_i32_132 = arith.constant 1 : i32
    %c8_i32_133 = arith.constant 8 : i32
    %355 = arith.muli %c1_i32_132, %c8_i32_133 : i32
    %356 = tpu.assume_multiple %355, 8 : i32
    %357 = arith.index_cast %356 : i32 to index
    %c0_134 = arith.constant 0 : index
    %358 = vector.load %arg11[%357, %c0_134] : memref<64x512xf32, #tpu.memory_space<vmem>>, vector<8x512xf32>
    %c0_135 = arith.constant 0 : index
    %c0_136 = arith.constant 0 : index
    %359 = vector.load %arg5[%c0_135, %c0_136] : memref<128x512xf32, #tpu.memory_space<vmem>>, vector<128x512xf32>
    %cst_137 = arith.constant dense<0.000000e+00> : vector<8x512xf32>
    %360 = tpu.matmul %354, %359, %cst_137 {dimension_numbers = #tpu.dot_dimension_numbers<[1], [0], [0], [1], [0, 0, 1, 1], [], []>} : vector<8x128xf32>, vector<128x512xf32>, vector<8x512xf32> -> vector<8x512xf32>
    %361 = arith.addf %358, %360 : vector<8x512xf32>
    %362 = vector.extract_strided_slice %361 {offsets = [0, 0], sizes = [8, 128], strides = [1, 1]} : vector<8x512xf32> to vector<8x128xf32>
    %363 = arith.negf %362 : vector<8x128xf32>
    %364 = math.exp %363 : vector<8x128xf32>
    %cst_138 = arith.constant 1.000000e+00 : f32
    %365 = vector.broadcast %cst_138 : f32 to vector<8x128xf32>
    %366 = arith.addf %365, %364 : vector<8x128xf32>
    %367 = arith.divf %365, %366 : vector<8x128xf32>
    %368 = vector.extract_strided_slice %361 {offsets = [0, 128], sizes = [8, 128], strides = [1, 1]} : vector<8x512xf32> to vector<8x128xf32>
    %369 = arith.negf %368 : vector<8x128xf32>
    %370 = math.exp %369 : vector<8x128xf32>
    %cst_139 = arith.constant 1.000000e+00 : f32
    %371 = vector.broadcast %cst_139 : f32 to vector<8x128xf32>
    %372 = arith.addf %371, %370 : vector<8x128xf32>
    %373 = arith.divf %371, %372 : vector<8x128xf32>
    %374 = vector.extract_strided_slice %361 {offsets = [0, 256], sizes = [8, 128], strides = [1, 1]} : vector<8x512xf32> to vector<8x128xf32>
    %375 = math.tanh %374 : vector<8x128xf32>
    %376 = vector.extract_strided_slice %361 {offsets = [0, 384], sizes = [8, 128], strides = [1, 1]} : vector<8x512xf32> to vector<8x128xf32>
    %377 = arith.negf %376 : vector<8x128xf32>
    %378 = math.exp %377 : vector<8x128xf32>
    %cst_140 = arith.constant 1.000000e+00 : f32
    %379 = vector.broadcast %cst_140 : f32 to vector<8x128xf32>
    %380 = arith.addf %379, %378 : vector<8x128xf32>
    %381 = arith.divf %379, %380 : vector<8x128xf32>
    %382 = arith.mulf %373, %352 : vector<8x128xf32>
    %383 = arith.mulf %367, %375 : vector<8x128xf32>
    %384 = arith.addf %382, %383 : vector<8x128xf32>
    %385 = math.tanh %384 : vector<8x128xf32>
    %386 = arith.mulf %381, %385 : vector<8x128xf32>
    %c2_i32_141 = arith.constant 2 : i32
    %c8_i32_142 = arith.constant 8 : i32
    %387 = arith.muli %c2_i32_141, %c8_i32_142 : i32
    %388 = tpu.assume_multiple %387, 8 : i32
    %389 = arith.index_cast %388 : i32 to index
    %c0_143 = arith.constant 0 : index
    %390 = vector.load %arg11[%389, %c0_143] : memref<64x512xf32, #tpu.memory_space<vmem>>, vector<8x512xf32>
    %c0_144 = arith.constant 0 : index
    %c0_145 = arith.constant 0 : index
    %391 = vector.load %arg5[%c0_144, %c0_145] : memref<128x512xf32, #tpu.memory_space<vmem>>, vector<128x512xf32>
    %cst_146 = arith.constant dense<0.000000e+00> : vector<8x512xf32>
    %392 = tpu.matmul %386, %391, %cst_146 {dimension_numbers = #tpu.dot_dimension_numbers<[1], [0], [0], [1], [0, 0, 1, 1], [], []>} : vector<8x128xf32>, vector<128x512xf32>, vector<8x512xf32> -> vector<8x512xf32>
    %393 = arith.addf %390, %392 : vector<8x512xf32>
    %394 = vector.extract_strided_slice %393 {offsets = [0, 0], sizes = [8, 128], strides = [1, 1]} : vector<8x512xf32> to vector<8x128xf32>
    %395 = arith.negf %394 : vector<8x128xf32>
    %396 = math.exp %395 : vector<8x128xf32>
    %cst_147 = arith.constant 1.000000e+00 : f32
    %397 = vector.broadcast %cst_147 : f32 to vector<8x128xf32>
    %398 = arith.addf %397, %396 : vector<8x128xf32>
    %399 = arith.divf %397, %398 : vector<8x128xf32>
    %400 = vector.extract_strided_slice %393 {offsets = [0, 128], sizes = [8, 128], strides = [1, 1]} : vector<8x512xf32> to vector<8x128xf32>
    %401 = arith.negf %400 : vector<8x128xf32>
    %402 = math.exp %401 : vector<8x128xf32>
    %cst_148 = arith.constant 1.000000e+00 : f32
    %403 = vector.broadcast %cst_148 : f32 to vector<8x128xf32>
    %404 = arith.addf %403, %402 : vector<8x128xf32>
    %405 = arith.divf %403, %404 : vector<8x128xf32>
    %406 = vector.extract_strided_slice %393 {offsets = [0, 256], sizes = [8, 128], strides = [1, 1]} : vector<8x512xf32> to vector<8x128xf32>
    %407 = math.tanh %406 : vector<8x128xf32>
    %408 = vector.extract_strided_slice %393 {offsets = [0, 384], sizes = [8, 128], strides = [1, 1]} : vector<8x512xf32> to vector<8x128xf32>
    %409 = arith.negf %408 : vector<8x128xf32>
    %410 = math.exp %409 : vector<8x128xf32>
    %cst_149 = arith.constant 1.000000e+00 : f32
    %411 = vector.broadcast %cst_149 : f32 to vector<8x128xf32>
    %412 = arith.addf %411, %410 : vector<8x128xf32>
    %413 = arith.divf %411, %412 : vector<8x128xf32>
    %414 = arith.mulf %405, %384 : vector<8x128xf32>
    %415 = arith.mulf %399, %407 : vector<8x128xf32>
    %416 = arith.addf %414, %415 : vector<8x128xf32>
    %417 = math.tanh %416 : vector<8x128xf32>
    %418 = arith.mulf %413, %417 : vector<8x128xf32>
    %c3_i32_150 = arith.constant 3 : i32
    %c8_i32_151 = arith.constant 8 : i32
    %419 = arith.muli %c3_i32_150, %c8_i32_151 : i32
    %420 = tpu.assume_multiple %419, 8 : i32
    %421 = arith.index_cast %420 : i32 to index
    %c0_152 = arith.constant 0 : index
    %422 = vector.load %arg11[%421, %c0_152] : memref<64x512xf32, #tpu.memory_space<vmem>>, vector<8x512xf32>
    %c0_153 = arith.constant 0 : index
    %c0_154 = arith.constant 0 : index
    %423 = vector.load %arg5[%c0_153, %c0_154] : memref<128x512xf32, #tpu.memory_space<vmem>>, vector<128x512xf32>
    %cst_155 = arith.constant dense<0.000000e+00> : vector<8x512xf32>
    %424 = tpu.matmul %418, %423, %cst_155 {dimension_numbers = #tpu.dot_dimension_numbers<[1], [0], [0], [1], [0, 0, 1, 1], [], []>} : vector<8x128xf32>, vector<128x512xf32>, vector<8x512xf32> -> vector<8x512xf32>
    %425 = arith.addf %422, %424 : vector<8x512xf32>
    %426 = vector.extract_strided_slice %425 {offsets = [0, 0], sizes = [8, 128], strides = [1, 1]} : vector<8x512xf32> to vector<8x128xf32>
    %427 = arith.negf %426 : vector<8x128xf32>
    %428 = math.exp %427 : vector<8x128xf32>
    %cst_156 = arith.constant 1.000000e+00 : f32
    %429 = vector.broadcast %cst_156 : f32 to vector<8x128xf32>
    %430 = arith.addf %429, %428 : vector<8x128xf32>
    %431 = arith.divf %429, %430 : vector<8x128xf32>
    %432 = vector.extract_strided_slice %425 {offsets = [0, 128], sizes = [8, 128], strides = [1, 1]} : vector<8x512xf32> to vector<8x128xf32>
    %433 = arith.negf %432 : vector<8x128xf32>
    %434 = math.exp %433 : vector<8x128xf32>
    %cst_157 = arith.constant 1.000000e+00 : f32
    %435 = vector.broadcast %cst_157 : f32 to vector<8x128xf32>
    %436 = arith.addf %435, %434 : vector<8x128xf32>
    %437 = arith.divf %435, %436 : vector<8x128xf32>
    %438 = vector.extract_strided_slice %425 {offsets = [0, 256], sizes = [8, 128], strides = [1, 1]} : vector<8x512xf32> to vector<8x128xf32>
    %439 = math.tanh %438 : vector<8x128xf32>
    %440 = vector.extract_strided_slice %425 {offsets = [0, 384], sizes = [8, 128], strides = [1, 1]} : vector<8x512xf32> to vector<8x128xf32>
    %441 = arith.negf %440 : vector<8x128xf32>
    %442 = math.exp %441 : vector<8x128xf32>
    %cst_158 = arith.constant 1.000000e+00 : f32
    %443 = vector.broadcast %cst_158 : f32 to vector<8x128xf32>
    %444 = arith.addf %443, %442 : vector<8x128xf32>
    %445 = arith.divf %443, %444 : vector<8x128xf32>
    %446 = arith.mulf %437, %416 : vector<8x128xf32>
    %447 = arith.mulf %431, %439 : vector<8x128xf32>
    %448 = arith.addf %446, %447 : vector<8x128xf32>
    %449 = math.tanh %448 : vector<8x128xf32>
    %450 = arith.mulf %445, %449 : vector<8x128xf32>
    %c4_i32_159 = arith.constant 4 : i32
    %c8_i32_160 = arith.constant 8 : i32
    %451 = arith.muli %c4_i32_159, %c8_i32_160 : i32
    %452 = tpu.assume_multiple %451, 8 : i32
    %453 = arith.index_cast %452 : i32 to index
    %c0_161 = arith.constant 0 : index
    %454 = vector.load %arg11[%453, %c0_161] : memref<64x512xf32, #tpu.memory_space<vmem>>, vector<8x512xf32>
    %c0_162 = arith.constant 0 : index
    %c0_163 = arith.constant 0 : index
    %455 = vector.load %arg5[%c0_162, %c0_163] : memref<128x512xf32, #tpu.memory_space<vmem>>, vector<128x512xf32>
    %cst_164 = arith.constant dense<0.000000e+00> : vector<8x512xf32>
    %456 = tpu.matmul %450, %455, %cst_164 {dimension_numbers = #tpu.dot_dimension_numbers<[1], [0], [0], [1], [0, 0, 1, 1], [], []>} : vector<8x128xf32>, vector<128x512xf32>, vector<8x512xf32> -> vector<8x512xf32>
    %457 = arith.addf %454, %456 : vector<8x512xf32>
    %458 = vector.extract_strided_slice %457 {offsets = [0, 0], sizes = [8, 128], strides = [1, 1]} : vector<8x512xf32> to vector<8x128xf32>
    %459 = arith.negf %458 : vector<8x128xf32>
    %460 = math.exp %459 : vector<8x128xf32>
    %cst_165 = arith.constant 1.000000e+00 : f32
    %461 = vector.broadcast %cst_165 : f32 to vector<8x128xf32>
    %462 = arith.addf %461, %460 : vector<8x128xf32>
    %463 = arith.divf %461, %462 : vector<8x128xf32>
    %464 = vector.extract_strided_slice %457 {offsets = [0, 128], sizes = [8, 128], strides = [1, 1]} : vector<8x512xf32> to vector<8x128xf32>
    %465 = arith.negf %464 : vector<8x128xf32>
    %466 = math.exp %465 : vector<8x128xf32>
    %cst_166 = arith.constant 1.000000e+00 : f32
    %467 = vector.broadcast %cst_166 : f32 to vector<8x128xf32>
    %468 = arith.addf %467, %466 : vector<8x128xf32>
    %469 = arith.divf %467, %468 : vector<8x128xf32>
    %470 = vector.extract_strided_slice %457 {offsets = [0, 256], sizes = [8, 128], strides = [1, 1]} : vector<8x512xf32> to vector<8x128xf32>
    %471 = math.tanh %470 : vector<8x128xf32>
    %472 = vector.extract_strided_slice %457 {offsets = [0, 384], sizes = [8, 128], strides = [1, 1]} : vector<8x512xf32> to vector<8x128xf32>
    %473 = arith.negf %472 : vector<8x128xf32>
    %474 = math.exp %473 : vector<8x128xf32>
    %cst_167 = arith.constant 1.000000e+00 : f32
    %475 = vector.broadcast %cst_167 : f32 to vector<8x128xf32>
    %476 = arith.addf %475, %474 : vector<8x128xf32>
    %477 = arith.divf %475, %476 : vector<8x128xf32>
    %478 = arith.mulf %469, %448 : vector<8x128xf32>
    %479 = arith.mulf %463, %471 : vector<8x128xf32>
    %480 = arith.addf %478, %479 : vector<8x128xf32>
    %481 = math.tanh %480 : vector<8x128xf32>
    %482 = arith.mulf %477, %481 : vector<8x128xf32>
    %c5_i32_168 = arith.constant 5 : i32
    %c8_i32_169 = arith.constant 8 : i32
    %483 = arith.muli %c5_i32_168, %c8_i32_169 : i32
    %484 = tpu.assume_multiple %483, 8 : i32
    %485 = arith.index_cast %484 : i32 to index
    %c0_170 = arith.constant 0 : index
    %486 = vector.load %arg11[%485, %c0_170] : memref<64x512xf32, #tpu.memory_space<vmem>>, vector<8x512xf32>
    %c0_171 = arith.constant 0 : index
    %c0_172 = arith.constant 0 : index
    %487 = vector.load %arg5[%c0_171, %c0_172] : memref<128x512xf32, #tpu.memory_space<vmem>>, vector<128x512xf32>
    %cst_173 = arith.constant dense<0.000000e+00> : vector<8x512xf32>
    %488 = tpu.matmul %482, %487, %cst_173 {dimension_numbers = #tpu.dot_dimension_numbers<[1], [0], [0], [1], [0, 0, 1, 1], [], []>} : vector<8x128xf32>, vector<128x512xf32>, vector<8x512xf32> -> vector<8x512xf32>
    %489 = arith.addf %486, %488 : vector<8x512xf32>
    %490 = vector.extract_strided_slice %489 {offsets = [0, 0], sizes = [8, 128], strides = [1, 1]} : vector<8x512xf32> to vector<8x128xf32>
    %491 = arith.negf %490 : vector<8x128xf32>
    %492 = math.exp %491 : vector<8x128xf32>
    %cst_174 = arith.constant 1.000000e+00 : f32
    %493 = vector.broadcast %cst_174 : f32 to vector<8x128xf32>
    %494 = arith.addf %493, %492 : vector<8x128xf32>
    %495 = arith.divf %493, %494 : vector<8x128xf32>
    %496 = vector.extract_strided_slice %489 {offsets = [0, 128], sizes = [8, 128], strides = [1, 1]} : vector<8x512xf32> to vector<8x128xf32>
    %497 = arith.negf %496 : vector<8x128xf32>
    %498 = math.exp %497 : vector<8x128xf32>
    %cst_175 = arith.constant 1.000000e+00 : f32
    %499 = vector.broadcast %cst_175 : f32 to vector<8x128xf32>
    %500 = arith.addf %499, %498 : vector<8x128xf32>
    %501 = arith.divf %499, %500 : vector<8x128xf32>
    %502 = vector.extract_strided_slice %489 {offsets = [0, 256], sizes = [8, 128], strides = [1, 1]} : vector<8x512xf32> to vector<8x128xf32>
    %503 = math.tanh %502 : vector<8x128xf32>
    %504 = vector.extract_strided_slice %489 {offsets = [0, 384], sizes = [8, 128], strides = [1, 1]} : vector<8x512xf32> to vector<8x128xf32>
    %505 = arith.negf %504 : vector<8x128xf32>
    %506 = math.exp %505 : vector<8x128xf32>
    %cst_176 = arith.constant 1.000000e+00 : f32
    %507 = vector.broadcast %cst_176 : f32 to vector<8x128xf32>
    %508 = arith.addf %507, %506 : vector<8x128xf32>
    %509 = arith.divf %507, %508 : vector<8x128xf32>
    %510 = arith.mulf %501, %480 : vector<8x128xf32>
    %511 = arith.mulf %495, %503 : vector<8x128xf32>
    %512 = arith.addf %510, %511 : vector<8x128xf32>
    %513 = math.tanh %512 : vector<8x128xf32>
    %514 = arith.mulf %509, %513 : vector<8x128xf32>
    %c6_i32_177 = arith.constant 6 : i32
    %c8_i32_178 = arith.constant 8 : i32
    %515 = arith.muli %c6_i32_177, %c8_i32_178 : i32
    %516 = tpu.assume_multiple %515, 8 : i32
    %517 = arith.index_cast %516 : i32 to index
    %c0_179 = arith.constant 0 : index
    %518 = vector.load %arg11[%517, %c0_179] : memref<64x512xf32, #tpu.memory_space<vmem>>, vector<8x512xf32>
    %c0_180 = arith.constant 0 : index
    %c0_181 = arith.constant 0 : index
    %519 = vector.load %arg5[%c0_180, %c0_181] : memref<128x512xf32, #tpu.memory_space<vmem>>, vector<128x512xf32>
    %cst_182 = arith.constant dense<0.000000e+00> : vector<8x512xf32>
    %520 = tpu.matmul %514, %519, %cst_182 {dimension_numbers = #tpu.dot_dimension_numbers<[1], [0], [0], [1], [0, 0, 1, 1], [], []>} : vector<8x128xf32>, vector<128x512xf32>, vector<8x512xf32> -> vector<8x512xf32>
    %521 = arith.addf %518, %520 : vector<8x512xf32>
    %522 = vector.extract_strided_slice %521 {offsets = [0, 0], sizes = [8, 128], strides = [1, 1]} : vector<8x512xf32> to vector<8x128xf32>
    %523 = arith.negf %522 : vector<8x128xf32>
    %524 = math.exp %523 : vector<8x128xf32>
    %cst_183 = arith.constant 1.000000e+00 : f32
    %525 = vector.broadcast %cst_183 : f32 to vector<8x128xf32>
    %526 = arith.addf %525, %524 : vector<8x128xf32>
    %527 = arith.divf %525, %526 : vector<8x128xf32>
    %528 = vector.extract_strided_slice %521 {offsets = [0, 128], sizes = [8, 128], strides = [1, 1]} : vector<8x512xf32> to vector<8x128xf32>
    %529 = arith.negf %528 : vector<8x128xf32>
    %530 = math.exp %529 : vector<8x128xf32>
    %cst_184 = arith.constant 1.000000e+00 : f32
    %531 = vector.broadcast %cst_184 : f32 to vector<8x128xf32>
    %532 = arith.addf %531, %530 : vector<8x128xf32>
    %533 = arith.divf %531, %532 : vector<8x128xf32>
    %534 = vector.extract_strided_slice %521 {offsets = [0, 256], sizes = [8, 128], strides = [1, 1]} : vector<8x512xf32> to vector<8x128xf32>
    %535 = math.tanh %534 : vector<8x128xf32>
    %536 = vector.extract_strided_slice %521 {offsets = [0, 384], sizes = [8, 128], strides = [1, 1]} : vector<8x512xf32> to vector<8x128xf32>
    %537 = arith.negf %536 : vector<8x128xf32>
    %538 = math.exp %537 : vector<8x128xf32>
    %cst_185 = arith.constant 1.000000e+00 : f32
    %539 = vector.broadcast %cst_185 : f32 to vector<8x128xf32>
    %540 = arith.addf %539, %538 : vector<8x128xf32>
    %541 = arith.divf %539, %540 : vector<8x128xf32>
    %542 = arith.mulf %533, %512 : vector<8x128xf32>
    %543 = arith.mulf %527, %535 : vector<8x128xf32>
    %544 = arith.addf %542, %543 : vector<8x128xf32>
    %545 = math.tanh %544 : vector<8x128xf32>
    %546 = arith.mulf %541, %545 : vector<8x128xf32>
    %c7_i32_186 = arith.constant 7 : i32
    %c8_i32_187 = arith.constant 8 : i32
    %547 = arith.muli %c7_i32_186, %c8_i32_187 : i32
    %548 = tpu.assume_multiple %547, 8 : i32
    %549 = arith.index_cast %548 : i32 to index
    %c0_188 = arith.constant 0 : index
    %550 = vector.load %arg11[%549, %c0_188] : memref<64x512xf32, #tpu.memory_space<vmem>>, vector<8x512xf32>
    %c0_189 = arith.constant 0 : index
    %c0_190 = arith.constant 0 : index
    %551 = vector.load %arg5[%c0_189, %c0_190] : memref<128x512xf32, #tpu.memory_space<vmem>>, vector<128x512xf32>
    %cst_191 = arith.constant dense<0.000000e+00> : vector<8x512xf32>
    %552 = tpu.matmul %546, %551, %cst_191 {dimension_numbers = #tpu.dot_dimension_numbers<[1], [0], [0], [1], [0, 0, 1, 1], [], []>} : vector<8x128xf32>, vector<128x512xf32>, vector<8x512xf32> -> vector<8x512xf32>
    %553 = arith.addf %550, %552 : vector<8x512xf32>
    %554 = vector.extract_strided_slice %553 {offsets = [0, 0], sizes = [8, 128], strides = [1, 1]} : vector<8x512xf32> to vector<8x128xf32>
    %555 = arith.negf %554 : vector<8x128xf32>
    %556 = math.exp %555 : vector<8x128xf32>
    %cst_192 = arith.constant 1.000000e+00 : f32
    %557 = vector.broadcast %cst_192 : f32 to vector<8x128xf32>
    %558 = arith.addf %557, %556 : vector<8x128xf32>
    %559 = arith.divf %557, %558 : vector<8x128xf32>
    %560 = vector.extract_strided_slice %553 {offsets = [0, 128], sizes = [8, 128], strides = [1, 1]} : vector<8x512xf32> to vector<8x128xf32>
    %561 = arith.negf %560 : vector<8x128xf32>
    %562 = math.exp %561 : vector<8x128xf32>
    %cst_193 = arith.constant 1.000000e+00 : f32
    %563 = vector.broadcast %cst_193 : f32 to vector<8x128xf32>
    %564 = arith.addf %563, %562 : vector<8x128xf32>
    %565 = arith.divf %563, %564 : vector<8x128xf32>
    %566 = vector.extract_strided_slice %553 {offsets = [0, 256], sizes = [8, 128], strides = [1, 1]} : vector<8x512xf32> to vector<8x128xf32>
    %567 = math.tanh %566 : vector<8x128xf32>
    %568 = vector.extract_strided_slice %553 {offsets = [0, 384], sizes = [8, 128], strides = [1, 1]} : vector<8x512xf32> to vector<8x128xf32>
    %569 = arith.negf %568 : vector<8x128xf32>
    %570 = math.exp %569 : vector<8x128xf32>
    %cst_194 = arith.constant 1.000000e+00 : f32
    %571 = vector.broadcast %cst_194 : f32 to vector<8x128xf32>
    %572 = arith.addf %571, %570 : vector<8x128xf32>
    %573 = arith.divf %571, %572 : vector<8x128xf32>
    %574 = arith.mulf %565, %544 : vector<8x128xf32>
    %575 = arith.mulf %559, %567 : vector<8x128xf32>
    %576 = arith.addf %574, %575 : vector<8x128xf32>
    %577 = math.tanh %576 : vector<8x128xf32>
    %578 = arith.mulf %573, %577 : vector<8x128xf32>
    %c8_i32_195 = arith.constant 8 : i32
    %c0_196 = arith.constant 0 : index
    %c0_197 = arith.constant 0 : index
    %579 = vector.load %arg7[%c0_196, %c0_197] : memref<128x4xf32, #tpu.memory_space<vmem>>, vector<128x4xf32>
    %cst_198 = arith.constant dense<0.000000e+00> : vector<8x4xf32>
    %580 = tpu.matmul %578, %579, %cst_198 {dimension_numbers = #tpu.dot_dimension_numbers<[1], [0], [0], [1], [0, 0, 1, 1], [], []>} : vector<8x128xf32>, vector<128x4xf32>, vector<8x4xf32> -> vector<8x4xf32>
    %c0_199 = arith.constant 0 : index
    %c0_200 = arith.constant 0 : index
    %581 = vector.load %arg8[%c0_199, %c0_200] : memref<1x4xf32, #tpu.memory_space<vmem>>, vector<1x4xf32>
    %582 = vector.broadcast %581 : vector<1x4xf32> to vector<8x4xf32>
    %583 = arith.addf %580, %582 : vector<8x4xf32>
    %c0_201 = arith.constant 0 : index
    %c0_202 = arith.constant 0 : index
    %584 = vector.load %arg9[%c0_201, %c0_202] : memref<8x4xf32, #tpu.memory_space<vmem>>, vector<8x4xf32>
    tpu.vector_store %arg9[%c0_201, %c0_202], %583 {strides = array<i32>} : memref<8x4xf32, #tpu.memory_space<vmem>>, vector<8x4xf32>,
    return
  }
}

</mosaic_0001>

<bundles_post_ra>
// kernel: time_series_model_forward.1
= control target key start
LH: loop header
LB: loop body
LE: loop exit
PB: predicated region body
PF: predicated region fallthrough
CT: control target
= control target key end

     0   :  { %14 = vsyncpa [#allocation5], 0  ;;  %s9738_s0 = inlined_call_operand.vmem [shape: f32[64,16], index: 0, kind: input, shape index: {}]   ;;  %s9739_s1 = inlined_call_operand.vmem [shape: f32[16,512], index: 1, kind: input, shape index: {}]   ;;  %s9740_s2 = inlined_call_operand.hbm [shape: f32[128,512], index: 2, kind: input, shape index: {}]   ;;  %s9741_s3 = inlined_call_operand.vmem [shape: f32[1,512], index: 3, kind: input, shape index: {}]   ;;  %s9742_s4 = inlined_call_operand.hbm [shape: f32[128,512], index: 4, kind: input, shape index: {}]   ;;  %s9743_s5 = inlined_call_operand.hbm [shape: f32[128,512], index: 5, kind: input, shape index: {}]   ;;  %s9744_s6 = inlined_call_operand.vmem [shape: f32[1,512], index: 6, kind: input, shape index: {}]   ;;  %s9745_s7 = inlined_call_operand.vmem [shape: f32[128,4], index: 7, kind: input, shape index: {}]   ;;  %s9746_s8 = inlined_call_operand.vmem [shape: f32[1,4], index: 8, kind: input, shape index: {}]   ;;  %s9747_s9 = inlined_call_operand.vmem [shape: f32[8,4], index: 9, kind: output, shape index: {}]  }
   0x1   :  { %15 = vsyncpa [#allocation7], 0  ;;  %s7912_s30 = smov [#allocation6]   ;;  %s7913_s11 = smov [#allocation4]  }
   0x2   :  { %s39_s10 = sshll.u32 %s7912_s30, 4  ;;  %s25_s12 = sshll.u32 %s7913_s11, 4  ;;  %s40_s10 = int_to_ptr.vmem [resolvable:$true] %s39_s10  ;;  %s7970_s12 = int_to_ptr.vmem [resolvable:$true] %s25_s12 }
   0x3   :  { %s7842_s15 = scalar_lea.hbm %s9742_s4, 8192 }
   0x4   :  { %p7843_p0 = scmp.ne.s32.totalorder %s9742_s4, %s7842_s15  ;;  %p7846_p1 = scmp.lt.u32.totalorder %s7842_s15, %s9742_s4 }
   0x6   :  { %p7848_p2 = pnand %p7846_p1, %p7843_p0 }
   0x8   :  { %7851 = shalt.err (!%p7848_p2)
}
   0x9   :  { %s7852_s20 = scalar_lea.vmem %s40_s10, 8192  ;;  %p7857_p4 = scmp.lt.s32.totalorder %s40_s10, %s40_s10 }
   0xa   :  { %p7853_p3 = scmp.ne.s32.totalorder %s40_s10, %s7852_s20  ;;  %p7858_p5 = scmp.lt.s32.totalorder %s7852_s20, %s7852_s20 }
   0xc   :  { %p7859_p6 = por %p7858_p5, %p7857_p4 }
   0xe   :  { %p7860_p7 = pnand %p7859_p6, %p7853_p3 }
  0x10   :  { %7863 = shalt.err (!%p7860_p7)
}
  0x11   :  { %s7914_s21 = smov 512   ;;  %s7915_s22 = smov 32  }
  0x12   :  { %45 = dma.hbm_to_vmem [thread:$0]  %s9742_s4, 8192, %s40_s10, [#allocation7], %s7914_s21, %s7914_s21, %s7915_s22  }
  0x13   :  { %s7864_s27 = scalar_lea.hbm %s9740_s2, 8192 }
  0x14   :  { %p7865_p8 = scmp.ne.s32.totalorder %s9740_s2, %s7864_s27  ;;  %p7868_p9 = scmp.lt.u32.totalorder %s7864_s27, %s9740_s2 }
  0x16   :  { %p7870_p10 = pnand %p7868_p9, %p7865_p8 }
  0x18   :  { %7873 = shalt.err (!%p7870_p10)
}
  0x19   :  { %s7874_s13 = scalar_lea.vmem %s7970_s12, 8192  ;;  %p7879_p12 = scmp.lt.s32.totalorder %s7970_s12, %s7970_s12 }
  0x1a   :  { %p7875_p11 = scmp.ne.s32.totalorder %s7970_s12, %s7874_s13  ;;  %p7880_p13 = scmp.lt.s32.totalorder %s7874_s13, %s7874_s13 }
  0x1c   :  { %p7881_p0 = por %p7880_p13, %p7879_p12 }
  0x1e   :  { %p7882_p1 = pnand %p7881_p0, %p7875_p11 }
  0x20   :  { %7885 = shalt.err (!%p7882_p1)
}
  0x21   :  { %31 = dma.hbm_to_vmem [thread:$0]  %s9740_s2, 8192, %s7970_s12, [#allocation5], %s7914_s21, %s7914_s21, %s7915_s22  }
  0x22   :  { %s7916_s14 = smov [#allocation8]   ;;  %s7886_s18 = scalar_lea.hbm %s9743_s5, 8192 }
  0x23   :  { %s51_s15 = sshll.u32 %s7916_s14, 4  ;;  %p7887_p2 = scmp.ne.s32.totalorder %s9743_s5, %s7886_s18  ;;  %s52_s15 = int_to_ptr.vmem [resolvable:$true] %s51_s15 }
  0x24   :  { %p7890_p3 = scmp.lt.u32.totalorder %s7886_s18, %s9743_s5 }
  0x26   :  { %p7892_p4 = pnand %p7890_p3, %p7887_p2 }
  0x28   :  { %7895 = shalt.err (!%p7892_p4)
}
  0x29   :  { %s7896_s25 = scalar_lea.vmem %s52_s15, 8192  ;;  %p7901_p6 = scmp.lt.s32.totalorder %s52_s15, %s52_s15 }
  0x2a   :  { %p7897_p5 = scmp.ne.s32.totalorder %s52_s15, %s7896_s25  ;;  %p7902_p7 = scmp.lt.s32.totalorder %s7896_s25, %s7896_s25 }
  0x2c   :  { %p7903_p8 = por %p7902_p7, %p7901_p6 }
  0x2e   :  { %p7904_p9 = pnand %p7903_p8, %p7897_p5 }
  0x30   :  { %7907 = shalt.err (!%p7904_p9)
}
  0x31   :  { %57 = dma.hbm_to_vmem [thread:$0]  %s9743_s5, 8192, %s52_s15, [#allocation7], %s7914_s21, %s7914_s21, %s7915_s22  }
  0x32   :  { %7908 = dma.done.wait [#allocation5], 8192  }
  0x33   :  { %7909 = vsyncadd [#allocation5], 4294959104 }
  0x34   :  { %7910 = dma.done.wait [#allocation7], 16384  }
  0x35   :  { %7911 = vsyncadd [#allocation7], 4294950912  ;;  %v9748_v0 = vmov 0.0   ;;  %v82_v1 = vld [vmem:[%s9739_s1 + $0x8] sm:$0xff]  ;;  %v84_v3 = vld [vmem:[%s9739_s1 + $0x18] sm:$0xff]  ;;  %vm111_vm0 = vcmask 130048  }
  0x36   :  { %200 = vmatprep.mubr.f32.mxu0 %v9748_v0  ;;  %313 = vmatprep.mubr.f32.mxu1 %v9748_v0  ;;  %v86_v2 = vld [vmem:[%s9739_s1 + $0x28] sm:$0xff]  ;;  %v88_v5 = vld [vmem:[%s9739_s1 + $0x38] sm:$0xff]  ;;  %v81_v6 = vld [vmem:[%s9739_s1] sm:$0xff]  ;;  %vm7919_vm1 = vmmov 0   ;;  %vm5743_vm2 = vcmask 31744  }
  0x37   :  { %v5882_v4 = vpack.c.bf16 %v86_v2, %v82_v1  ;;  %v85_v7 = vld [vmem:[%s9739_s1 + $0x20] sm:$0xff]  ;;  %v5886_v8 = vpack.c.bf16 %v88_v5, %v84_v3  ;;  %v83_v10 = vld [vmem:[%s9739_s1 + $0x10] sm:$0xff]  ;;  %v402_v14 = vld [vmem:[#allocation4 + $0x8] sm:$0xff] }
  0x38   :  { %v5884_v9 = vpack.c.bf16 %v85_v7, %v81_v6  ;;  %v87_v11 = vld [vmem:[%s9739_s1 + $0x30] sm:$0xff]  ;;  %v73_v12 = vld [vmem:[%s9738_s0] sm:$0xff]  ;;  %v406_v15 = vld [vmem:[#allocation4 + $0x28] sm:$0xff] }
  0x39   :  { %5883 = vmatprep.subr.bf16.mxu0 %v5882_v4  ;;  %v5888_v13 = vpack.c.bf16 %v87_v11, %v83_v10  ;;  %v404_v16 = vld [vmem:[#allocation4 + $0x18] sm:$0xff]  ;;  %5887 = vmatprep.subr.bf16.mxu1 %v5886_v8  ;;  %v8051_v17 = vpack.c.bf16 %v406_v15, %v402_v14  ;;  %v401_v19 = vld [vmem:[#allocation4] sm:$0xff]  ;;  %v403_v23 = vld [vmem:[#allocation4 + $0x10] sm:$0xff] }
  0x3a   :  { %5885 = vmatpush1.bf16.msra.mxu0 %v5884_v9  ;;  %v408_v18 = vld [vmem:[#allocation4 + $0x38] sm:$0xff]  ;;  %v405_v20 = vld [vmem:[#allocation4 + $0x20] sm:$0xff]  ;;  %v407_v24 = vld [vmem:[#allocation4 + $0x30] sm:$0xff] }
  0x3b   :  { %5889 = vmatpush1.bf16.msra.mxu1 %v5888_v13  ;;  %v8053_v21 = vpack.c.bf16 %v408_v18, %v404_v16  ;;  %v8055_v22 = vpack.c.bf16 %v405_v20, %v401_v19  ;;  %5891 = vmatprep.subr.bf16.mxu0 %v8051_v17  ;;  %v8058_v25 = vpack.c.bf16 %v407_v24, %v403_v23  ;;  %v410_v26 = vld [vmem:[#allocation4 + $0x48] sm:$0xff]  ;;  %v412_v28 = vld [vmem:[#allocation4 + $0x58] sm:$0xff]  ;;  %v409_v31 = vld [vmem:[#allocation4 + $0x40] sm:$0xff] }
  0x3c   :  { %v414_v27 = vld [vmem:[#allocation4 + $0x68] sm:$0xff]  ;;  %v416_v30 = vld [vmem:[#allocation4 + $0x78] sm:$0xff]  ;;  %v413_v32 = vld [vmem:[#allocation4 + $0x60] sm:$0xff] }
  0x3d   :  { %5765 = vmatmul.mubr.msk.f32.vlgmr.msra.gmra.mrb[0].mxu0 %vm111_vm0, %v73_v12  ;;  %5923 = vmatprep.subr.bf16.mxu1 %v8053_v21  ;;  %v8062_v29 = vpack.c.bf16 %v414_v27, %v410_v26  ;;  %v74_v33 = vld [vmem:[%s9738_s0 + $0x8] sm:$0xff]  ;;  %v8069_v34 = vpack.c.bf16 %v416_v30, %v412_v28  ;;  %v8071_v35 = vpack.c.bf16 %v413_v32, %v409_v31  ;;  %v411_v36 = vld [vmem:[#allocation4 + $0x50] sm:$0xff]  ;;  %v420_v41 = vld [vmem:[#allocation4 + $0x98] sm:$0xff] }
  0x3e   :  { %5773 = vmatmul.mubr.msk.f32.vlgmr.msra.gmra.mrb[0].mxu1 %vm111_vm0, %v73_v12  ;;  %5893 = vmatpush1.bf16.msra.mxu0 %v8055_v22  ;;  %v415_v37 = vld [vmem:[#allocation4 + $0x70] sm:$0xff]  ;;  %v418_v39 = vld [vmem:[#allocation4 + $0x88] sm:$0xff]  ;;  %v424_v43 = vld [vmem:[#allocation4 + $0xb8] sm:$0xff] }
  0x3f   :  { %5925 = vmatpush1.bf16.msra.mxu1 %v8058_v25  ;;  %206 = vmatprep.mubr.f32.mxu0 %v9748_v0  ;;  %v8075_v38 = vpack.c.bf16 %v415_v37, %v411_v36  ;;  %v422_v40 = vld [vmem:[#allocation4 + $0xa8] sm:$0xff]  ;;  %v417_v44 = vld [vmem:[#allocation4 + $0x80] sm:$0xff]  ;;  %v75_v46 = vld [vmem:[%s9738_s0 + $0x10] sm:$0xff]  ;;  %v8086_v47 = vpack.c.bf16 %v424_v43, %v420_v41 }
  0x40   :  { %319 = vmatprep.mubr.f32.mxu1 %v9748_v0  ;;  %5895 = vmatprep.subr.bf16.mxu0 %v8062_v29  ;;  %v8079_v42 = vpack.c.bf16 %v422_v40, %v418_v39  ;;  %v421_v45 = vld [vmem:[#allocation4 + $0xa0] sm:$0xff]  ;;  %v419_v48 = vld [vmem:[#allocation4 + $0x90] sm:$0xff]  ;;  %v426_v51 = vld [vmem:[#allocation4 + $0xc8] sm:$0xff] }
  0x41   :  { %5766 = vmatmul.mubr.msk.f32.gmra.mrb[2].mxu0 %vm111_vm0, %v74_v33  ;;  %5927 = vmatprep.subr.bf16.mxu1 %v8069_v34  ;;  %v423_v49 = vld [vmem:[#allocation4 + $0xb0] sm:$0xff]  ;;  %v8090_v50 = vpack.c.bf16 %v421_v45, %v417_v44  ;;  %v430_v52 = vld [vmem:[#allocation4 + $0xe8] sm:$0xff]  ;;  %v428_v53 = vld [vmem:[#allocation4 + $0xd8] sm:$0xff] }
  0x42   :  { %5774 = vmatmul.mubr.msk.f32.gmra.mrb[2].mxu1 %vm111_vm0, %v74_v33  ;;  %5897 = vmatpush1.bf16.msra.mxu0 %v8071_v35  ;;  %v8094_v54 = vpack.c.bf16 %v423_v49, %v419_v48  ;;  %v432_v55 = vld [vmem:[#allocation4 + $0xf8] sm:$0xff]  ;;  %v425_v56 = vld [vmem:[#allocation4 + $0xc0] sm:$0xff]  ;;  %v8098_v58 = vpack.c.bf16 %v430_v52, %v426_v51  ;;  %v427_v59 = vld [vmem:[#allocation4 + $0xd0] sm:$0xff] }
  0x43   :  { %5929 = vmatpush1.bf16.msra.mxu1 %v8075_v38  ;;  %212 = vmatprep.mubr.f32.mxu0 %v9748_v0  ;;  %v429_v57 = vld [vmem:[#allocation4 + $0xe0] sm:$0xff]  ;;  %v431_v60 = vld [vmem:[#allocation4 + $0xf0] sm:$0xff]  ;;  %v8102_v61 = vpack.c.bf16 %v432_v55, %v428_v53  ;;  %v434_v62 = vld [vmem:[#allocation4 + $0x108] sm:$0xff] }
  0x44   :  { %325 = vmatprep.mubr.f32.mxu1 %v9748_v0  ;;  %5899 = vmatprep.subr.bf16.mxu0 %v8079_v42  ;;  %v438_v63 = vld [vmem:[#allocation4 + $0x128] sm:$0xff]  ;;  %v76_v1 = vld [vmem:[%s9738_s0 + $0x18] sm:$0xff]  ;;  %v8109_v2 = vpack.c.bf16 %v429_v57, %v425_v56  ;;  %v8113_v5 = vpack.c.bf16 %v431_v60, %v427_v59  ;;  %v433_v6 = vld [vmem:[#allocation4 + $0x100] sm:$0xff] }
  0x45   :  { %5767 = vmatmul.mubr.msk.f32.gmra.mrb[4].mxu0 %vm111_vm0, %v75_v46  ;;  %5931 = vmatprep.subr.bf16.mxu1 %v8086_v47  ;;  %v436_v3 = vld [vmem:[#allocation4 + $0x118] sm:$0xff]  ;;  %v437_v7 = vld [vmem:[#allocation4 + $0x120] sm:$0xff]  ;;  %v8117_v8 = vpack.c.bf16 %v438_v63, %v434_v62  ;;  %v435_v9 = vld [vmem:[#allocation4 + $0x110] sm:$0xff] }
  0x46   :  { %5775 = vmatmul.mubr.msk.f32.gmra.mrb[4].mxu1 %vm111_vm0, %v75_v46  ;;  %5901 = vmatpush1.bf16.msra.mxu0 %v8090_v50  ;;  %v440_v4 = vld [vmem:[#allocation4 + $0x138] sm:$0xff]  ;;  %v439_v10 = vld [vmem:[#allocation4 + $0x130] sm:$0xff]  ;;  %v442_v12 = vld [vmem:[#allocation4 + $0x148] sm:$0xff]  ;;  %v8128_v15 = vpack.c.bf16 %v437_v7, %v433_v6 }
  0x47   :  { %5933 = vmatpush1.bf16.msra.mxu1 %v8094_v54  ;;  %218 = vmatprep.mubr.f32.mxu0 %v9748_v0  ;;  %v8121_v11 = vpack.c.bf16 %v440_v4, %v436_v3  ;;  %v446_v13 = vld [vmem:[#allocation4 + $0x168] sm:$0xff]  ;;  %v77_v14 = vld [vmem:[%s9738_s0 + $0x20] sm:$0xff]  ;;  %v444_v16 = vld [vmem:[#allocation4 + $0x158] sm:$0xff]  ;;  %v8132_v19 = vpack.c.bf16 %v439_v10, %v435_v9 }
  0x48   :  { %331 = vmatprep.mubr.f32.mxu1 %v9748_v0  ;;  %5903 = vmatprep.subr.bf16.mxu0 %v8098_v58  ;;  %v448_v18 = vld [vmem:[#allocation4 + $0x178] sm:$0xff]  ;;  %v441_v20 = vld [vmem:[#allocation4 + $0x140] sm:$0xff]  ;;  %v8136_v24 = vpack.c.bf16 %v446_v13, %v442_v12  ;;  %v443_v26 = vld [vmem:[#allocation4 + $0x150] sm:$0xff] }
  0x49   :  { %5768 = vmatmul.mubr.msk.f32.gmra.mrb[6].mxu0 %vm111_vm0, %v76_v1  ;;  %5935 = vmatprep.subr.bf16.mxu1 %v8102_v61  ;;  %v445_v23 = vld [vmem:[#allocation4 + $0x160] sm:$0xff]  ;;  %v447_v27 = vld [vmem:[#allocation4 + $0x170] sm:$0xff]  ;;  %v8140_v28 = vpack.c.bf16 %v448_v18, %v444_v16  ;;  %v450_v30 = vld [vmem:[#allocation4 + $0x188] sm:$0xff] }
  0x4a   :  { %5776 = vmatmul.mubr.msk.f32.gmra.mrb[6].mxu1 %vm111_vm0, %v76_v1  ;;  %5905 = vmatpush1.bf16.msra.mxu0 %v8109_v2  ;;  %v454_v31 = vld [vmem:[#allocation4 + $0x1a8] sm:$0xff]  ;;  %v8147_v33 = vpack.c.bf16 %v445_v23, %v441_v20  ;;  %v452_v36 = vld [vmem:[#allocation4 + $0x198] sm:$0xff]  ;;  %v8151_v39 = vpack.c.bf16 %v447_v27, %v443_v26  ;;  %v449_v40 = vld [vmem:[#allocation4 + $0x180] sm:$0xff] }
  0x4b   :  { %5937 = vmatpush1.bf16.msra.mxu1 %v8113_v5  ;;  %224 = vmatprep.mubr.f32.mxu0 %v9748_v0  ;;  %v78_v32 = vld [vmem:[%s9738_s0 + $0x28] sm:$0xff]  ;;  %v456_v37 = vld [vmem:[#allocation4 + $0x1b8] sm:$0xff]  ;;  %v453_v41 = vld [vmem:[#allocation4 + $0x1a0] sm:$0xff]  ;;  %v8155_v43 = vpack.c.bf16 %v454_v31, %v450_v30 }
  0x4c   :  { %337 = vmatprep.mubr.f32.mxu1 %v9748_v0  ;;  %5907 = vmatprep.subr.bf16.mxu0 %v8117_v8  ;;  %v451_v44 = vld [vmem:[#allocation4 + $0x190] sm:$0xff]  ;;  %v8159_v46 = vpack.c.bf16 %v456_v37, %v452_v36  ;;  %v458_v48 = vld [vmem:[#allocation4 + $0x1c8] sm:$0xff]  ;;  %v8166_v52 = vpack.c.bf16 %v453_v41, %v449_v40  ;;  %v460_v53 = vld [vmem:[#allocation4 + $0x1d8] sm:$0xff] }
  0x4d   :  { %5769 = vmatmul.mubr.msk.f32.gmra.mrb[8].mxu0 %vm111_vm0, %v77_v14  ;;  %5939 = vmatprep.subr.bf16.mxu1 %v8121_v11  ;;  %v455_v45 = vld [vmem:[#allocation4 + $0x1b0] sm:$0xff]  ;;  %v462_v49 = vld [vmem:[#allocation4 + $0x1e8] sm:$0xff]  ;;  %v464_v55 = vld [vmem:[#allocation4 + $0x1f8] sm:$0xff] }
  0x4e   :  { %5777 = vmatmul.mubr.msk.f32.gmra.mrb[8].mxu1 %vm111_vm0, %v77_v14  ;;  %5909 = vmatpush1.bf16.msra.mxu0 %v8128_v15  ;;  %v79_v51 = vld [vmem:[%s9738_s0 + $0x30] sm:$0xff]  ;;  %v8170_v56 = vpack.c.bf16 %v455_v45, %v451_v44  ;;  %v457_v57 = vld [vmem:[#allocation4 + $0x1c0] sm:$0xff]  ;;  %v8174_v60 = vpack.c.bf16 %v462_v49, %v458_v48  ;;  %v8178_v1 = vpack.c.bf16 %v464_v55, %v460_v53  ;;  %v80_v3 = vld [vmem:[%s9738_s0 + $0x38] sm:$0xff] }
  0x4f   :  { %5941 = vmatpush1.bf16.msra.mxu1 %v8132_v19  ;;  %230 = vmatprep.mubr.f32.mxu0 %v9748_v0  ;;  %v461_v59 = vld [vmem:[#allocation4 + $0x1e0] sm:$0xff]  ;;  %v459_v62 = vld [vmem:[#allocation4 + $0x1d0] sm:$0xff]  ;;  %v636_v7 = vld [vmem:[#allocation6 + $0x8] sm:$0xff] }
  0x50   :  { %343 = vmatprep.mubr.f32.mxu1 %v9748_v0  ;;  %5911 = vmatprep.subr.bf16.mxu0 %v8136_v24  ;;  %v463_v63 = vld [vmem:[#allocation4 + $0x1f0] sm:$0xff]  ;;  %v8185_v4 = vpack.c.bf16 %v461_v59, %v457_v57  ;;  %v640_v9 = vld [vmem:[#allocation6 + $0x28] sm:$0xff]  ;;  %v638_v10 = vld [vmem:[#allocation6 + $0x18] sm:$0xff] }
  0x51   :  { %5770 = vmatmul.mubr.msk.f32.gmra.mrb[10].mxu0 %vm111_vm0, %v78_v32  ;;  %5943 = vmatprep.subr.bf16.mxu1 %v8140_v28  ;;  %v8189_v6 = vpack.c.bf16 %v463_v63, %v459_v62  ;;  %v8204_v12 = vpack.c.bf16 %v640_v9, %v636_v7  ;;  %v642_v13 = vld [vmem:[#allocation6 + $0x38] sm:$0xff]  ;;  %v635_v14 = vld [vmem:[#allocation6] sm:$0xff]  ;;  %v637_v23 = vld [vmem:[#allocation6 + $0x10] sm:$0xff] }
  0x52   :  { %5778 = vmatmul.mubr.msk.f32.gmra.mrb[10].mxu1 %vm111_vm0, %v78_v32  ;;  %5913 = vmatpush1.bf16.msra.mxu0 %v8147_v33  ;;  %v639_v16 = vld [vmem:[#allocation6 + $0x20] sm:$0xff]  ;;  %v8206_v18 = vpack.c.bf16 %v642_v13, %v638_v10  ;;  %v641_v26 = vld [vmem:[#allocation6 + $0x30] sm:$0xff]  ;;  %v644_v30 = vld [vmem:[#allocation6 + $0x48] sm:$0xff] }
  0x53   :  { %5945 = vmatpush1.bf16.msra.mxu1 %v8151_v39  ;;  %236 = vmatprep.mubr.f32.mxu0 %v9748_v0  ;;  %v8208_v20 = vpack.c.bf16 %v639_v16, %v635_v14  ;;  %v8211_v27 = vpack.c.bf16 %v641_v26, %v637_v23  ;;  %v648_v31 = vld [vmem:[#allocation6 + $0x68] sm:$0xff]  ;;  %v646_v32 = vld [vmem:[#allocation6 + $0x58] sm:$0xff]  ;;  %v643_v40 = vld [vmem:[#allocation6 + $0x40] sm:$0xff] }
  0x54   :  { %349 = vmatprep.mubr.f32.mxu1 %v9748_v0  ;;  %5915 = vmatprep.subr.bf16.mxu0 %v8155_v43  ;;  %v8216_v36 = vpack.c.bf16 %v648_v31, %v644_v30  ;;  %v650_v37 = vld [vmem:[#allocation6 + $0x78] sm:$0xff]  ;;  %v647_v41 = vld [vmem:[#allocation6 + $0x60] sm:$0xff]  ;;  %v645_v48 = vld [vmem:[#allocation6 + $0x50] sm:$0xff] }
  0x55   :  { %5771 = vmatmul.mubr.msk.f32.gmra.mrb[12].mxu0 %vm111_vm0, %v79_v51  ;;  %5947 = vmatprep.subr.bf16.mxu1 %v8159_v46  ;;  %v8218_v44 = vpack.c.bf16 %v650_v37, %v646_v32  ;;  %v8220_v45 = vpack.c.bf16 %v647_v41, %v643_v40  ;;  %v649_v49 = vld [vmem:[#allocation6 + $0x70] sm:$0xff]  ;;  %v652_v53 = vld [vmem:[#allocation6 + $0x88] sm:$0xff]  ;;  %v654_v57 = vld [vmem:[#allocation6 + $0x98] sm:$0xff] }
  0x56   :  { %5779 = vmatmul.mubr.msk.f32.gmra.mrb[12].mxu1 %vm111_vm0, %v79_v51  ;;  %5917 = vmatpush1.bf16.msra.mxu0 %v8166_v52  ;;  %v8223_v51 = vpack.c.bf16 %v649_v49, %v645_v48  ;;  %v656_v55 = vld [vmem:[#allocation6 + $0xa8] sm:$0xff]  ;;  %v658_v62 = vld [vmem:[#allocation6 + $0xb8] sm:$0xff]  ;;  %v651_v63 = vld [vmem:[#allocation6 + $0x80] sm:$0xff] }
  0x57   :  { %5949 = vmatpush1.bf16.msra.mxu1 %v8170_v56  ;;  %242 = vmatprep.mubr.f32.mxu0 %v9748_v0  ;;  %v8228_v59 = vpack.c.bf16 %v656_v55, %v652_v53  ;;  %v8230_v7 = vpack.c.bf16 %v658_v62, %v654_v57  ;;  %v653_v10 = vld [vmem:[#allocation6 + $0x90] sm:$0xff]  ;;  %v660_v16 = vld [vmem:[#allocation6 + $0xc8] sm:$0xff]  ;;  %v662_v26 = vld [vmem:[#allocation6 + $0xd8] sm:$0xff] }
  0x58   :  { %355 = vmatprep.mubr.f32.mxu1 %v9748_v0  ;;  %5919 = vmatprep.subr.bf16.mxu0 %v8174_v60  ;;  %v657_v13 = vld [vmem:[#allocation6 + $0xb0] sm:$0xff]  ;;  %v664_v23 = vld [vmem:[#allocation6 + $0xe8] sm:$0xff]  ;;  %v666_v31 = vld [vmem:[#allocation6 + $0xf8] sm:$0xff] }
  0x59   :  { %5772 = vmatmul.mubr.msk.f32.gmra.mrb[14].mxu0 %vm111_vm0, %v80_v3  ;;  %5951 = vmatprep.subr.bf16.mxu1 %v8178_v1  ;;  %v8235_v14 = vpack.c.bf16 %v657_v13, %v653_v10  ;;  %v8240_v30 = vpack.c.bf16 %v664_v23, %v660_v16  ;;  %v659_v32 = vld [vmem:[#allocation6 + $0xc0] sm:$0xff]  ;;  %v8242_v40 = vpack.c.bf16 %v666_v31, %v662_v26  ;;  %v661_v48 = vld [vmem:[#allocation6 + $0xd0] sm:$0xff]  ;;  %v668_v55 = vld [vmem:[#allocation6 + $0x108] sm:$0xff] }
  0x5a   :  { %5780 = vmatmul.mubr.msk.f32.gmra.mrb[14].mxu1 %vm111_vm0, %v80_v3  ;;  %5921 = vmatpush1.bf16.msra.mxu0 %v8185_v4  ;;  %v655_v3 = vld [vmem:[#allocation6 + $0xa0] sm:$0xff]  ;;  %v665_v49 = vld [vmem:[#allocation6 + $0xf0] sm:$0xff]  ;;  %v672_v57 = vld [vmem:[#allocation6 + $0x128] sm:$0xff] }
  0x5b   :  { %5953 = vmatpush1.bf16.msra.mxu1 %v8189_v6  ;;  %529 = vmatprep.mubr.f32.mxu0 %v9748_v0  ;;  %v8232_v9 = vpack.c.bf16 %v655_v3, %v651_v63  ;;  %v663_v37 = vld [vmem:[#allocation6 + $0xe0] sm:$0xff]  ;;  %v8247_v53 = vpack.c.bf16 %v665_v49, %v661_v48  ;;  %v670_v62 = vld [vmem:[#allocation6 + $0x118] sm:$0xff]  ;;  %v8252_v63 = vpack.c.bf16 %v672_v57, %v668_v55  ;;  %v669_v26 = vld [vmem:[#allocation6 + $0x110] sm:$0xff] }
  0x5c   :  { %600 = vmatprep.mubr.f32.mxu1 %v9748_v0  ;;  %5955 = vmatprep.subr.bf16.mxu0 %v8204_v12  ;;  %v8244_v41 = vpack.c.bf16 %v663_v37, %v659_v32  ;;  %v674_v3 = vld [vmem:[#allocation6 + $0x138] sm:$0xff]  ;;  %v667_v10 = vld [vmem:[#allocation6 + $0x100] sm:$0xff]  ;;  %v673_v31 = vld [vmem:[#allocation6 + $0x130] sm:$0xff] }
  0x5d   :  { %530 = vmatmul.mubr.f32.vlgmr.msra.gmra.mrb[0].mxu0 %v9748_v0  ;;  %5987 = vmatprep.subr.bf16.mxu1 %v8206_v18  ;;  %9840 = vst [vmem:[#allocation11_spill] sm:$0xff] %v8247_v53  ;;  %9841 = vst [vmem:[#allocation12_spill] sm:$0xff] %v8252_v63  ;;  %v671_v13 = vld [vmem:[#allocation6 + $0x120] sm:$0xff]  ;;  %v8254_v16 = vpack.c.bf16 %v674_v3, %v670_v62  ;;  %v8259_v32 = vpack.c.bf16 %v673_v31, %v669_v26  ;;  %v676_v37 = vld [vmem:[#allocation6 + $0x148] sm:$0xff] }
  0x5e   :  { %601 = vmatmul.mubr.f32.vlgmr.msra.gmra.mrb[0].mxu1 %v9748_v0  ;;  %785 = vmatprep.mubr.f32.mxu0 %v9748_v0  ;;  %v8256_v23 = vpack.c.bf16 %v671_v13, %v667_v10  ;;  %v680_v48 = vld [vmem:[#allocation6 + $0x168] sm:$0xff]  ;;  %v678_v49 = vld [vmem:[#allocation6 + $0x158] sm:$0xff]  ;;  %v675_v62 = vld [vmem:[#allocation6 + $0x140] sm:$0xff] }
  0x5f   :  { %856 = vmatprep.mubr.f32.mxu1 %v9748_v0  ;;  %5957 = vmatpush1.bf16.msra.mxu0 %v8208_v20  ;;  %9842 = vst [vmem:[#allocation13_spill] sm:$0xff] %v8254_v16  ;;  %9844 = vst [vmem:[#allocation15_spill] sm:$0xff] %v8259_v32  ;;  %v8264_v55 = vpack.c.bf16 %v680_v48, %v676_v37  ;;  %v682_v57 = vld [vmem:[#allocation6 + $0x178] sm:$0xff]  ;;  %v679_v3 = vld [vmem:[#allocation6 + $0x160] sm:$0xff] }
  0x60   :  { %5989 = vmatpush1.bf16.msra.mxu1 %v8211_v27  ;;  %5959 = vmatprep.subr.bf16.mxu0 %v8216_v36  ;;  %9843 = vst [vmem:[#allocation14_spill] sm:$0xff] %v8256_v23  ;;  %v8266_v10 = vpack.c.bf16 %v682_v57, %v678_v49  ;;  %v8268_v13 = vpack.c.bf16 %v679_v3, %v675_v62  ;;  %v677_v26 = vld [vmem:[#allocation6 + $0x150] sm:$0xff]  ;;  %v684_v0 = vld [vmem:[#allocation6 + $0x188] sm:$0xff]  ;;  %v683_v49 = vld [vmem:[#allocation6 + $0x180] sm:$0xff] }
  0x61   :  { %5991 = vmatprep.subr.bf16.mxu1 %v8218_v44  ;;  %9845 = vst [vmem:[#allocation16_spill] sm:$0xff] %v8264_v55  ;;  %v681_v31 = vld [vmem:[#allocation6 + $0x170] sm:$0xff]  ;;  %v687_v57 = vld [vmem:[#allocation6 + $0x1a0] sm:$0xff] }
  0x62   :  { %9846 = vst [vmem:[#allocation17_spill] sm:$0xff] %v8266_v10  ;;  %9847 = vst [vmem:[#allocation18_spill] sm:$0xff] %v8268_v13  ;;  %v685_v62 = vld [vmem:[#allocation6 + $0x190] sm:$0xff]  ;;  %v8280_v3 = vpack.c.bf16 %v687_v57, %v683_v49 }
  0x63   :  { %5961 = vmatpush1.bf16.msra.mxu0 %v8220_v45  ;;  %v697_v49 = vld [vmem:[#allocation6 + $0x1f0] sm:$0xff] }
  0x64   :  { %5993 = vmatpush1.bf16.msra.mxu1 %v8223_v51  ;;  %5963 = vmatprep.subr.bf16.mxu0 %v8228_v59  ;;  %9850 = vst [vmem:[#allocation21_spill] sm:$0xff] %v8280_v3 }
  0x65   :  { %5995 = vmatprep.subr.bf16.mxu1 %v8230_v7 }
  0x67   :  { %5965 = vmatpush1.bf16.msra.mxu0 %v8232_v9 }
  0x68   :  { %5997 = vmatpush1.bf16.msra.mxu1 %v8235_v14  ;;  %5967 = vmatprep.subr.bf16.mxu0 %v8240_v30 }
  0x69   :  { %5999 = vmatprep.subr.bf16.mxu1 %v8242_v40 }
  0x6b   :  { %5969 = vmatpush1.bf16.msra.mxu0 %v8244_v41 }
  0x6c   :  { %6001 = vmatpush1.bf16.msra.mxu1 %v8247_v53  ;;  %5971 = vmatprep.subr.bf16.mxu0 %v8252_v63  ;;  %v686_v63 = vld [vmem:[#allocation6 + $0x198] sm:$0xff] }
  0x6d   :  { %6003 = vmatprep.subr.bf16.mxu1 %v8254_v16  ;;  %v688_v16 = vld [vmem:[#allocation6 + $0x1a8] sm:$0xff]  ;;  %v690_v53 = vld [vmem:[#allocation6 + $0x1b8] sm:$0xff] }
  0x6e   :  { %v8275_v37 = vpack.c.bf16 %v688_v16, %v684_v0  ;;  %v8277_v48 = vpack.c.bf16 %v690_v53, %v686_v63  ;;  %v694_v53 = vld [vmem:[#allocation6 + $0x1d8] sm:$0xff]  ;;  %v691_v16 = vld [vmem:[#allocation6 + $0x1c0] sm:$0xff] }
  0x6f   :  { %5973 = vmatpush1.bf16.msra.mxu0 %v8256_v23  ;;  %v8271_v23 = vpack.c.bf16 %v681_v31, %v677_v26  ;;  %v689_v26 = vld [vmem:[#allocation6 + $0x1b0] sm:$0xff]  ;;  %v692_v31 = vld [vmem:[#allocation6 + $0x1c8] sm:$0xff]  ;;  %v698_v63 = vld [vmem:[#allocation6 + $0x1f8] sm:$0xff] }
  0x70   :  { %6005 = vmatpush1.bf16.msra.mxu1 %v8259_v32  ;;  %5975 = vmatprep.subr.bf16.mxu0 %v8264_v55  ;;  %9849 = vst [vmem:[#allocation20_spill] sm:$0xff] %v8277_v48  ;;  %v696_v55 = vld [vmem:[#allocation6 + $0x1e8] sm:$0xff]  ;;  %v695_v32 = vld [vmem:[#allocation6 + $0x1e0] sm:$0xff] }
  0x71   :  { %9848 = vst [vmem:[#allocation19_spill] sm:$0xff] %v8271_v23  ;;  %6007 = vmatprep.subr.bf16.mxu1 %v8266_v10  ;;  %v8284_v10 = vpack.c.bf16 %v689_v26, %v685_v62  ;;  %v8286_v0 = vpack.c.bf16 %v696_v55, %v692_v31  ;;  %v8291_v57 = vpack.c.bf16 %v695_v32, %v691_v16  ;;  %v91_v55 = vlaneseq  ;;  %v89_v31 = vld [vmem:[%s9741_s3] sm:$0xf] }
  0x73   :  { %5977 = vmatpush1.bf16.msra.mxu0 %v8268_v13  ;;  %9851 = vst [vmem:[#allocation22_spill] sm:$0xff] %v8284_v10  ;;  %9852 = vst [vmem:[#allocation23_spill] sm:$0xff] %v8286_v0  ;;  %v8288_v13 = vpack.c.bf16 %v698_v63, %v694_v53  ;;  %v92_v26 = vshrl.u32 %v91_v55, 7 }
  0x74   :  { %6009 = vmatpush1.bf16.msra.mxu1 %v8271_v23  ;;  %5979 = vmatprep.subr.bf16.mxu0 %v8275_v37  ;;  %v693_v23 = vld [vmem:[#allocation6 + $0x1d0] sm:$0xff]  ;;  %9854 = vst [vmem:[#allocation25_spill] sm:$0xff] %v8291_v57 }
  0x75   :  { %6011 = vmatprep.subr.bf16.mxu1 %v8277_v48  ;;  %9853 = vst [vmem:[#allocation24_spill] sm:$0xff] %v8288_v13  ;;  %v8295_v62 = vpack.c.bf16 %v697_v49, %v693_v23  ;;  %v8302_v32 = vsub.s32 0, %v92_v26  ;;  %v8307_v23 = vsub.s32 1, %v92_v26 }
  0x77   :  { %5981 = vmatpush1.bf16.msra.mxu0 %v8280_v3  ;;  %9855 = vst [vmem:[#allocation26_spill] sm:$0xff] %v8295_v62  ;;  %9856 = vst [vmem:[#allocation27_spill] sm:$0xff] %v8302_v32  ;;  %v8310_v53 = vrot.slane %v89_v31, %v8302_v32  ;;  %v8313_v63 = vrot.slane %v89_v31, %v8307_v23  ;;  %v8322_v32 = vsub.s32 2, %v92_v26 }
  0x78   :  { %6013 = vmatpush1.bf16.msra.mxu1 %v8284_v10  ;;  %5983 = vmatprep.subr.bf16.mxu0 %v8286_v0  ;;  %9857 = vst [vmem:[#allocation28_spill] sm:$0xff] %v8307_v23 }
  0x79   :  { %6015 = vmatprep.subr.bf16.mxu1 %v8288_v13  ;;  %9858 = vst [vmem:[#allocation29_spill] sm:$0xff] %v8310_v53  ;;  %9859 = vst [vmem:[#allocation30_spill] sm:$0xff] %v8313_v63  ;;  %v8326_v3 = vrot.slane %v89_v31, %v8322_v32 }
  0x7a   :  { %9862 = vst [vmem:[#allocation33_spill] sm:$0xff] %v8322_v32 }
  0x7b   :  { %5985 = vmatpush1.bf16.msra.mxu0 %v8291_v57 }
  0x7c   :  { %6017 = vmatpush1.bf16.msra.mxu1 %v8295_v62  ;;  %6019 = vmatprep.subr.bf16.mxu0 %v8051_v17  ;;  %v8315_v17 = vsub.s32 3, %v92_v26 }
  0x7d   :  { %6051 = vmatprep.subr.bf16.mxu1 %v8053_v21 }
  0x7e   :  { %9860 = vst [vmem:[#allocation31_spill] sm:$0xff] %v8315_v17  ;;  %v8320_v10 = vrot.slane %v89_v31, %v8315_v17 }
  0x80   :  { %9861 = vst [vmem:[#allocation32_spill] sm:$0xff] %v8320_v10 }
 0x130   :  { %v531_v16 = vpop.f32.mrb[0].mxu0 }
 0x131   :  { %v7450_v21 = vadd.f32 %v531_v16, %v8310_v53  ;;  %v602_v49 = vpop.f32.mrb[0].mxu1  ;;  %v533_v55 = vpop.f32.mrb[1].mxu0 }
 0x132   :  { %v7451_v62 = vadd.f32 %v533_v55, %v8313_v63  ;;  %v604_v57 = vpop.f32.mrb[1].mxu1  ;;  %v7466_v53 = vadd.f32 %v602_v49, %v8326_v3 }
 0x133   :  { %v5781_v13 = vmul.f32 -1.442695, %v7450_v21  ;;  %v7467_v23 = vadd.f32 %v604_v57, %v8320_v10 }
 0x134   :  { %v5782_v0 = vmul.f32 -1.442695, %v7451_v62 }
 0x135   :  { %7586 = vpow2.f32 %v5781_v13  ;;  %v5783_v16 = vmul.f32 -1.442695, %v7467_v23 }
 0x136   :  { %7588 = vpow2.f32 %v5782_v0 }
 0x137   :  { %7590 = vpow2.f32 %v5783_v16  ;;  %v1355_v16 = vld [vmem:[#allocation4 + $0x20] sm:$0xff] }
 0x138   :  { %7592 = vtanh.f32 %v7466_v53  ;;  %v9863_v53 = vmov 0.0  }
 0x13f   :  { %v7587_v48 = vpop.eup %7586 }
 0x140   :  { %v7589_v55 = vpop.eup %7588  ;;  %v614_v63 = vadd.f32 1.0, %v7587_v48 }
 0x141   :  { %v620_v62 = vadd.f32 1.0, %v7589_v55  ;;  %v7591_v13 = vpop.eup %7590  ;;  %v1353_v55 = vld [vmem:[#allocation4 + $0x10] sm:$0xff] }
 0x142   :  { %7594 = vrcp.f32 %v614_v63  ;;  %v7593_v26 = vpop.eup %7592  ;;  %v627_v57 = vadd.f32 1.0, %v7591_v13  ;;  %v1360_v13 = vld [vmem:[#allocation4 + $0x48] sm:$0xff] }
 0x143   :  { %7596 = vrcp.f32 %v620_v62  ;;  %v1357_v62 = vld [vmem:[#allocation4 + $0x30] sm:$0xff] }
 0x144   :  { %7598 = vrcp.f32 %v627_v57 }
 0x14c   :  { %v7595_v21 = vpop.eup %7594 }
 0x14d   :  { %v7597_v0 = vpop.eup %7596  ;;  %v631_v17 = vmul.f32 %v7595_v21, %v7593_v26  ;;  %v1364_v26 = vld [vmem:[#allocation4 + $0x68] sm:$0xff]  ;;  %v1362_v21 = vld [vmem:[#allocation4 + $0x58] sm:$0xff] }
 0x14e   :  { %v630_v10 = vmul.f32 0.0, %v7597_v0  ;;  %v7599_v23 = vpop.eup %7598  ;;  %v1366_v0 = vld [vmem:[#allocation4 + $0x78] sm:$0xff] }
 0x150   :  { %v8329_v31 = vadd.f32 %v631_v17, %v630_v10  ;;  %v1351_v17 = vld [vmem:[#allocation4] sm:$0xff] }
 0x152   :  { %7600 = vtanh.f32 %v8329_v31 }
 0x15c   :  { %v7601_v49 = vpop.eup %7600 }
 0x15d   :  { %v634_v48 = vmul.f32 %v7601_v49, %v7599_v23  ;;  %v8412_v49 = vpack.c.bf16 %v1355_v16, %v1351_v17  ;;  %v1392_v17 = vld [vmem:[#allocation4 + $0x148] sm:$0xff] }
 0x15e   :  { %v1396_v16 = vld [vmem:[#allocation4 + $0x168] sm:$0xff] }
 0x15f   :  { %786 = vmatmul.mubr.f32.vlgmr.msra.gmra.mrb[16].mxu0 %v634_v48  ;;  %857 = vmatmul.mubr.f32.vlgmr.msra.gmra.mrb[16].mxu1 %v634_v48 }
 0x160   :  { %6021 = vmatpush1.bf16.msra.mxu0 %v8055_v22  ;;  %6053 = vmatpush1.bf16.msra.mxu1 %v8058_v25  ;;  %v9864_v22 = vld [vmem:[#allocation11_spill] sm:$0xff]  ;;  %v9865_v25 = vld [vmem:[#allocation12_spill] sm:$0xff] }
 0x161   :  { %6023 = vmatprep.subr.bf16.mxu0 %v8062_v29  ;;  %6055 = vmatprep.subr.bf16.mxu1 %v8069_v34  ;;  %v9866_v29 = vld [vmem:[#allocation13_spill] sm:$0xff]  ;;  %v9867_v34 = vld [vmem:[#allocation14_spill] sm:$0xff] }
 0x162   :  { %1004 = vmatprep.mubr.f32.mxu0 %v9863_v53  ;;  %1075 = vmatprep.mubr.f32.mxu1 %v9863_v53 }
 0x164   :  { %6025 = vmatpush1.bf16.msra.mxu0 %v8071_v35  ;;  %6057 = vmatpush1.bf16.msra.mxu1 %v8075_v38  ;;  %v9868_v35 = vld [vmem:[#allocation15_spill] sm:$0xff]  ;;  %v9869_v38 = vld [vmem:[#allocation16_spill] sm:$0xff] }
 0x165   :  { %6027 = vmatprep.subr.bf16.mxu0 %v8079_v42  ;;  %6059 = vmatprep.subr.bf16.mxu1 %v8086_v47  ;;  %v9870_v42 = vld [vmem:[#allocation17_spill] sm:$0xff]  ;;  %v9871_v47 = vld [vmem:[#allocation18_spill] sm:$0xff] }
 0x168   :  { %6029 = vmatpush1.bf16.msra.mxu0 %v8090_v50  ;;  %6061 = vmatpush1.bf16.msra.mxu1 %v8094_v54  ;;  %v9872_v50 = vld [vmem:[#allocation19_spill] sm:$0xff]  ;;  %v9873_v54 = vld [vmem:[#allocation20_spill] sm:$0xff] }
 0x169   :  { %6031 = vmatprep.subr.bf16.mxu0 %v8098_v58  ;;  %6063 = vmatprep.subr.bf16.mxu1 %v8102_v61  ;;  %v9874_v58 = vld [vmem:[#allocation21_spill] sm:$0xff]  ;;  %v9875_v61 = vld [vmem:[#allocation22_spill] sm:$0xff] }
 0x16c   :  { %6033 = vmatpush1.bf16.msra.mxu0 %v8109_v2  ;;  %6065 = vmatpush1.bf16.msra.mxu1 %v8113_v5  ;;  %v9876_v2 = vld [vmem:[#allocation23_spill] sm:$0xff]  ;;  %v9877_v5 = vld [vmem:[#allocation24_spill] sm:$0xff] }
 0x16d   :  { %6035 = vmatprep.subr.bf16.mxu0 %v8117_v8  ;;  %6067 = vmatprep.subr.bf16.mxu1 %v8121_v11  ;;  %v9878_v8 = vld [vmem:[#allocation25_spill] sm:$0xff]  ;;  %v9879_v11 = vld [vmem:[#allocation26_spill] sm:$0xff] }
 0x170   :  { %6037 = vmatpush1.bf16.msra.mxu0 %v8128_v15  ;;  %6069 = vmatpush1.bf16.msra.mxu1 %v8132_v19  ;;  %v1352_v15 = vld [vmem:[#allocation4 + $0x8] sm:$0xff] }
 0x171   :  { %6039 = vmatprep.subr.bf16.mxu0 %v8136_v24  ;;  %6071 = vmatprep.subr.bf16.mxu1 %v8140_v28  ;;  %v1356_v19 = vld [vmem:[#allocation4 + $0x28] sm:$0xff]  ;;  %v1354_v24 = vld [vmem:[#allocation4 + $0x18] sm:$0xff] }
 0x172   :  { %v8398_v28 = vpack.c.bf16 %v1356_v19, %v1352_v15  ;;  %v1369_v15 = vld [vmem:[#allocation4 + $0x90] sm:$0xff] }
 0x173   :  { %v1373_v19 = vld [vmem:[#allocation4 + $0xb0] sm:$0xff] }
 0x174   :  { %6041 = vmatpush1.bf16.msra.mxu0 %v8147_v33  ;;  %6073 = vmatpush1.bf16.msra.mxu1 %v8151_v39  ;;  %v1358_v33 = vld [vmem:[#allocation4 + $0x38] sm:$0xff] }
 0x175   :  { %6043 = vmatprep.subr.bf16.mxu0 %v8155_v43  ;;  %6075 = vmatprep.subr.bf16.mxu1 %v8159_v46  ;;  %v8400_v39 = vpack.c.bf16 %v1358_v33, %v1354_v24  ;;  %v1376_v24 = vld [vmem:[#allocation4 + $0xc8] sm:$0xff] }
 0x176   :  { %v1380_v33 = vld [vmem:[#allocation4 + $0xe8] sm:$0xff] }
 0x178   :  { %6045 = vmatpush1.bf16.msra.mxu0 %v8166_v52  ;;  %6077 = vmatpush1.bf16.msra.mxu1 %v8170_v56  ;;  %v9880_v52 = vld [vmem:[#allocation29_spill] sm:$0xff] }
 0x179   :  { %6047 = vmatprep.subr.bf16.mxu0 %v8174_v60  ;;  %6079 = vmatprep.subr.bf16.mxu1 %v8178_v1 }
 0x17c   :  { %6049 = vmatpush1.bf16.msra.mxu0 %v8185_v4  ;;  %6081 = vmatpush1.bf16.msra.mxu1 %v8189_v6  ;;  %v9881_v4 = vld [vmem:[#allocation30_spill] sm:$0xff] }
 0x17d   :  { %6083 = vmatprep.subr.bf16.mxu0 %v8204_v12  ;;  %6115 = vmatprep.subr.bf16.mxu1 %v8206_v18 }
 0x17f   :  { %1005 = vmatmul.mubr.f32.vlgmr.msra.gmra.mrb[2].mxu0 %v634_v48  ;;  %1076 = vmatmul.mubr.f32.vlgmr.msra.gmra.mrb[2].mxu1 %v634_v48  ;;  %v8414_v48 = vpack.c.bf16 %v1357_v62, %v1353_v55  ;;  %v1394_v55 = vld [vmem:[#allocation4 + $0x158] sm:$0xff] }
 0x180   :  { %6085 = vmatpush1.bf16.msra.mxu0 %v8208_v20  ;;  %6117 = vmatpush1.bf16.msra.mxu1 %v8211_v27  ;;  %v9882_v20 = vld [vmem:[#allocation32_spill] sm:$0xff]  ;;  %v1398_v62 = vld [vmem:[#allocation4 + $0x178] sm:$0xff] }
 0x181   :  { %6087 = vmatprep.subr.bf16.mxu0 %v8216_v36  ;;  %6119 = vmatprep.subr.bf16.mxu1 %v8218_v44 }
 0x182   :  { %1260 = vmatprep.mubr.f32.mxu0 %v9863_v53  ;;  %1331 = vmatprep.mubr.f32.mxu1 %v9863_v53 }
 0x184   :  { %6089 = vmatpush1.bf16.msra.mxu0 %v8220_v45  ;;  %6121 = vmatpush1.bf16.msra.mxu1 %v8223_v51 }
 0x185   :  { %6091 = vmatprep.subr.bf16.mxu0 %v8228_v59  ;;  %6123 = vmatprep.subr.bf16.mxu1 %v8230_v7 }
 0x188   :  { %6093 = vmatpush1.bf16.msra.mxu0 %v8232_v9  ;;  %6125 = vmatpush1.bf16.msra.mxu1 %v8235_v14 }
 0x189   :  { %6095 = vmatprep.subr.bf16.mxu0 %v8240_v30  ;;  %6127 = vmatprep.subr.bf16.mxu1 %v8242_v40 }
 0x18c   :  { %6097 = vmatpush1.bf16.msra.mxu0 %v8244_v41  ;;  %6129 = vmatpush1.bf16.msra.mxu1 %v9864_v22  ;;  %v1363_v22 = vld [vmem:[#allocation4 + $0x60] sm:$0xff] }
 0x18d   :  { %6099 = vmatprep.subr.bf16.mxu0 %v9865_v25  ;;  %6131 = vmatprep.subr.bf16.mxu1 %v9866_v29  ;;  %v8418_v29 = vpack.c.bf16 %v1364_v26, %v1360_v13 }
 0x190   :  { %6101 = vmatpush1.bf16.msra.mxu0 %v9867_v34  ;;  %6133 = vmatpush1.bf16.msra.mxu1 %v9868_v35  ;;  %v8420_v34 = vpack.c.bf16 %v1366_v0, %v1362_v21  ;;  %v1361_v35 = vld [vmem:[#allocation4 + $0x50] sm:$0xff]  ;;  %v1391_v21 = vld [vmem:[#allocation4 + $0x140] sm:$0xff] }
 0x191   :  { %6103 = vmatprep.subr.bf16.mxu0 %v9869_v38  ;;  %6135 = vmatprep.subr.bf16.mxu1 %v9870_v42  ;;  %v1365_v38 = vld [vmem:[#allocation4 + $0x70] sm:$0xff]  ;;  %v1368_v42 = vld [vmem:[#allocation4 + $0x88] sm:$0xff]  ;;  %v1395_v0 = vld [vmem:[#allocation4 + $0x160] sm:$0xff] }
 0x194   :  { %6105 = vmatpush1.bf16.msra.mxu0 %v9871_v47  ;;  %6137 = vmatpush1.bf16.msra.mxu1 %v9872_v50  ;;  %v1372_v47 = vld [vmem:[#allocation4 + $0xa8] sm:$0xff]  ;;  %v1370_v50 = vld [vmem:[#allocation4 + $0x98] sm:$0xff] }
 0x195   :  { %6107 = vmatprep.subr.bf16.mxu0 %v8275_v37  ;;  %6139 = vmatprep.subr.bf16.mxu1 %v9873_v54  ;;  %v1374_v54 = vld [vmem:[#allocation4 + $0xb8] sm:$0xff] }
 0x198   :  { %6109 = vmatpush1.bf16.msra.mxu0 %v9874_v58  ;;  %6141 = vmatpush1.bf16.msra.mxu1 %v9875_v61  ;;  %v8428_v61 = vpack.c.bf16 %v1365_v38, %v1361_v35  ;;  %v1400_v35 = vld [vmem:[#allocation4 + $0x188] sm:$0xff] }
 0x199   :  { %6111 = vmatprep.subr.bf16.mxu0 %v9876_v2  ;;  %6143 = vmatprep.subr.bf16.mxu1 %v9877_v5  ;;  %v1367_v2 = vld [vmem:[#allocation4 + $0x80] sm:$0xff]  ;;  %v1404_v38 = vld [vmem:[#allocation4 + $0x1a8] sm:$0xff] }
 0x19a   :  { %v1371_v5 = vld [vmem:[#allocation4 + $0xa0] sm:$0xff] }
 0x19c   :  { %6113 = vmatpush1.bf16.msra.mxu0 %v9878_v8  ;;  %6145 = vmatpush1.bf16.msra.mxu1 %v9879_v11  ;;  %v8432_v8 = vpack.c.bf16 %v1372_v47, %v1368_v42  ;;  %v8434_v11 = vpack.c.bf16 %v1374_v54, %v1370_v50  ;;  %v1402_v42 = vld [vmem:[#allocation4 + $0x198] sm:$0xff]  ;;  %v8476_v50 = vpack.c.bf16 %v1395_v0, %v1391_v21  ;;  %v1585_v0 = vld [vmem:[#allocation6] sm:$0xff] }
 0x19d   :  { %6147 = vmatprep.subr.bf16.mxu0 %v8398_v28  ;;  %6179 = vmatprep.subr.bf16.mxu1 %v8400_v39  ;;  %v1406_v47 = vld [vmem:[#allocation4 + $0x1b8] sm:$0xff] }
 0x19e   :  { %v1592_v21 = vld [vmem:[#allocation6 + $0x38] sm:$0xff] }
 0x252   :  { %v1006_v43 = vpop.f32.mrb[2].mxu0  ;;  %v1077_v46 = vpop.f32.mrb[2].mxu1 }
 0x253   :  { %v7452_v56 = vadd.f32 %v1006_v43, %v9880_v52  ;;  %v1008_v60 = vpop.f32.mrb[3].mxu0  ;;  %v1079_v1 = vpop.f32.mrb[3].mxu1  ;;  %v7468_v44 = vadd.f32 %v1077_v46, %v8326_v3  ;;  %v1378_v43 = vld [vmem:[#allocation4 + $0xd8] sm:$0xff] }
 0x254   :  { %v7453_v6 = vadd.f32 %v1008_v60, %v9881_v4  ;;  %v7469_v27 = vadd.f32 %v1079_v1, %v9882_v20  ;;  %v1382_v46 = vld [vmem:[#allocation4 + $0xf8] sm:$0xff]  ;;  %v8442_v60 = vpack.c.bf16 %v1373_v19, %v1369_v15  ;;  %v1375_v1 = vld [vmem:[#allocation4 + $0xc0] sm:$0xff]  ;;  %v8482_v15 = vpack.c.bf16 %v1404_v38, %v1400_v35  ;;  %v1587_v38 = vld [vmem:[#allocation6 + $0x10] sm:$0xff] }
 0x255   :  { %v5784_v12 = vmul.f32 -1.442695, %v7452_v56  ;;  %v8440_v56 = vpack.c.bf16 %v1371_v5, %v1367_v2  ;;  %v1399_v2 = vld [vmem:[#allocation4 + $0x180] sm:$0xff]  ;;  %v8484_v19 = vpack.c.bf16 %v1406_v47, %v1402_v42  ;;  %v1591_v42 = vld [vmem:[#allocation6 + $0x30] sm:$0xff]  ;;  %v1594_v47 = vld [vmem:[#allocation6 + $0x48] sm:$0xff] }
 0x256   :  { %v5785_v18 = vmul.f32 -1.442695, %v7453_v6  ;;  %v5786_v36 = vmul.f32 -1.442695, %v7469_v27  ;;  %v1379_v6 = vld [vmem:[#allocation4 + $0xe0] sm:$0xff]  ;;  %v1377_v27 = vld [vmem:[#allocation4 + $0xd0] sm:$0xff] }
 0x257   :  { %7602 = vpow2.f32 %v5784_v12  ;;  %v8446_v12 = vpack.c.bf16 %v1380_v33, %v1376_v24  ;;  %v1403_v5 = vld [vmem:[#allocation4 + $0x1a0] sm:$0xff]  ;;  %v1401_v24 = vld [vmem:[#allocation4 + $0x190] sm:$0xff] }
 0x258   :  { %7604 = vpow2.f32 %v5785_v18  ;;  %v8448_v18 = vpack.c.bf16 %v1382_v46, %v1378_v43  ;;  %v1405_v33 = vld [vmem:[#allocation4 + $0x1b0] sm:$0xff]  ;;  %v1408_v43 = vld [vmem:[#allocation4 + $0x1c8] sm:$0xff] }
 0x259   :  { %7606 = vpow2.f32 %v5786_v36  ;;  %v1381_v36 = vld [vmem:[#allocation4 + $0xf0] sm:$0xff]  ;;  %v1412_v46 = vld [vmem:[#allocation4 + $0x1e8] sm:$0xff] }
 0x25a   :  { %7608 = vtanh.f32 %v7468_v44  ;;  %v1384_v44 = vld [vmem:[#allocation4 + $0x108] sm:$0xff] }
 0x261   :  { %v7603_v45 = vpop.eup %7602 }
 0x262   :  { %v7605_v51 = vpop.eup %7604  ;;  %v1089_v59 = vadd.f32 1.0, %v7603_v45  ;;  %v1388_v45 = vld [vmem:[#allocation4 + $0x128] sm:$0xff] }
 0x263   :  { %v1095_v7 = vadd.f32 1.0, %v7605_v51  ;;  %v7607_v9 = vpop.eup %7606  ;;  %v1386_v51 = vld [vmem:[#allocation4 + $0x118] sm:$0xff] }
 0x264   :  { %7610 = vrcp.f32 %v1089_v59  ;;  %v7609_v14 = vpop.eup %7608  ;;  %v1102_v10 = vadd.f32 1.0, %v7607_v9  ;;  %v1390_v59 = vld [vmem:[#allocation4 + $0x138] sm:$0xff]  ;;  %v8454_v9 = vpack.c.bf16 %v1381_v36, %v1377_v27  ;;  %v8488_v27 = vpack.c.bf16 %v1403_v5, %v1399_v2  ;;  %v1598_v2 = vld [vmem:[#allocation6 + $0x68] sm:$0xff] }
 0x265   :  { %7612 = vrcp.f32 %v1095_v7  ;;  %v8452_v7 = vpack.c.bf16 %v1379_v6, %v1375_v1  ;;  %v1410_v1 = vld [vmem:[#allocation4 + $0x1d8] sm:$0xff]  ;;  %v8490_v36 = vpack.c.bf16 %v1405_v33, %v1401_v24  ;;  %v8524_v24 = vpack.c.bf16 %v1598_v2, %v1594_v47  ;;  %v1603_v47 = vld [vmem:[#allocation6 + $0x90] sm:$0xff] }
 0x266   :  { %7614 = vrcp.f32 %v1102_v10  ;;  %v1385_v10 = vld [vmem:[#allocation4 + $0x110] sm:$0xff]  ;;  %v1414_v6 = vld [vmem:[#allocation4 + $0x1f8] sm:$0xff] }
 0x267   :  { %v1596_v5 = vld [vmem:[#allocation6 + $0x58] sm:$0xff]  ;;  %v1607_v2 = vld [vmem:[#allocation6 + $0xb0] sm:$0xff] }
 0x268   :  { %v1600_v33 = vld [vmem:[#allocation6 + $0x78] sm:$0xff] }
 0x26e   :  { %v7611_v30 = vpop.eup %7610 }
 0x26f   :  { %v7613_v40 = vpop.eup %7612  ;;  %v1106_v41 = vmul.f32 %v7611_v30, %v7609_v14  ;;  %v1383_v14 = vld [vmem:[#allocation4 + $0x100] sm:$0xff] }
 0x270   :  { %v1105_v37 = vmul.f32 %v7613_v40, %v8329_v31  ;;  %v7615_v57 = vpop.eup %7614  ;;  %v1359_v31 = vld [vmem:[#allocation4 + $0x40] sm:$0xff]  ;;  %v8458_v40 = vpack.c.bf16 %v1388_v45, %v1384_v44  ;;  %v8494_v45 = vpack.c.bf16 %v1412_v46, %v1408_v43 }
 0x271   :  { %v8426_v58 = vpack.c.bf16 %v1363_v22, %v1359_v31  ;;  %v1387_v30 = vld [vmem:[#allocation4 + $0x120] sm:$0xff]  ;;  %v1393_v31 = vld [vmem:[#allocation4 + $0x150] sm:$0xff] }
 0x272   :  { %v8409_v63 = vadd.f32 %v1106_v41, %v1105_v37  ;;  %v8460_v41 = vpack.c.bf16 %v1390_v59, %v1386_v51  ;;  %v1389_v37 = vld [vmem:[#allocation4 + $0x130] sm:$0xff]  ;;  %v8464_v13 = vpack.c.bf16 %v1387_v30, %v1383_v14  ;;  %v1407_v44 = vld [vmem:[#allocation4 + $0x1c0] sm:$0xff]  ;;  %v8496_v51 = vpack.c.bf16 %v1414_v6, %v1410_v1 }
 0x273   :  { %v8466_v26 = vpack.c.bf16 %v1389_v37, %v1385_v10  ;;  %v1397_v22 = vld [vmem:[#allocation4 + $0x170] sm:$0xff]  ;;  %v1411_v59 = vld [vmem:[#allocation4 + $0x1e0] sm:$0xff]  ;;  %v8526_v1 = vpack.c.bf16 %v1600_v33, %v1596_v5  ;;  %v8543_v5 = vpack.c.bf16 %v1607_v2, %v1603_v47  ;;  %v1610_v33 = vld [vmem:[#allocation6 + $0xc8] sm:$0xff] }
 0x274   :  { %7616 = vtanh.f32 %v8409_v63  ;;  %v8478_v54 = vpack.c.bf16 %v1397_v22, %v1393_v31  ;;  %v1409_v14 = vld [vmem:[#allocation4 + $0x1d0] sm:$0xff]  ;;  %v8500_v10 = vpack.c.bf16 %v1411_v59, %v1407_v44  ;;  %v1589_v31 = vld [vmem:[#allocation6 + $0x20] sm:$0xff]  ;;  %v1618_v2 = vld [vmem:[#allocation6 + $0x108] sm:$0xff] }
 0x275   :  { %v1413_v30 = vld [vmem:[#allocation4 + $0x1f0] sm:$0xff]  ;;  %v8516_v35 = vpack.c.bf16 %v1589_v31, %v1585_v0  ;;  %v1593_v43 = vld [vmem:[#allocation6 + $0x40] sm:$0xff]  ;;  %9885 = vst [vmem:[#allocation13_spill] sm:$0xff] %v8543_v5 }
 0x276   :  { %v8502_v37 = vpack.c.bf16 %v1413_v30, %v1409_v14  ;;  %v1597_v46 = vld [vmem:[#allocation6 + $0x60] sm:$0xff]  ;;  %v1595_v44 = vld [vmem:[#allocation6 + $0x50] sm:$0xff]  ;;  %v1602_v30 = vld [vmem:[#allocation6 + $0x88] sm:$0xff] }
 0x277   :  { %v8528_v6 = vpack.c.bf16 %v1597_v46, %v1593_v43  ;;  %v1599_v59 = vld [vmem:[#allocation6 + $0x70] sm:$0xff]  ;;  %v1601_v0 = vld [vmem:[#allocation6 + $0x80] sm:$0xff]  ;;  %v1614_v43 = vld [vmem:[#allocation6 + $0xe8] sm:$0xff] }
 0x278   :  { %v8531_v14 = vpack.c.bf16 %v1599_v59, %v1595_v44  ;;  %v1605_v31 = vld [vmem:[#allocation6 + $0xa0] sm:$0xff]  ;;  %v1612_v46 = vld [vmem:[#allocation6 + $0xd8] sm:$0xff]  ;;  %v8548_v44 = vpack.c.bf16 %v1614_v43, %v1610_v33  ;;  %v1622_v33 = vld [vmem:[#allocation6 + $0x128] sm:$0xff] }
 0x279   :  { %v1616_v59 = vld [vmem:[#allocation6 + $0xf8] sm:$0xff]  ;;  %v8560_v32 = vpack.c.bf16 %v1622_v33, %v1618_v2  ;;  %v1630_v2 = vld [vmem:[#allocation6 + $0x168] sm:$0xff] }
 0x27a   :  { %9886 = vst [vmem:[#allocation14_spill] sm:$0xff] %v8548_v44  ;;  %v1620_v43 = vld [vmem:[#allocation6 + $0x118] sm:$0xff] }
 0x27b   :  { %9890 = vst [vmem:[#allocation18_spill] sm:$0xff] %v8560_v32  ;;  %v1628_v33 = vld [vmem:[#allocation6 + $0x158] sm:$0xff] }
 0x27e   :  { %v7617_v23 = vpop.eup %7616 }
 0x27f   :  { %v8416_v25 = vmul.f32 %v7617_v23, %v7615_v57  ;;  %v8470_v57 = vpack.c.bf16 %v1396_v16, %v1392_v17  ;;  %v8472_v23 = vpack.c.bf16 %v1398_v62, %v1394_v55  ;;  %v1586_v17 = vld [vmem:[#allocation6 + $0x8] sm:$0xff]  ;;  %v1588_v55 = vld [vmem:[#allocation6 + $0x18] sm:$0xff] }
 0x280   :  { %v1590_v16 = vld [vmem:[#allocation6 + $0x28] sm:$0xff]  ;;  %v8514_v22 = vpack.c.bf16 %v1592_v21, %v1588_v55  ;;  %v1608_v21 = vld [vmem:[#allocation6 + $0xb8] sm:$0xff] }
 0x281   :  { %1261 = vmatmul.mubr.f32.vlgmr.msra.gmra.mrb[18].mxu0 %v8416_v25  ;;  %1332 = vmatmul.mubr.f32.vlgmr.msra.gmra.mrb[18].mxu1 %v8416_v25  ;;  %v8512_v62 = vpack.c.bf16 %v1590_v16, %v1586_v17  ;;  %v1606_v17 = vld [vmem:[#allocation6 + $0xa8] sm:$0xff]  ;;  %v1604_v16 = vld [vmem:[#allocation6 + $0x98] sm:$0xff] }
 0x282   :  { %6149 = vmatpush1.bf16.msra.mxu0 %v8412_v49  ;;  %6181 = vmatpush1.bf16.msra.mxu1 %v8414_v48  ;;  %v8536_v55 = vpack.c.bf16 %v1606_v17, %v1602_v30  ;;  %v1609_v30 = vld [vmem:[#allocation6 + $0xc0] sm:$0xff] }
 0x283   :  { %6151 = vmatprep.subr.bf16.mxu0 %v8418_v29  ;;  %6183 = vmatprep.subr.bf16.mxu1 %v8420_v34  ;;  %v1613_v17 = vld [vmem:[#allocation6 + $0xe0] sm:$0xff] }
 0x284   :  { %1479 = vmatprep.mubr.f32.mxu0 %v9863_v53  ;;  %1550 = vmatprep.mubr.f32.mxu1 %v9863_v53 }
 0x286   :  { %6153 = vmatpush1.bf16.msra.mxu0 %v8426_v58  ;;  %6185 = vmatpush1.bf16.msra.mxu1 %v8428_v61 }
 0x287   :  { %6155 = vmatprep.subr.bf16.mxu0 %v8432_v8  ;;  %6187 = vmatprep.subr.bf16.mxu1 %v8434_v11 }
 0x28a   :  { %6157 = vmatpush1.bf16.msra.mxu0 %v8440_v56  ;;  %6189 = vmatpush1.bf16.msra.mxu1 %v8442_v60 }
 0x28b   :  { %6159 = vmatprep.subr.bf16.mxu0 %v8446_v12  ;;  %6191 = vmatprep.subr.bf16.mxu1 %v8448_v18 }
 0x28e   :  { %6161 = vmatpush1.bf16.msra.mxu0 %v8452_v7  ;;  %6193 = vmatpush1.bf16.msra.mxu1 %v8454_v9 }
 0x28f   :  { %6163 = vmatprep.subr.bf16.mxu0 %v8458_v40  ;;  %6195 = vmatprep.subr.bf16.mxu1 %v8460_v41 }
 0x292   :  { %6165 = vmatpush1.bf16.msra.mxu0 %v8464_v13  ;;  %6197 = vmatpush1.bf16.msra.mxu1 %v8466_v26 }
 0x293   :  { %6167 = vmatprep.subr.bf16.mxu0 %v8470_v57  ;;  %6199 = vmatprep.subr.bf16.mxu1 %v8472_v23 }
 0x296   :  { %6169 = vmatpush1.bf16.msra.mxu0 %v8476_v50  ;;  %6201 = vmatpush1.bf16.msra.mxu1 %v8478_v54 }
 0x297   :  { %6171 = vmatprep.subr.bf16.mxu0 %v8482_v15  ;;  %6203 = vmatprep.subr.bf16.mxu1 %v8484_v19 }
 0x29a   :  { %6173 = vmatpush1.bf16.msra.mxu0 %v8488_v27  ;;  %6205 = vmatpush1.bf16.msra.mxu1 %v8490_v36 }
 0x29b   :  { %6175 = vmatprep.subr.bf16.mxu0 %v8494_v45  ;;  %6207 = vmatprep.subr.bf16.mxu1 %v8496_v51 }
 0x29e   :  { %6177 = vmatpush1.bf16.msra.mxu0 %v8500_v10  ;;  %6209 = vmatpush1.bf16.msra.mxu1 %v8502_v37 }
 0x29f   :  { %6211 = vmatprep.subr.bf16.mxu0 %v8512_v62  ;;  %6243 = vmatprep.subr.bf16.mxu1 %v8514_v22 }
 0x2a1   :  { %1480 = vmatmul.mubr.f32.vlgmr.msra.gmra.mrb[4].mxu0 %v8416_v25  ;;  %1551 = vmatmul.mubr.f32.vlgmr.msra.gmra.mrb[4].mxu1 %v8416_v25  ;;  %v8519_v25 = vpack.c.bf16 %v1591_v42, %v1587_v38  ;;  %v8538_v38 = vpack.c.bf16 %v1608_v21, %v1604_v16  ;;  %v8540_v42 = vpack.c.bf16 %v1605_v31, %v1601_v0  ;;  %v1611_v0 = vld [vmem:[#allocation6 + $0xd0] sm:$0xff] }
 0x2a2   :  { %1735 = vmatprep.mubr.f32.mxu0 %v9863_v53  ;;  %1806 = vmatprep.mubr.f32.mxu1 %v9863_v53  ;;  %v8550_v16 = vpack.c.bf16 %v1616_v59, %v1612_v46  ;;  %v8552_v21 = vpack.c.bf16 %v1613_v17, %v1609_v30  ;;  %v1615_v31 = vld [vmem:[#allocation6 + $0xf0] sm:$0xff]  ;;  %v1624_v46 = vld [vmem:[#allocation6 + $0x138] sm:$0xff]  ;;  %v1617_v59 = vld [vmem:[#allocation6 + $0x100] sm:$0xff] }
 0x2a3   :  { %6213 = vmatpush1.bf16.msra.mxu0 %v8516_v35  ;;  %6245 = vmatpush1.bf16.msra.mxu1 %v8519_v25  ;;  %9883 = vst [vmem:[#allocation11_spill] sm:$0xff] %v8538_v38  ;;  %9884 = vst [vmem:[#allocation12_spill] sm:$0xff] %v8540_v42  ;;  %v8555_v47 = vpack.c.bf16 %v1615_v31, %v1611_v0  ;;  %v1621_v30 = vld [vmem:[#allocation6 + $0x120] sm:$0xff]  ;;  %v8562_v17 = vpack.c.bf16 %v1624_v46, %v1620_v43  ;;  %v1619_v0 = vld [vmem:[#allocation6 + $0x110] sm:$0xff] }
 0x2a4   :  { %6215 = vmatprep.subr.bf16.mxu0 %v8524_v24  ;;  %6247 = vmatprep.subr.bf16.mxu1 %v8526_v1  ;;  %9887 = vst [vmem:[#allocation15_spill] sm:$0xff] %v8550_v16  ;;  %9888 = vst [vmem:[#allocation16_spill] sm:$0xff] %v8552_v21  ;;  %v1623_v31 = vld [vmem:[#allocation6 + $0x130] sm:$0xff]  ;;  %v1632_v43 = vld [vmem:[#allocation6 + $0x178] sm:$0xff] }
 0x2a5   :  { %9889 = vst [vmem:[#allocation17_spill] sm:$0xff] %v8555_v47  ;;  %9891 = vst [vmem:[#allocation19_spill] sm:$0xff] %v8562_v17  ;;  %v1625_v46 = vld [vmem:[#allocation6 + $0x140] sm:$0xff] }
 0x2a7   :  { %6217 = vmatpush1.bf16.msra.mxu0 %v8528_v6  ;;  %6249 = vmatpush1.bf16.msra.mxu1 %v8531_v14 }
 0x2a8   :  { %6219 = vmatprep.subr.bf16.mxu0 %v8536_v55  ;;  %6251 = vmatprep.subr.bf16.mxu1 %v8538_v38  ;;  %v1640_v38 = vld [vmem:[#allocation6 + $0x1b8] sm:$0xff] }
 0x2ab   :  { %6221 = vmatpush1.bf16.msra.mxu0 %v8540_v42  ;;  %6253 = vmatpush1.bf16.msra.mxu1 %v8543_v5  ;;  %v8564_v5 = vpack.c.bf16 %v1621_v30, %v1617_v59  ;;  %v1629_v59 = vld [vmem:[#allocation6 + $0x160] sm:$0xff]  ;;  %v8574_v30 = vpack.c.bf16 %v1632_v43, %v1628_v33  ;;  %v1636_v42 = vld [vmem:[#allocation6 + $0x198] sm:$0xff] }
 0x2ac   :  { %6223 = vmatprep.subr.bf16.mxu0 %v8548_v44  ;;  %6255 = vmatprep.subr.bf16.mxu1 %v8550_v16  ;;  %v8567_v16 = vpack.c.bf16 %v1623_v31, %v1619_v0  ;;  %v8576_v44 = vpack.c.bf16 %v1629_v59, %v1625_v46  ;;  %v1627_v0 = vld [vmem:[#allocation6 + $0x150] sm:$0xff]  ;;  %v1633_v33 = vld [vmem:[#allocation6 + $0x180] sm:$0xff] }
 0x2ad   :  { %9892 = vst [vmem:[#allocation20_spill] sm:$0xff] %v8564_v5  ;;  %9895 = vst [vmem:[#allocation23_spill] sm:$0xff] %v8574_v30  ;;  %v1631_v31 = vld [vmem:[#allocation6 + $0x170] sm:$0xff]  ;;  %v1637_v43 = vld [vmem:[#allocation6 + $0x1a0] sm:$0xff] }
 0x2ae   :  { %9893 = vst [vmem:[#allocation21_spill] sm:$0xff] %v8567_v16  ;;  %9896 = vst [vmem:[#allocation24_spill] sm:$0xff] %v8576_v44  ;;  %v1635_v46 = vld [vmem:[#allocation6 + $0x190] sm:$0xff]  ;;  %v8588_v59 = vpack.c.bf16 %v1637_v43, %v1633_v33 }
 0x2af   :  { %6225 = vmatpush1.bf16.msra.mxu0 %v8552_v21  ;;  %6257 = vmatpush1.bf16.msra.mxu1 %v8555_v47  ;;  %v1626_v47 = vld [vmem:[#allocation6 + $0x148] sm:$0xff]  ;;  %v1647_v33 = vld [vmem:[#allocation6 + $0x1f0] sm:$0xff] }
 0x2b0   :  { %6227 = vmatprep.subr.bf16.mxu0 %v8560_v32  ;;  %6259 = vmatprep.subr.bf16.mxu1 %v8562_v17  ;;  %v8572_v21 = vpack.c.bf16 %v1630_v2, %v1626_v47  ;;  %v1634_v32 = vld [vmem:[#allocation6 + $0x188] sm:$0xff]  ;;  %v8585_v2 = vpack.c.bf16 %v1640_v38, %v1636_v42  ;;  %v1644_v38 = vld [vmem:[#allocation6 + $0x1d8] sm:$0xff] }
 0x2b1   :  { %v1638_v17 = vld [vmem:[#allocation6 + $0x1a8] sm:$0xff]  ;;  %v1648_v42 = vld [vmem:[#allocation6 + $0x1f8] sm:$0xff] }
 0x2b2   :  { %9894 = vst [vmem:[#allocation22_spill] sm:$0xff] %v8572_v21  ;;  %v8583_v47 = vpack.c.bf16 %v1638_v17, %v1634_v32  ;;  %v1641_v17 = vld [vmem:[#allocation6 + $0x1c0] sm:$0xff] }
 0x2b3   :  { %6229 = vmatpush1.bf16.msra.mxu0 %v8564_v5  ;;  %6261 = vmatpush1.bf16.msra.mxu1 %v8567_v16  ;;  %v8579_v5 = vpack.c.bf16 %v1631_v31, %v1627_v0  ;;  %v1639_v0 = vld [vmem:[#allocation6 + $0x1b0] sm:$0xff]  ;;  %v1642_v31 = vld [vmem:[#allocation6 + $0x1c8] sm:$0xff]  ;;  %v1645_v16 = vld [vmem:[#allocation6 + $0x1e0] sm:$0xff] }
 0x2b4   :  { %6231 = vmatprep.subr.bf16.mxu0 %v8572_v21  ;;  %6263 = vmatprep.subr.bf16.mxu1 %v8574_v30  ;;  %v1646_v21 = vld [vmem:[#allocation6 + $0x1e8] sm:$0xff]  ;;  %v8592_v30 = vpack.c.bf16 %v1639_v0, %v1635_v46  ;;  %v8599_v43 = vpack.c.bf16 %v1645_v16, %v1641_v17 }
 0x2b5   :  { %9897 = vst [vmem:[#allocation25_spill] sm:$0xff] %v8579_v5  ;;  %v8594_v32 = vpack.c.bf16 %v1646_v21, %v1642_v31 }
 0x2b6   :  { %9900 = vst [vmem:[#allocation32_spill] sm:$0xff] %v8599_v43 }
 0x2b7   :  { %6233 = vmatpush1.bf16.msra.mxu0 %v8576_v44  ;;  %6265 = vmatpush1.bf16.msra.mxu1 %v8579_v5  ;;  %9898 = vst [vmem:[#allocation26_spill] sm:$0xff] %v8594_v32  ;;  %v8596_v44 = vpack.c.bf16 %v1648_v42, %v1644_v38  ;;  %v1643_v5 = vld [vmem:[#allocation6 + $0x1d0] sm:$0xff] }
 0x2b8   :  { %6235 = vmatprep.subr.bf16.mxu0 %v8583_v47  ;;  %6267 = vmatprep.subr.bf16.mxu1 %v8585_v2  ;;  %v8603_v46 = vpack.c.bf16 %v1647_v33, %v1643_v5 }
 0x2b9   :  { %9899 = vst [vmem:[#allocation30_spill] sm:$0xff] %v8596_v44 }
 0x2ba   :  { %9901 = vst [vmem:[#allocation34_spill] sm:$0xff] %v8603_v46 }
 0x2bb   :  { %6237 = vmatpush1.bf16.msra.mxu0 %v8588_v59  ;;  %6269 = vmatpush1.bf16.msra.mxu1 %v8592_v30 }
 0x2bc   :  { %6239 = vmatprep.subr.bf16.mxu0 %v8594_v32  ;;  %6271 = vmatprep.subr.bf16.mxu1 %v8596_v44 }
 0x2bf   :  { %6241 = vmatpush1.bf16.msra.mxu0 %v8599_v43  ;;  %6273 = vmatpush1.bf16.msra.mxu1 %v8603_v46 }
 0x2c0   :  { %6275 = vmatprep.subr.bf16.mxu0 %v8398_v28  ;;  %6307 = vmatprep.subr.bf16.mxu1 %v8400_v39 }
 0x374   :  { %v1481_v21 = vpop.f32.mrb[4].mxu0  ;;  %v1552_v0 = vpop.f32.mrb[4].mxu1 }
 0x375   :  { %v7454_v16 = vadd.f32 %v1481_v21, %v9880_v52  ;;  %v1483_v31 = vpop.f32.mrb[5].mxu0  ;;  %v1554_v38 = vpop.f32.mrb[5].mxu1  ;;  %v7470_v46 = vadd.f32 %v1552_v0, %v8326_v3 }
 0x376   :  { %v7455_v42 = vadd.f32 %v1483_v31, %v9881_v4  ;;  %v7471_v33 = vadd.f32 %v1554_v38, %v9882_v20 }
 0x377   :  { %v5787_v5 = vmul.f32 -1.442695, %v7454_v16 }
 0x378   :  { %v5788_v17 = vmul.f32 -1.442695, %v7455_v42  ;;  %v5789_v43 = vmul.f32 -1.442695, %v7471_v33 }
 0x379   :  { %7618 = vpow2.f32 %v5787_v5 }
 0x37a   :  { %7620 = vpow2.f32 %v5788_v17 }
 0x37b   :  { %7622 = vpow2.f32 %v5789_v43 }
 0x37c   :  { %7624 = vtanh.f32 %v7470_v46 }
 0x383   :  { %v7619_v28 = vpop.eup %7618 }
 0x384   :  { %v7621_v44 = vpop.eup %7620  ;;  %v1564_v39 = vadd.f32 1.0, %v7619_v28 }
 0x385   :  { %v1570_v32 = vadd.f32 1.0, %v7621_v44  ;;  %v7623_v21 = vpop.eup %7622 }
 0x386   :  { %7626 = vrcp.f32 %v1564_v39  ;;  %v7625_v52 = vpop.eup %7624  ;;  %v1577_v5 = vadd.f32 1.0, %v7623_v21  ;;  %v2301_v39 = vld [vmem:[#allocation4] sm:$0xff] }
 0x387   :  { %7628 = vrcp.f32 %v1570_v32  ;;  %v2305_v21 = vld [vmem:[#allocation4 + $0x20] sm:$0xff] }
 0x388   :  { %7630 = vrcp.f32 %v1577_v5  ;;  %v2314_v5 = vld [vmem:[#allocation4 + $0x68] sm:$0xff] }
 0x390   :  { %v7627_v31 = vpop.eup %7626 }
 0x391   :  { %v7629_v16 = vpop.eup %7628  ;;  %v1581_v42 = vmul.f32 %v7627_v31, %v7625_v52  ;;  %v9902_v52 = vld [vmem:[#allocation11_spill] sm:$0xff]  ;;  %v2303_v31 = vld [vmem:[#allocation4 + $0x10] sm:$0xff] }
 0x392   :  { %v1580_v17 = vmul.f32 %v7629_v16, %v8409_v63  ;;  %v7631_v0 = vpop.eup %7630  ;;  %v9903_v63 = vld [vmem:[#allocation12_spill] sm:$0xff]  ;;  %v2307_v16 = vld [vmem:[#allocation4 + $0x30] sm:$0xff] }
 0x394   :  { %v8615_v38 = vadd.f32 %v1581_v42, %v1580_v17  ;;  %v2310_v42 = vld [vmem:[#allocation4 + $0x48] sm:$0xff]  ;;  %v2312_v17 = vld [vmem:[#allocation4 + $0x58] sm:$0xff] }
 0x396   :  { %7632 = vtanh.f32 %v8615_v38 }
 0x3a0   :  { %v7633_v33 = vpop.eup %7632 }
 0x3a1   :  { %v1584_v43 = vmul.f32 %v7633_v33, %v7631_v0  ;;  %v2316_v0 = vld [vmem:[#allocation4 + $0x78] sm:$0xff] }
 0x3a3   :  { %1736 = vmatmul.mubr.f32.vlgmr.msra.gmra.mrb[20].mxu0 %v1584_v43  ;;  %1807 = vmatmul.mubr.f32.vlgmr.msra.gmra.mrb[20].mxu1 %v1584_v43 }
 0x3a4   :  { %6277 = vmatpush1.bf16.msra.mxu0 %v8412_v49  ;;  %6309 = vmatpush1.bf16.msra.mxu1 %v8414_v48  ;;  %v9904_v49 = vld [vmem:[#allocation13_spill] sm:$0xff]  ;;  %v9905_v48 = vld [vmem:[#allocation14_spill] sm:$0xff] }
 0x3a5   :  { %6279 = vmatprep.subr.bf16.mxu0 %v8418_v29  ;;  %6311 = vmatprep.subr.bf16.mxu1 %v8420_v34  ;;  %v9906_v29 = vld [vmem:[#allocation15_spill] sm:$0xff]  ;;  %v9907_v34 = vld [vmem:[#allocation16_spill] sm:$0xff] }
 0x3a6   :  { %1954 = vmatprep.mubr.f32.mxu0 %v9863_v53  ;;  %2025 = vmatprep.mubr.f32.mxu1 %v9863_v53 }
 0x3a8   :  { %6281 = vmatpush1.bf16.msra.mxu0 %v8426_v58  ;;  %6313 = vmatpush1.bf16.msra.mxu1 %v8428_v61  ;;  %v9908_v58 = vld [vmem:[#allocation17_spill] sm:$0xff]  ;;  %v9909_v61 = vld [vmem:[#allocation18_spill] sm:$0xff] }
 0x3a9   :  { %6283 = vmatprep.subr.bf16.mxu0 %v8432_v8  ;;  %6315 = vmatprep.subr.bf16.mxu1 %v8434_v11  ;;  %v9910_v8 = vld [vmem:[#allocation19_spill] sm:$0xff]  ;;  %v9911_v11 = vld [vmem:[#allocation20_spill] sm:$0xff] }
 0x3ac   :  { %6285 = vmatpush1.bf16.msra.mxu0 %v8440_v56  ;;  %6317 = vmatpush1.bf16.msra.mxu1 %v8442_v60  ;;  %v9912_v56 = vld [vmem:[#allocation21_spill] sm:$0xff]  ;;  %v9913_v60 = vld [vmem:[#allocation22_spill] sm:$0xff] }
 0x3ad   :  { %6287 = vmatprep.subr.bf16.mxu0 %v8446_v12  ;;  %6319 = vmatprep.subr.bf16.mxu1 %v8448_v18  ;;  %v9914_v12 = vld [vmem:[#allocation23_spill] sm:$0xff]  ;;  %v9915_v18 = vld [vmem:[#allocation24_spill] sm:$0xff] }
 0x3b0   :  { %6289 = vmatpush1.bf16.msra.mxu0 %v8452_v7  ;;  %6321 = vmatpush1.bf16.msra.mxu1 %v8454_v9  ;;  %v9916_v7 = vld [vmem:[#allocation25_spill] sm:$0xff]  ;;  %v9917_v9 = vld [vmem:[#allocation26_spill] sm:$0xff] }
 0x3b1   :  { %6291 = vmatprep.subr.bf16.mxu0 %v8458_v40  ;;  %6323 = vmatprep.subr.bf16.mxu1 %v8460_v41  ;;  %v9918_v40 = vld [vmem:[#allocation30_spill] sm:$0xff]  ;;  %v9919_v41 = vld [vmem:[#allocation32_spill] sm:$0xff] }
 0x3b4   :  { %6293 = vmatpush1.bf16.msra.mxu0 %v8464_v13  ;;  %6325 = vmatpush1.bf16.msra.mxu1 %v8466_v26  ;;  %v9920_v13 = vld [vmem:[#allocation34_spill] sm:$0xff]  ;;  %v2302_v26 = vld [vmem:[#allocation4 + $0x8] sm:$0xff] }
 0x3b5   :  { %6295 = vmatprep.subr.bf16.mxu0 %v8470_v57  ;;  %6327 = vmatprep.subr.bf16.mxu1 %v8472_v23  ;;  %v2306_v57 = vld [vmem:[#allocation4 + $0x28] sm:$0xff]  ;;  %v2304_v23 = vld [vmem:[#allocation4 + $0x18] sm:$0xff] }
 0x3b8   :  { %6297 = vmatpush1.bf16.msra.mxu0 %v8476_v50  ;;  %6329 = vmatpush1.bf16.msra.mxu1 %v8478_v54  ;;  %v8684_v50 = vpack.c.bf16 %v2306_v57, %v2302_v26  ;;  %v2308_v54 = vld [vmem:[#allocation4 + $0x38] sm:$0xff]  ;;  %v2323_v26 = vld [vmem:[#allocation4 + $0xb0] sm:$0xff]  ;;  %v2326_v57 = vld [vmem:[#allocation4 + $0xc8] sm:$0xff] }
 0x3b9   :  { %6299 = vmatprep.subr.bf16.mxu0 %v8482_v15  ;;  %6331 = vmatprep.subr.bf16.mxu1 %v8484_v19  ;;  %v8686_v15 = vpack.c.bf16 %v2308_v54, %v2304_v23  ;;  %v2330_v23 = vld [vmem:[#allocation4 + $0xe8] sm:$0xff]  ;;  %v2328_v54 = vld [vmem:[#allocation4 + $0xd8] sm:$0xff] }
 0x3bc   :  { %6301 = vmatpush1.bf16.msra.mxu0 %v8488_v27  ;;  %6333 = vmatpush1.bf16.msra.mxu1 %v8490_v36  ;;  %v9921_v36 = vld [vmem:[#allocation29_spill] sm:$0xff] }
 0x3bd   :  { %6303 = vmatprep.subr.bf16.mxu0 %v8494_v45  ;;  %6335 = vmatprep.subr.bf16.mxu1 %v8496_v51 }
 0x3c0   :  { %6305 = vmatpush1.bf16.msra.mxu0 %v8500_v10  ;;  %6337 = vmatpush1.bf16.msra.mxu1 %v8502_v37 }
 0x3c1   :  { %6339 = vmatprep.subr.bf16.mxu0 %v8512_v62  ;;  %6371 = vmatprep.subr.bf16.mxu1 %v8514_v22 }
 0x3c3   :  { %1955 = vmatmul.mubr.f32.vlgmr.msra.gmra.mrb[6].mxu0 %v1584_v43  ;;  %2026 = vmatmul.mubr.f32.vlgmr.msra.gmra.mrb[6].mxu1 %v1584_v43 }
 0x3c4   :  { %6341 = vmatpush1.bf16.msra.mxu0 %v8516_v35  ;;  %6373 = vmatpush1.bf16.msra.mxu1 %v8519_v25 }
 0x3c5   :  { %6343 = vmatprep.subr.bf16.mxu0 %v8524_v24  ;;  %6375 = vmatprep.subr.bf16.mxu1 %v8526_v1 }
 0x3c6   :  { %2210 = vmatprep.mubr.f32.mxu0 %v9863_v53  ;;  %2281 = vmatprep.mubr.f32.mxu1 %v9863_v53 }
 0x3c8   :  { %6345 = vmatpush1.bf16.msra.mxu0 %v8528_v6  ;;  %6377 = vmatpush1.bf16.msra.mxu1 %v8531_v14 }
 0x3c9   :  { %6347 = vmatprep.subr.bf16.mxu0 %v8536_v55  ;;  %6379 = vmatprep.subr.bf16.mxu1 %v9902_v52  ;;  %v8698_v52 = vpack.c.bf16 %v2305_v21, %v2301_v39  ;;  %v2346_v39 = vld [vmem:[#allocation4 + $0x168] sm:$0xff]  ;;  %v2344_v21 = vld [vmem:[#allocation4 + $0x158] sm:$0xff] }
 0x3cc   :  { %6349 = vmatpush1.bf16.msra.mxu0 %v9903_v63  ;;  %6381 = vmatpush1.bf16.msra.mxu1 %v9904_v49  ;;  %v8700_v63 = vpack.c.bf16 %v2307_v16, %v2303_v31  ;;  %v2313_v49 = vld [vmem:[#allocation4 + $0x60] sm:$0xff]  ;;  %v2348_v31 = vld [vmem:[#allocation4 + $0x178] sm:$0xff] }
 0x3cd   :  { %6351 = vmatprep.subr.bf16.mxu0 %v9905_v48  ;;  %6383 = vmatprep.subr.bf16.mxu1 %v9906_v29  ;;  %v8704_v29 = vpack.c.bf16 %v2314_v5, %v2310_v42  ;;  %v2341_v5 = vld [vmem:[#allocation4 + $0x140] sm:$0xff] }
 0x3d0   :  { %6353 = vmatpush1.bf16.msra.mxu0 %v9907_v34  ;;  %6385 = vmatpush1.bf16.msra.mxu1 %v9908_v58  ;;  %v8706_v34 = vpack.c.bf16 %v2316_v0, %v2312_v17  ;;  %v2311_v58 = vld [vmem:[#allocation4 + $0x50] sm:$0xff]  ;;  %v2345_v17 = vld [vmem:[#allocation4 + $0x160] sm:$0xff] }
 0x3d1   :  { %6355 = vmatprep.subr.bf16.mxu0 %v9909_v61  ;;  %6387 = vmatprep.subr.bf16.mxu1 %v9910_v8  ;;  %v2315_v61 = vld [vmem:[#allocation4 + $0x70] sm:$0xff]  ;;  %v2318_v8 = vld [vmem:[#allocation4 + $0x88] sm:$0xff] }
 0x3d4   :  { %6357 = vmatpush1.bf16.msra.mxu0 %v9911_v11  ;;  %6389 = vmatpush1.bf16.msra.mxu1 %v9912_v56  ;;  %v2322_v11 = vld [vmem:[#allocation4 + $0xa8] sm:$0xff]  ;;  %v2320_v56 = vld [vmem:[#allocation4 + $0x98] sm:$0xff] }
 0x3d5   :  { %6359 = vmatprep.subr.bf16.mxu0 %v9913_v60  ;;  %6391 = vmatprep.subr.bf16.mxu1 %v9914_v12  ;;  %v2324_v60 = vld [vmem:[#allocation4 + $0xb8] sm:$0xff] }
 0x3d8   :  { %6361 = vmatpush1.bf16.msra.mxu0 %v9915_v18  ;;  %6393 = vmatpush1.bf16.msra.mxu1 %v9916_v7  ;;  %v8714_v18 = vpack.c.bf16 %v2315_v61, %v2311_v58  ;;  %v2317_v7 = vld [vmem:[#allocation4 + $0x80] sm:$0xff]  ;;  %v2354_v58 = vld [vmem:[#allocation4 + $0x1a8] sm:$0xff]  ;;  %v2352_v61 = vld [vmem:[#allocation4 + $0x198] sm:$0xff] }
 0x3d9   :  { %6363 = vmatprep.subr.bf16.mxu0 %v8583_v47  ;;  %6395 = vmatprep.subr.bf16.mxu1 %v8585_v2 }
 0x3dc   :  { %6365 = vmatpush1.bf16.msra.mxu0 %v8588_v59  ;;  %6397 = vmatpush1.bf16.msra.mxu1 %v8592_v30 }
 0x3dd   :  { %6367 = vmatprep.subr.bf16.mxu0 %v9917_v9  ;;  %6399 = vmatprep.subr.bf16.mxu1 %v9918_v40  ;;  %v2321_v9 = vld [vmem:[#allocation4 + $0xa0] sm:$0xff]  ;;  %v8718_v40 = vpack.c.bf16 %v2322_v11, %v2318_v8  ;;  %v2356_v8 = vld [vmem:[#allocation4 + $0x1b8] sm:$0xff]  ;;  %v8762_v11 = vpack.c.bf16 %v2345_v17, %v2341_v5 }
 0x3de   :  { %v2535_v5 = vld [vmem:[#allocation6] sm:$0xff] }
 0x3df   :  { %v2539_v17 = vld [vmem:[#allocation6 + $0x20] sm:$0xff] }
 0x3e0   :  { %6369 = vmatpush1.bf16.msra.mxu0 %v9919_v41  ;;  %6401 = vmatpush1.bf16.msra.mxu1 %v9920_v13  ;;  %v8720_v41 = vpack.c.bf16 %v2324_v60, %v2320_v56  ;;  %v2319_v13 = vld [vmem:[#allocation4 + $0x90] sm:$0xff]  ;;  %v2349_v60 = vld [vmem:[#allocation4 + $0x180] sm:$0xff] }
 0x3e1   :  { %6403 = vmatprep.subr.bf16.mxu0 %v8684_v50  ;;  %6435 = vmatprep.subr.bf16.mxu1 %v8686_v15 }
 0x496   :  { %v1956_v19 = vpop.f32.mrb[6].mxu0  ;;  %v2027_v27 = vpop.f32.mrb[6].mxu1 }
 0x497   :  { %v7456_v45 = vadd.f32 %v1956_v19, %v9921_v36  ;;  %v1958_v51 = vpop.f32.mrb[7].mxu0  ;;  %v2029_v10 = vpop.f32.mrb[7].mxu1  ;;  %v7472_v24 = vadd.f32 %v2027_v27, %v8326_v3  ;;  %v2332_v19 = vld [vmem:[#allocation4 + $0xf8] sm:$0xff]  ;;  %v8726_v27 = vpack.c.bf16 %v2321_v9, %v2317_v7  ;;  %v2353_v7 = vld [vmem:[#allocation4 + $0x1a0] sm:$0xff] }
 0x498   :  { %v7457_v37 = vadd.f32 %v1958_v51, %v9881_v4  ;;  %v7473_v35 = vadd.f32 %v2029_v10, %v9882_v20  ;;  %v2325_v51 = vld [vmem:[#allocation4 + $0xc0] sm:$0xff] }
 0x499   :  { %v5790_v62 = vmul.f32 -1.442695, %v7456_v45  ;;  %v8728_v45 = vpack.c.bf16 %v2323_v26, %v2319_v13  ;;  %v2329_v10 = vld [vmem:[#allocation4 + $0xe0] sm:$0xff]  ;;  %v8770_v13 = vpack.c.bf16 %v2356_v8, %v2352_v61  ;;  %v2351_v26 = vld [vmem:[#allocation4 + $0x190] sm:$0xff]  ;;  %v2544_v61 = vld [vmem:[#allocation6 + $0x48] sm:$0xff] }
 0x49a   :  { %v5791_v22 = vmul.f32 -1.442695, %v7457_v37  ;;  %v5792_v25 = vmul.f32 -1.442695, %v7473_v35  ;;  %v8732_v37 = vpack.c.bf16 %v2330_v23, %v2326_v57  ;;  %v2331_v35 = vld [vmem:[#allocation4 + $0xf0] sm:$0xff]  ;;  %v2358_v23 = vld [vmem:[#allocation4 + $0x1c8] sm:$0xff] }
 0x49b   :  { %7634 = vpow2.f32 %v5790_v62  ;;  %v8734_v62 = vpack.c.bf16 %v2332_v19, %v2328_v54  ;;  %v2355_v57 = vld [vmem:[#allocation4 + $0x1b0] sm:$0xff]  ;;  %v2362_v54 = vld [vmem:[#allocation4 + $0x1e8] sm:$0xff]  ;;  %v2360_v19 = vld [vmem:[#allocation4 + $0x1d8] sm:$0xff] }
 0x49c   :  { %7636 = vpow2.f32 %v5791_v22  ;;  %v2327_v22 = vld [vmem:[#allocation4 + $0xd0] sm:$0xff]  ;;  %v2548_v8 = vld [vmem:[#allocation6 + $0x68] sm:$0xff] }
 0x49d   :  { %7638 = vpow2.f32 %v5792_v25  ;;  %v2334_v25 = vld [vmem:[#allocation4 + $0x108] sm:$0xff] }
 0x49e   :  { %7640 = vtanh.f32 %v7472_v24  ;;  %v2338_v24 = vld [vmem:[#allocation4 + $0x128] sm:$0xff] }
 0x4a5   :  { %v7635_v1 = vpop.eup %7634 }
 0x4a6   :  { %v7637_v6 = vpop.eup %7636  ;;  %v2039_v14 = vadd.f32 1.0, %v7635_v1  ;;  %v2336_v1 = vld [vmem:[#allocation4 + $0x118] sm:$0xff] }
 0x4a7   :  { %v2045_v55 = vadd.f32 1.0, %v7637_v6  ;;  %v7639_v44 = vpop.eup %7638  ;;  %v2340_v6 = vld [vmem:[#allocation4 + $0x138] sm:$0xff] }
 0x4a8   :  { %7642 = vrcp.f32 %v2039_v14  ;;  %v7641_v30 = vpop.eup %7640  ;;  %v2052_v32 = vadd.f32 1.0, %v7639_v44  ;;  %v8738_v14 = vpack.c.bf16 %v2329_v10, %v2325_v51  ;;  %v2333_v44 = vld [vmem:[#allocation4 + $0x100] sm:$0xff]  ;;  %v2364_v51 = vld [vmem:[#allocation4 + $0x1f8] sm:$0xff]  ;;  %v8774_v10 = vpack.c.bf16 %v2353_v7, %v2349_v60 }
 0x4a9   :  { %7644 = vrcp.f32 %v2045_v55  ;;  %v8740_v55 = vpack.c.bf16 %v2331_v35, %v2327_v22  ;;  %v8776_v22 = vpack.c.bf16 %v2355_v57, %v2351_v26  ;;  %v2357_v35 = vld [vmem:[#allocation4 + $0x1c0] sm:$0xff]  ;;  %v2546_v60 = vld [vmem:[#allocation6 + $0x58] sm:$0xff]  ;;  %v8810_v7 = vpack.c.bf16 %v2548_v8, %v2544_v61  ;;  %v2557_v61 = vld [vmem:[#allocation6 + $0xb0] sm:$0xff] }
 0x4aa   :  { %7646 = vrcp.f32 %v2052_v32  ;;  %v2339_v32 = vld [vmem:[#allocation4 + $0x130] sm:$0xff]  ;;  %v2550_v26 = vld [vmem:[#allocation6 + $0x78] sm:$0xff]  ;;  %v2543_v57 = vld [vmem:[#allocation6 + $0x40] sm:$0xff] }
 0x4b2   :  { %v7643_v47 = vpop.eup %7642 }
 0x4b3   :  { %v7645_v2 = vpop.eup %7644  ;;  %v2056_v59 = vmul.f32 %v7643_v47, %v7641_v30  ;;  %v2337_v30 = vld [vmem:[#allocation4 + $0x120] sm:$0xff]  ;;  %v8744_v47 = vpack.c.bf16 %v2338_v24, %v2334_v25  ;;  %v8780_v25 = vpack.c.bf16 %v2362_v54, %v2358_v23  ;;  %v8782_v24 = vpack.c.bf16 %v2364_v51, %v2360_v19  ;;  %v2545_v51 = vld [vmem:[#allocation6 + $0x50] sm:$0xff] }
 0x4b4   :  { %v2055_v46 = vmul.f32 %v7645_v2, %v8615_v38  ;;  %v7647_v33 = vpop.eup %7646  ;;  %v2309_v38 = vld [vmem:[#allocation4 + $0x40] sm:$0xff]  ;;  %v8746_v2 = vpack.c.bf16 %v2340_v6, %v2336_v1  ;;  %v8750_v16 = vpack.c.bf16 %v2337_v30, %v2333_v44  ;;  %v2359_v6 = vld [vmem:[#allocation4 + $0x1d0] sm:$0xff]  ;;  %v8812_v54 = vpack.c.bf16 %v2550_v26, %v2546_v60  ;;  %v2560_v60 = vld [vmem:[#allocation6 + $0xc8] sm:$0xff] }
 0x4b5   :  { %v8712_v12 = vpack.c.bf16 %v2313_v49, %v2309_v38  ;;  %v2347_v38 = vld [vmem:[#allocation4 + $0x170] sm:$0xff]  ;;  %v2350_v49 = vld [vmem:[#allocation4 + $0x188] sm:$0xff]  ;;  %v2361_v1 = vld [vmem:[#allocation4 + $0x1e0] sm:$0xff] }
 0x4b6   :  { %v8695_v28 = vadd.f32 %v2056_v59, %v2055_v46  ;;  %v2335_v59 = vld [vmem:[#allocation4 + $0x110] sm:$0xff]  ;;  %v2342_v46 = vld [vmem:[#allocation4 + $0x148] sm:$0xff]  ;;  %v8768_v9 = vpack.c.bf16 %v2354_v58, %v2350_v49  ;;  %v8786_v30 = vpack.c.bf16 %v2361_v1, %v2357_v35  ;;  %v2547_v23 = vld [vmem:[#allocation6 + $0x60] sm:$0xff] }
 0x4b7   :  { %v8752_v42 = vpack.c.bf16 %v2339_v32, %v2335_v59  ;;  %v8756_v0 = vpack.c.bf16 %v2346_v39, %v2342_v46  ;;  %v2363_v44 = vld [vmem:[#allocation4 + $0x1f0] sm:$0xff]  ;;  %v2536_v32 = vld [vmem:[#allocation6 + $0x8] sm:$0xff]  ;;  %v2538_v39 = vld [vmem:[#allocation6 + $0x18] sm:$0xff]  ;;  %v8814_v19 = vpack.c.bf16 %v2547_v23, %v2543_v57 }
 0x4b8   :  { %7648 = vtanh.f32 %v8695_v28  ;;  %v8788_v59 = vpack.c.bf16 %v2363_v44, %v2359_v6  ;;  %v2540_v46 = vld [vmem:[#allocation6 + $0x28] sm:$0xff]  ;;  %v2537_v49 = vld [vmem:[#allocation6 + $0x10] sm:$0xff]  ;;  %v2562_v57 = vld [vmem:[#allocation6 + $0xd8] sm:$0xff] }
 0x4b9   :  { %v2541_v58 = vld [vmem:[#allocation6 + $0x30] sm:$0xff]  ;;  %v2552_v6 = vld [vmem:[#allocation6 + $0x88] sm:$0xff] }
 0x4ba   :  { %v2549_v35 = vld [vmem:[#allocation6 + $0x70] sm:$0xff]  ;;  %v2556_v44 = vld [vmem:[#allocation6 + $0xa8] sm:$0xff] }
 0x4bb   :  { %v8817_v1 = vpack.c.bf16 %v2549_v35, %v2545_v51  ;;  %v2564_v26 = vld [vmem:[#allocation6 + $0xe8] sm:$0xff]  ;;  %v2566_v51 = vld [vmem:[#allocation6 + $0xf8] sm:$0xff]  ;;  %v2559_v35 = vld [vmem:[#allocation6 + $0xc0] sm:$0xff] }
 0x4bc   :  { %v8834_v23 = vpack.c.bf16 %v2564_v26, %v2560_v60  ;;  %v2570_v60 = vld [vmem:[#allocation6 + $0x118] sm:$0xff] }
 0x4be   :  { %9925 = vst [vmem:[#allocation14_spill] sm:$0xff] %v8834_v23 }
 0x4c2   :  { %v7649_v43 = vpop.eup %7648 }
 0x4c3   :  { %v8702_v48 = vmul.f32 %v7649_v43, %v7647_v33  ;;  %v8758_v33 = vpack.c.bf16 %v2348_v31, %v2344_v21  ;;  %v2343_v43 = vld [vmem:[#allocation4 + $0x150] sm:$0xff]  ;;  %v8798_v21 = vpack.c.bf16 %v2540_v46, %v2536_v32  ;;  %v2542_v31 = vld [vmem:[#allocation6 + $0x38] sm:$0xff]  ;;  %v8822_v46 = vpack.c.bf16 %v2556_v44, %v2552_v6  ;;  %v2563_v6 = vld [vmem:[#allocation6 + $0xe0] sm:$0xff] }
 0x4c4   :  { %v8764_v56 = vpack.c.bf16 %v2347_v38, %v2343_v43  ;;  %v8800_v43 = vpack.c.bf16 %v2542_v31, %v2538_v39  ;;  %v8802_v38 = vpack.c.bf16 %v2539_v17, %v2535_v5  ;;  %v2554_v32 = vld [vmem:[#allocation6 + $0x98] sm:$0xff]  ;;  %v2551_v31 = vld [vmem:[#allocation6 + $0x80] sm:$0xff]  ;;  %v8836_v44 = vpack.c.bf16 %v2566_v51, %v2562_v57 }
 0x4c5   :  { %2211 = vmatmul.mubr.f32.vlgmr.msra.gmra.mrb[22].mxu0 %v8702_v48  ;;  %2282 = vmatmul.mubr.f32.vlgmr.msra.gmra.mrb[22].mxu1 %v8702_v48  ;;  %v2558_v39 = vld [vmem:[#allocation6 + $0xb8] sm:$0xff]  ;;  %v2555_v5 = vld [vmem:[#allocation6 + $0xa0] sm:$0xff] }
 0x4c6   :  { %6405 = vmatpush1.bf16.msra.mxu0 %v8698_v52  ;;  %6437 = vmatpush1.bf16.msra.mxu1 %v8700_v63  ;;  %v8824_v17 = vpack.c.bf16 %v2558_v39, %v2554_v32  ;;  %9926 = vst [vmem:[#allocation15_spill] sm:$0xff] %v8836_v44  ;;  %v8838_v32 = vpack.c.bf16 %v2563_v6, %v2559_v35  ;;  %v2561_v39 = vld [vmem:[#allocation6 + $0xd0] sm:$0xff]  ;;  %v2574_v57 = vld [vmem:[#allocation6 + $0x138] sm:$0xff]  ;;  %v2567_v51 = vld [vmem:[#allocation6 + $0x100] sm:$0xff] }
 0x4c7   :  { %6407 = vmatprep.subr.bf16.mxu0 %v8704_v29  ;;  %6439 = vmatprep.subr.bf16.mxu1 %v8706_v34  ;;  %v2571_v35 = vld [vmem:[#allocation6 + $0x120] sm:$0xff]  ;;  %v8848_v6 = vpack.c.bf16 %v2574_v57, %v2570_v60  ;;  %v2582_v60 = vld [vmem:[#allocation6 + $0x178] sm:$0xff] }
 0x4c8   :  { %2429 = vmatprep.mubr.f32.mxu0 %v9863_v53  ;;  %2500 = vmatprep.mubr.f32.mxu1 %v9863_v53  ;;  %9922 = vst [vmem:[#allocation11_spill] sm:$0xff] %v8824_v17  ;;  %9927 = vst [vmem:[#allocation16_spill] sm:$0xff] %v8838_v32  ;;  %v2575_v57 = vld [vmem:[#allocation6 + $0x140] sm:$0xff] }
 0x4c9   :  { %9930 = vst [vmem:[#allocation19_spill] sm:$0xff] %v8848_v6 }
 0x4ca   :  { %6409 = vmatpush1.bf16.msra.mxu0 %v8712_v12  ;;  %6441 = vmatpush1.bf16.msra.mxu1 %v8714_v18 }
 0x4cb   :  { %6411 = vmatprep.subr.bf16.mxu0 %v8718_v40  ;;  %6443 = vmatprep.subr.bf16.mxu1 %v8720_v41 }
 0x4ce   :  { %6413 = vmatpush1.bf16.msra.mxu0 %v8726_v27  ;;  %6445 = vmatpush1.bf16.msra.mxu1 %v8728_v45 }
 0x4cf   :  { %6415 = vmatprep.subr.bf16.mxu0 %v8732_v37  ;;  %6447 = vmatprep.subr.bf16.mxu1 %v8734_v62 }
 0x4d2   :  { %6417 = vmatpush1.bf16.msra.mxu0 %v8738_v14  ;;  %6449 = vmatpush1.bf16.msra.mxu1 %v8740_v55 }
 0x4d3   :  { %6419 = vmatprep.subr.bf16.mxu0 %v8744_v47  ;;  %6451 = vmatprep.subr.bf16.mxu1 %v8746_v2 }
 0x4d6   :  { %6421 = vmatpush1.bf16.msra.mxu0 %v8750_v16  ;;  %6453 = vmatpush1.bf16.msra.mxu1 %v8752_v42 }
 0x4d7   :  { %6423 = vmatprep.subr.bf16.mxu0 %v8756_v0  ;;  %6455 = vmatprep.subr.bf16.mxu1 %v8758_v33 }
 0x4da   :  { %6425 = vmatpush1.bf16.msra.mxu0 %v8762_v11  ;;  %6457 = vmatpush1.bf16.msra.mxu1 %v8764_v56 }
 0x4db   :  { %6427 = vmatprep.subr.bf16.mxu0 %v8768_v9  ;;  %6459 = vmatprep.subr.bf16.mxu1 %v8770_v13 }
 0x4de   :  { %6429 = vmatpush1.bf16.msra.mxu0 %v8774_v10  ;;  %6461 = vmatpush1.bf16.msra.mxu1 %v8776_v22 }
 0x4df   :  { %6431 = vmatprep.subr.bf16.mxu0 %v8780_v25  ;;  %6463 = vmatprep.subr.bf16.mxu1 %v8782_v24 }
 0x4e2   :  { %6433 = vmatpush1.bf16.msra.mxu0 %v8786_v30  ;;  %6465 = vmatpush1.bf16.msra.mxu1 %v8788_v59 }
 0x4e3   :  { %6467 = vmatprep.subr.bf16.mxu0 %v8798_v21  ;;  %6499 = vmatprep.subr.bf16.mxu1 %v8800_v43 }
 0x4e5   :  { %2430 = vmatmul.mubr.f32.vlgmr.msra.gmra.mrb[8].mxu0 %v8702_v48  ;;  %2501 = vmatmul.mubr.f32.vlgmr.msra.gmra.mrb[8].mxu1 %v8702_v48  ;;  %v8805_v48 = vpack.c.bf16 %v2541_v58, %v2537_v49  ;;  %v8826_v49 = vpack.c.bf16 %v2555_v5, %v2551_v31  ;;  %v2553_v58 = vld [vmem:[#allocation6 + $0x90] sm:$0xff] }
 0x4e6   :  { %2685 = vmatprep.mubr.f32.mxu0 %v9863_v53  ;;  %2756 = vmatprep.mubr.f32.mxu1 %v9863_v53  ;;  %v8829_v8 = vpack.c.bf16 %v2557_v61, %v2553_v58  ;;  %v2565_v31 = vld [vmem:[#allocation6 + $0xf0] sm:$0xff]  ;;  %v2568_v58 = vld [vmem:[#allocation6 + $0x108] sm:$0xff] }
 0x4e7   :  { %6469 = vmatpush1.bf16.msra.mxu0 %v8802_v38  ;;  %6501 = vmatpush1.bf16.msra.mxu1 %v8805_v48  ;;  %9923 = vst [vmem:[#allocation12_spill] sm:$0xff] %v8826_v49  ;;  %v8841_v5 = vpack.c.bf16 %v2565_v31, %v2561_v39  ;;  %v2572_v61 = vld [vmem:[#allocation6 + $0x128] sm:$0xff]  ;;  %v2569_v39 = vld [vmem:[#allocation6 + $0x110] sm:$0xff] }
 0x4e8   :  { %6471 = vmatprep.subr.bf16.mxu0 %v8810_v7  ;;  %6503 = vmatprep.subr.bf16.mxu1 %v8812_v54  ;;  %9924 = vst [vmem:[#allocation13_spill] sm:$0xff] %v8829_v8  ;;  %v8846_v26 = vpack.c.bf16 %v2572_v61, %v2568_v58  ;;  %v2573_v31 = vld [vmem:[#allocation6 + $0x130] sm:$0xff]  ;;  %v2580_v58 = vld [vmem:[#allocation6 + $0x168] sm:$0xff]  ;;  %v2578_v61 = vld [vmem:[#allocation6 + $0x158] sm:$0xff] }
 0x4e9   :  { %9928 = vst [vmem:[#allocation17_spill] sm:$0xff] %v8841_v5 }
 0x4ea   :  { %9929 = vst [vmem:[#allocation18_spill] sm:$0xff] %v8846_v26 }
 0x4eb   :  { %6473 = vmatpush1.bf16.msra.mxu0 %v8814_v19  ;;  %6505 = vmatpush1.bf16.msra.mxu1 %v8817_v1 }
 0x4ec   :  { %6475 = vmatprep.subr.bf16.mxu0 %v8822_v46  ;;  %6507 = vmatprep.subr.bf16.mxu1 %v8824_v17  ;;  %v2590_v17 = vld [vmem:[#allocation6 + $0x1b8] sm:$0xff] }
 0x4ef   :  { %6477 = vmatpush1.bf16.msra.mxu0 %v8826_v49  ;;  %6509 = vmatpush1.bf16.msra.mxu1 %v8829_v8  ;;  %v8850_v8 = vpack.c.bf16 %v2571_v35, %v2567_v51  ;;  %v2579_v51 = vld [vmem:[#allocation6 + $0x160] sm:$0xff]  ;;  %v8860_v35 = vpack.c.bf16 %v2582_v60, %v2578_v61  ;;  %v2586_v49 = vld [vmem:[#allocation6 + $0x198] sm:$0xff] }
 0x4f0   :  { %6479 = vmatprep.subr.bf16.mxu0 %v8834_v23  ;;  %6511 = vmatprep.subr.bf16.mxu1 %v8836_v44  ;;  %v8853_v44 = vpack.c.bf16 %v2573_v31, %v2569_v39  ;;  %v8862_v23 = vpack.c.bf16 %v2579_v51, %v2575_v57  ;;  %v2577_v39 = vld [vmem:[#allocation6 + $0x150] sm:$0xff]  ;;  %v2583_v61 = vld [vmem:[#allocation6 + $0x180] sm:$0xff] }
 0x4f1   :  { %9931 = vst [vmem:[#allocation20_spill] sm:$0xff] %v8850_v8  ;;  %9934 = vst [vmem:[#allocation23_spill] sm:$0xff] %v8860_v35  ;;  %v2581_v31 = vld [vmem:[#allocation6 + $0x170] sm:$0xff]  ;;  %v2587_v60 = vld [vmem:[#allocation6 + $0x1a0] sm:$0xff] }
 0x4f2   :  { %9932 = vst [vmem:[#allocation21_spill] sm:$0xff] %v8853_v44  ;;  %9935 = vst [vmem:[#allocation24_spill] sm:$0xff] %v8862_v23  ;;  %v2585_v57 = vld [vmem:[#allocation6 + $0x190] sm:$0xff]  ;;  %v8874_v51 = vpack.c.bf16 %v2587_v60, %v2583_v61 }
 0x4f3   :  { %6481 = vmatpush1.bf16.msra.mxu0 %v8838_v32  ;;  %6513 = vmatpush1.bf16.msra.mxu1 %v8841_v5  ;;  %v2576_v5 = vld [vmem:[#allocation6 + $0x148] sm:$0xff]  ;;  %v2597_v61 = vld [vmem:[#allocation6 + $0x1f0] sm:$0xff] }
 0x4f4   :  { %6483 = vmatprep.subr.bf16.mxu0 %v8846_v26  ;;  %6515 = vmatprep.subr.bf16.mxu1 %v8848_v6  ;;  %v8858_v32 = vpack.c.bf16 %v2580_v58, %v2576_v5  ;;  %v2584_v26 = vld [vmem:[#allocation6 + $0x188] sm:$0xff]  ;;  %v8871_v58 = vpack.c.bf16 %v2590_v17, %v2586_v49  ;;  %v2594_v17 = vld [vmem:[#allocation6 + $0x1d8] sm:$0xff] }
 0x4f5   :  { %v2588_v6 = vld [vmem:[#allocation6 + $0x1a8] sm:$0xff]  ;;  %v2598_v49 = vld [vmem:[#allocation6 + $0x1f8] sm:$0xff] }
 0x4f6   :  { %9933 = vst [vmem:[#allocation22_spill] sm:$0xff] %v8858_v32  ;;  %v8869_v5 = vpack.c.bf16 %v2588_v6, %v2584_v26  ;;  %v2591_v6 = vld [vmem:[#allocation6 + $0x1c0] sm:$0xff] }
 0x4f7   :  { %6485 = vmatpush1.bf16.msra.mxu0 %v8850_v8  ;;  %6517 = vmatpush1.bf16.msra.mxu1 %v8853_v44  ;;  %v8865_v8 = vpack.c.bf16 %v2581_v31, %v2577_v39  ;;  %v2589_v39 = vld [vmem:[#allocation6 + $0x1b0] sm:$0xff]  ;;  %v2592_v31 = vld [vmem:[#allocation6 + $0x1c8] sm:$0xff]  ;;  %v2595_v44 = vld [vmem:[#allocation6 + $0x1e0] sm:$0xff] }
 0x4f8   :  { %6487 = vmatprep.subr.bf16.mxu0 %v8858_v32  ;;  %6519 = vmatprep.subr.bf16.mxu1 %v8860_v35  ;;  %v2596_v32 = vld [vmem:[#allocation6 + $0x1e8] sm:$0xff]  ;;  %v8878_v35 = vpack.c.bf16 %v2589_v39, %v2585_v57  ;;  %v8885_v60 = vpack.c.bf16 %v2595_v44, %v2591_v6 }
 0x4f9   :  { %9936 = vst [vmem:[#allocation25_spill] sm:$0xff] %v8865_v8  ;;  %v8880_v26 = vpack.c.bf16 %v2596_v32, %v2592_v31 }
 0x4fa   :  { %9939 = vst [vmem:[#allocation32_spill] sm:$0xff] %v8885_v60 }
 0x4fb   :  { %6489 = vmatpush1.bf16.msra.mxu0 %v8862_v23  ;;  %6521 = vmatpush1.bf16.msra.mxu1 %v8865_v8  ;;  %9937 = vst [vmem:[#allocation26_spill] sm:$0xff] %v8880_v26  ;;  %v8882_v23 = vpack.c.bf16 %v2598_v49, %v2594_v17  ;;  %v2593_v8 = vld [vmem:[#allocation6 + $0x1d0] sm:$0xff] }
 0x4fc   :  { %6491 = vmatprep.subr.bf16.mxu0 %v8869_v5  ;;  %6523 = vmatprep.subr.bf16.mxu1 %v8871_v58  ;;  %v8889_v57 = vpack.c.bf16 %v2597_v61, %v2593_v8 }
 0x4fd   :  { %9938 = vst [vmem:[#allocation30_spill] sm:$0xff] %v8882_v23 }
 0x4fe   :  { %9940 = vst [vmem:[#allocation34_spill] sm:$0xff] %v8889_v57 }
 0x4ff   :  { %6493 = vmatpush1.bf16.msra.mxu0 %v8874_v51  ;;  %6525 = vmatpush1.bf16.msra.mxu1 %v8878_v35 }
 0x500   :  { %6495 = vmatprep.subr.bf16.mxu0 %v8880_v26  ;;  %6527 = vmatprep.subr.bf16.mxu1 %v8882_v23 }
 0x503   :  { %6497 = vmatpush1.bf16.msra.mxu0 %v8885_v60  ;;  %6529 = vmatpush1.bf16.msra.mxu1 %v8889_v57 }
 0x504   :  { %6531 = vmatprep.subr.bf16.mxu0 %v8684_v50  ;;  %6563 = vmatprep.subr.bf16.mxu1 %v8686_v15 }
 0x5b8   :  { %v2431_v32 = vpop.f32.mrb[8].mxu0  ;;  %v2502_v39 = vpop.f32.mrb[8].mxu1 }
 0x5b9   :  { %v7458_v44 = vadd.f32 %v2431_v32, %v9921_v36  ;;  %v2433_v31 = vpop.f32.mrb[9].mxu0  ;;  %v2504_v17 = vpop.f32.mrb[9].mxu1  ;;  %v7474_v57 = vadd.f32 %v2502_v39, %v8326_v3 }
 0x5ba   :  { %v7459_v49 = vadd.f32 %v2433_v31, %v9881_v4  ;;  %v7475_v61 = vadd.f32 %v2504_v17, %v9882_v20 }
 0x5bb   :  { %v5793_v8 = vmul.f32 -1.442695, %v7458_v44 }
 0x5bc   :  { %v5794_v6 = vmul.f32 -1.442695, %v7459_v49  ;;  %v5795_v60 = vmul.f32 -1.442695, %v7475_v61 }
 0x5bd   :  { %7650 = vpow2.f32 %v5793_v8 }
 0x5be   :  { %7652 = vpow2.f32 %v5794_v6 }
 0x5bf   :  { %7654 = vpow2.f32 %v5795_v60 }
 0x5c0   :  { %7656 = vtanh.f32 %v7474_v57 }
 0x5c7   :  { %v7651_v50 = vpop.eup %7650 }
 0x5c8   :  { %v7653_v23 = vpop.eup %7652  ;;  %v2514_v15 = vadd.f32 1.0, %v7651_v50 }
 0x5c9   :  { %v2520_v26 = vadd.f32 1.0, %v7653_v23  ;;  %v7655_v32 = vpop.eup %7654 }
 0x5ca   :  { %7658 = vrcp.f32 %v2514_v15  ;;  %v7657_v36 = vpop.eup %7656  ;;  %v2527_v8 = vadd.f32 1.0, %v7655_v32  ;;  %v3251_v15 = vld [vmem:[#allocation4] sm:$0xff] }
 0x5cb   :  { %7660 = vrcp.f32 %v2520_v26  ;;  %v3255_v32 = vld [vmem:[#allocation4 + $0x20] sm:$0xff] }
 0x5cc   :  { %7662 = vrcp.f32 %v2527_v8  ;;  %v3264_v8 = vld [vmem:[#allocation4 + $0x68] sm:$0xff] }
 0x5d4   :  { %v7659_v31 = vpop.eup %7658 }
 0x5d5   :  { %v7661_v44 = vpop.eup %7660  ;;  %v2531_v49 = vmul.f32 %v7659_v31, %v7657_v36  ;;  %v9941_v36 = vld [vmem:[#allocation11_spill] sm:$0xff]  ;;  %v3253_v31 = vld [vmem:[#allocation4 + $0x10] sm:$0xff] }
 0x5d6   :  { %v2530_v6 = vmul.f32 %v7661_v44, %v8695_v28  ;;  %v7663_v39 = vpop.eup %7662  ;;  %v9942_v28 = vld [vmem:[#allocation12_spill] sm:$0xff]  ;;  %v3257_v44 = vld [vmem:[#allocation4 + $0x30] sm:$0xff] }
 0x5d8   :  { %v8901_v17 = vadd.f32 %v2531_v49, %v2530_v6  ;;  %v3260_v49 = vld [vmem:[#allocation4 + $0x48] sm:$0xff]  ;;  %v3262_v6 = vld [vmem:[#allocation4 + $0x58] sm:$0xff] }
 0x5da   :  { %7664 = vtanh.f32 %v8901_v17 }
 0x5e4   :  { %v7665_v61 = vpop.eup %7664 }
 0x5e5   :  { %v2534_v60 = vmul.f32 %v7665_v61, %v7663_v39  ;;  %v3266_v39 = vld [vmem:[#allocation4 + $0x78] sm:$0xff] }
 0x5e7   :  { %2686 = vmatmul.mubr.f32.vlgmr.msra.gmra.mrb[24].mxu0 %v2534_v60  ;;  %2757 = vmatmul.mubr.f32.vlgmr.msra.gmra.mrb[24].mxu1 %v2534_v60 }
 0x5e8   :  { %6533 = vmatpush1.bf16.msra.mxu0 %v8698_v52  ;;  %6565 = vmatpush1.bf16.msra.mxu1 %v8700_v63  ;;  %v9943_v52 = vld [vmem:[#allocation13_spill] sm:$0xff]  ;;  %v9944_v63 = vld [vmem:[#allocation14_spill] sm:$0xff] }
 0x5e9   :  { %6535 = vmatprep.subr.bf16.mxu0 %v8704_v29  ;;  %6567 = vmatprep.subr.bf16.mxu1 %v8706_v34  ;;  %v9945_v29 = vld [vmem:[#allocation15_spill] sm:$0xff]  ;;  %v9946_v34 = vld [vmem:[#allocation16_spill] sm:$0xff] }
 0x5ea   :  { %2904 = vmatprep.mubr.f32.mxu0 %v9863_v53  ;;  %2975 = vmatprep.mubr.f32.mxu1 %v9863_v53 }
 0x5ec   :  { %6537 = vmatpush1.bf16.msra.mxu0 %v8712_v12  ;;  %6569 = vmatpush1.bf16.msra.mxu1 %v8714_v18  ;;  %v9947_v12 = vld [vmem:[#allocation17_spill] sm:$0xff]  ;;  %v9948_v18 = vld [vmem:[#allocation18_spill] sm:$0xff] }
 0x5ed   :  { %6539 = vmatprep.subr.bf16.mxu0 %v8718_v40  ;;  %6571 = vmatprep.subr.bf16.mxu1 %v8720_v41  ;;  %v9949_v40 = vld [vmem:[#allocation19_spill] sm:$0xff]  ;;  %v9950_v41 = vld [vmem:[#allocation20_spill] sm:$0xff] }
 0x5f0   :  { %6541 = vmatpush1.bf16.msra.mxu0 %v8726_v27  ;;  %6573 = vmatpush1.bf16.msra.mxu1 %v8728_v45  ;;  %v9951_v27 = vld [vmem:[#allocation21_spill] sm:$0xff]  ;;  %v9952_v45 = vld [vmem:[#allocation22_spill] sm:$0xff] }
 0x5f1   :  { %6543 = vmatprep.subr.bf16.mxu0 %v8732_v37  ;;  %6575 = vmatprep.subr.bf16.mxu1 %v8734_v62  ;;  %v9953_v37 = vld [vmem:[#allocation23_spill] sm:$0xff]  ;;  %v9954_v62 = vld [vmem:[#allocation24_spill] sm:$0xff] }
 0x5f4   :  { %6545 = vmatpush1.bf16.msra.mxu0 %v8738_v14  ;;  %6577 = vmatpush1.bf16.msra.mxu1 %v8740_v55  ;;  %v9955_v14 = vld [vmem:[#allocation25_spill] sm:$0xff]  ;;  %v9956_v55 = vld [vmem:[#allocation26_spill] sm:$0xff] }
 0x5f5   :  { %6547 = vmatprep.subr.bf16.mxu0 %v8744_v47  ;;  %6579 = vmatprep.subr.bf16.mxu1 %v8746_v2  ;;  %v9957_v47 = vld [vmem:[#allocation30_spill] sm:$0xff]  ;;  %v9958_v2 = vld [vmem:[#allocation32_spill] sm:$0xff] }
 0x5f8   :  { %6549 = vmatpush1.bf16.msra.mxu0 %v8750_v16  ;;  %6581 = vmatpush1.bf16.msra.mxu1 %v8752_v42  ;;  %v9959_v16 = vld [vmem:[#allocation34_spill] sm:$0xff]  ;;  %v3252_v42 = vld [vmem:[#allocation4 + $0x8] sm:$0xff] }
 0x5f9   :  { %6551 = vmatprep.subr.bf16.mxu0 %v8756_v0  ;;  %6583 = vmatprep.subr.bf16.mxu1 %v8758_v33  ;;  %v3256_v0 = vld [vmem:[#allocation4 + $0x28] sm:$0xff]  ;;  %v3254_v33 = vld [vmem:[#allocation4 + $0x18] sm:$0xff] }
 0x5fc   :  { %6553 = vmatpush1.bf16.msra.mxu0 %v8762_v11  ;;  %6585 = vmatpush1.bf16.msra.mxu1 %v8764_v56  ;;  %v8970_v11 = vpack.c.bf16 %v3256_v0, %v3252_v42  ;;  %v3258_v56 = vld [vmem:[#allocation4 + $0x38] sm:$0xff]  ;;  %v3273_v42 = vld [vmem:[#allocation4 + $0xb0] sm:$0xff]  ;;  %v3276_v0 = vld [vmem:[#allocation4 + $0xc8] sm:$0xff] }
 0x5fd   :  { %6555 = vmatprep.subr.bf16.mxu0 %v8768_v9  ;;  %6587 = vmatprep.subr.bf16.mxu1 %v8770_v13  ;;  %v8972_v9 = vpack.c.bf16 %v3258_v56, %v3254_v33  ;;  %v3280_v33 = vld [vmem:[#allocation4 + $0xe8] sm:$0xff]  ;;  %v3278_v56 = vld [vmem:[#allocation4 + $0xd8] sm:$0xff] }
 0x600   :  { %6557 = vmatpush1.bf16.msra.mxu0 %v8774_v10  ;;  %6589 = vmatpush1.bf16.msra.mxu1 %v8776_v22  ;;  %v9960_v22 = vld [vmem:[#allocation29_spill] sm:$0xff] }
 0x601   :  { %6559 = vmatprep.subr.bf16.mxu0 %v8780_v25  ;;  %6591 = vmatprep.subr.bf16.mxu1 %v8782_v24 }
 0x604   :  { %6561 = vmatpush1.bf16.msra.mxu0 %v8786_v30  ;;  %6593 = vmatpush1.bf16.msra.mxu1 %v8788_v59 }
 0x605   :  { %6595 = vmatprep.subr.bf16.mxu0 %v8798_v21  ;;  %6627 = vmatprep.subr.bf16.mxu1 %v8800_v43 }
 0x607   :  { %2905 = vmatmul.mubr.f32.vlgmr.msra.gmra.mrb[10].mxu0 %v2534_v60  ;;  %2976 = vmatmul.mubr.f32.vlgmr.msra.gmra.mrb[10].mxu1 %v2534_v60 }
 0x608   :  { %6597 = vmatpush1.bf16.msra.mxu0 %v8802_v38  ;;  %6629 = vmatpush1.bf16.msra.mxu1 %v8805_v48 }
 0x609   :  { %6599 = vmatprep.subr.bf16.mxu0 %v8810_v7  ;;  %6631 = vmatprep.subr.bf16.mxu1 %v8812_v54 }
 0x60a   :  { %3160 = vmatprep.mubr.f32.mxu0 %v9863_v53  ;;  %3231 = vmatprep.mubr.f32.mxu1 %v9863_v53 }
 0x60c   :  { %6601 = vmatpush1.bf16.msra.mxu0 %v8814_v19  ;;  %6633 = vmatpush1.bf16.msra.mxu1 %v8817_v1 }
 0x60d   :  { %6603 = vmatprep.subr.bf16.mxu0 %v8822_v46  ;;  %6635 = vmatprep.subr.bf16.mxu1 %v9941_v36  ;;  %v8984_v36 = vpack.c.bf16 %v3255_v32, %v3251_v15  ;;  %v3296_v15 = vld [vmem:[#allocation4 + $0x168] sm:$0xff]  ;;  %v3294_v32 = vld [vmem:[#allocation4 + $0x158] sm:$0xff] }
 0x610   :  { %6605 = vmatpush1.bf16.msra.mxu0 %v9942_v28  ;;  %6637 = vmatpush1.bf16.msra.mxu1 %v9943_v52  ;;  %v8986_v28 = vpack.c.bf16 %v3257_v44, %v3253_v31  ;;  %v3263_v52 = vld [vmem:[#allocation4 + $0x60] sm:$0xff]  ;;  %v3298_v31 = vld [vmem:[#allocation4 + $0x178] sm:$0xff] }
 0x611   :  { %6607 = vmatprep.subr.bf16.mxu0 %v9944_v63  ;;  %6639 = vmatprep.subr.bf16.mxu1 %v9945_v29  ;;  %v8990_v29 = vpack.c.bf16 %v3264_v8, %v3260_v49  ;;  %v3291_v8 = vld [vmem:[#allocation4 + $0x140] sm:$0xff] }
 0x614   :  { %6609 = vmatpush1.bf16.msra.mxu0 %v9946_v34  ;;  %6641 = vmatpush1.bf16.msra.mxu1 %v9947_v12  ;;  %v8992_v34 = vpack.c.bf16 %v3266_v39, %v3262_v6  ;;  %v3261_v12 = vld [vmem:[#allocation4 + $0x50] sm:$0xff]  ;;  %v3295_v6 = vld [vmem:[#allocation4 + $0x160] sm:$0xff] }
 0x615   :  { %6611 = vmatprep.subr.bf16.mxu0 %v9948_v18  ;;  %6643 = vmatprep.subr.bf16.mxu1 %v9949_v40  ;;  %v3265_v18 = vld [vmem:[#allocation4 + $0x70] sm:$0xff]  ;;  %v3268_v40 = vld [vmem:[#allocation4 + $0x88] sm:$0xff] }
 0x618   :  { %6613 = vmatpush1.bf16.msra.mxu0 %v9950_v41  ;;  %6645 = vmatpush1.bf16.msra.mxu1 %v9951_v27  ;;  %v3272_v41 = vld [vmem:[#allocation4 + $0xa8] sm:$0xff]  ;;  %v3270_v27 = vld [vmem:[#allocation4 + $0x98] sm:$0xff] }
 0x619   :  { %6615 = vmatprep.subr.bf16.mxu0 %v9952_v45  ;;  %6647 = vmatprep.subr.bf16.mxu1 %v9953_v37  ;;  %v3274_v45 = vld [vmem:[#allocation4 + $0xb8] sm:$0xff] }
 0x61c   :  { %6617 = vmatpush1.bf16.msra.mxu0 %v9954_v62  ;;  %6649 = vmatpush1.bf16.msra.mxu1 %v9955_v14  ;;  %v9000_v62 = vpack.c.bf16 %v3265_v18, %v3261_v12  ;;  %v3267_v14 = vld [vmem:[#allocation4 + $0x80] sm:$0xff]  ;;  %v3304_v12 = vld [vmem:[#allocation4 + $0x1a8] sm:$0xff]  ;;  %v3302_v18 = vld [vmem:[#allocation4 + $0x198] sm:$0xff] }
 0x61d   :  { %6619 = vmatprep.subr.bf16.mxu0 %v8869_v5  ;;  %6651 = vmatprep.subr.bf16.mxu1 %v8871_v58 }
 0x620   :  { %6621 = vmatpush1.bf16.msra.mxu0 %v8874_v51  ;;  %6653 = vmatpush1.bf16.msra.mxu1 %v8878_v35 }
 0x621   :  { %6623 = vmatprep.subr.bf16.mxu0 %v9956_v55  ;;  %6655 = vmatprep.subr.bf16.mxu1 %v9957_v47  ;;  %v3271_v55 = vld [vmem:[#allocation4 + $0xa0] sm:$0xff]  ;;  %v9004_v47 = vpack.c.bf16 %v3272_v41, %v3268_v40  ;;  %v3306_v40 = vld [vmem:[#allocation4 + $0x1b8] sm:$0xff]  ;;  %v9048_v41 = vpack.c.bf16 %v3295_v6, %v3291_v8 }
 0x622   :  { %v3485_v8 = vld [vmem:[#allocation6] sm:$0xff] }
 0x623   :  { %v3489_v6 = vld [vmem:[#allocation6 + $0x20] sm:$0xff] }
 0x624   :  { %6625 = vmatpush1.bf16.msra.mxu0 %v9958_v2  ;;  %6657 = vmatpush1.bf16.msra.mxu1 %v9959_v16  ;;  %v9006_v2 = vpack.c.bf16 %v3274_v45, %v3270_v27  ;;  %v3269_v16 = vld [vmem:[#allocation4 + $0x90] sm:$0xff]  ;;  %v3299_v45 = vld [vmem:[#allocation4 + $0x180] sm:$0xff] }
 0x625   :  { %6659 = vmatprep.subr.bf16.mxu0 %v8970_v11  ;;  %6691 = vmatprep.subr.bf16.mxu1 %v8972_v9 }
 0x6da   :  { %v2906_v13 = vpop.f32.mrb[10].mxu0  ;;  %v2977_v10 = vpop.f32.mrb[10].mxu1 }
 0x6db   :  { %v7460_v25 = vadd.f32 %v2906_v13, %v9960_v22  ;;  %v2908_v24 = vpop.f32.mrb[11].mxu0  ;;  %v2979_v30 = vpop.f32.mrb[11].mxu1  ;;  %v7476_v7 = vadd.f32 %v2977_v10, %v8326_v3  ;;  %v3282_v13 = vld [vmem:[#allocation4 + $0xf8] sm:$0xff]  ;;  %v9012_v10 = vpack.c.bf16 %v3271_v55, %v3267_v14  ;;  %v3303_v14 = vld [vmem:[#allocation4 + $0x1a0] sm:$0xff] }
 0x6dc   :  { %v7461_v59 = vadd.f32 %v2908_v24, %v9881_v4  ;;  %v7477_v38 = vadd.f32 %v2979_v30, %v9882_v20  ;;  %v3275_v24 = vld [vmem:[#allocation4 + $0xc0] sm:$0xff] }
 0x6dd   :  { %v5796_v21 = vmul.f32 -1.442695, %v7460_v25  ;;  %v9014_v25 = vpack.c.bf16 %v3273_v42, %v3269_v16  ;;  %v3279_v30 = vld [vmem:[#allocation4 + $0xe0] sm:$0xff]  ;;  %v9056_v16 = vpack.c.bf16 %v3306_v40, %v3302_v18  ;;  %v3301_v42 = vld [vmem:[#allocation4 + $0x190] sm:$0xff]  ;;  %v3494_v18 = vld [vmem:[#allocation6 + $0x48] sm:$0xff] }
 0x6de   :  { %v5797_v43 = vmul.f32 -1.442695, %v7461_v59  ;;  %v5798_v48 = vmul.f32 -1.442695, %v7477_v38  ;;  %v9018_v59 = vpack.c.bf16 %v3280_v33, %v3276_v0  ;;  %v3281_v38 = vld [vmem:[#allocation4 + $0xf0] sm:$0xff]  ;;  %v3308_v33 = vld [vmem:[#allocation4 + $0x1c8] sm:$0xff] }
 0x6df   :  { %7666 = vpow2.f32 %v5796_v21  ;;  %v9020_v21 = vpack.c.bf16 %v3282_v13, %v3278_v56  ;;  %v3305_v0 = vld [vmem:[#allocation4 + $0x1b0] sm:$0xff]  ;;  %v3312_v56 = vld [vmem:[#allocation4 + $0x1e8] sm:$0xff]  ;;  %v3310_v13 = vld [vmem:[#allocation4 + $0x1d8] sm:$0xff] }
 0x6e0   :  { %7668 = vpow2.f32 %v5797_v43  ;;  %v3277_v43 = vld [vmem:[#allocation4 + $0xd0] sm:$0xff]  ;;  %v3498_v40 = vld [vmem:[#allocation6 + $0x68] sm:$0xff] }
 0x6e1   :  { %7670 = vpow2.f32 %v5798_v48  ;;  %v3284_v48 = vld [vmem:[#allocation4 + $0x108] sm:$0xff] }
 0x6e2   :  { %7672 = vtanh.f32 %v7476_v7  ;;  %v3288_v7 = vld [vmem:[#allocation4 + $0x128] sm:$0xff] }
 0x6e9   :  { %v7667_v54 = vpop.eup %7666 }
 0x6ea   :  { %v7669_v19 = vpop.eup %7668  ;;  %v2989_v1 = vadd.f32 1.0, %v7667_v54  ;;  %v3286_v54 = vld [vmem:[#allocation4 + $0x118] sm:$0xff] }
 0x6eb   :  { %v2995_v46 = vadd.f32 1.0, %v7669_v19  ;;  %v7671_v23 = vpop.eup %7670  ;;  %v3290_v19 = vld [vmem:[#allocation4 + $0x138] sm:$0xff] }
 0x6ec   :  { %7674 = vrcp.f32 %v2989_v1  ;;  %v7673_v35 = vpop.eup %7672  ;;  %v3002_v26 = vadd.f32 1.0, %v7671_v23  ;;  %v9024_v1 = vpack.c.bf16 %v3279_v30, %v3275_v24  ;;  %v3283_v23 = vld [vmem:[#allocation4 + $0x100] sm:$0xff]  ;;  %v3314_v24 = vld [vmem:[#allocation4 + $0x1f8] sm:$0xff]  ;;  %v9060_v30 = vpack.c.bf16 %v3303_v14, %v3299_v45 }
 0x6ed   :  { %7676 = vrcp.f32 %v2995_v46  ;;  %v9026_v46 = vpack.c.bf16 %v3281_v38, %v3277_v43  ;;  %v9062_v43 = vpack.c.bf16 %v3305_v0, %v3301_v42  ;;  %v3307_v38 = vld [vmem:[#allocation4 + $0x1c0] sm:$0xff]  ;;  %v3496_v45 = vld [vmem:[#allocation6 + $0x58] sm:$0xff]  ;;  %v9096_v14 = vpack.c.bf16 %v3498_v40, %v3494_v18  ;;  %v3507_v18 = vld [vmem:[#allocation6 + $0xb0] sm:$0xff] }
 0x6ee   :  { %7678 = vrcp.f32 %v3002_v26  ;;  %v3289_v26 = vld [vmem:[#allocation4 + $0x130] sm:$0xff]  ;;  %v3500_v42 = vld [vmem:[#allocation6 + $0x78] sm:$0xff]  ;;  %v3493_v0 = vld [vmem:[#allocation6 + $0x40] sm:$0xff] }
 0x6f6   :  { %v7675_v5 = vpop.eup %7674 }
 0x6f7   :  { %v7677_v58 = vpop.eup %7676  ;;  %v3006_v51 = vmul.f32 %v7675_v5, %v7673_v35  ;;  %v3287_v35 = vld [vmem:[#allocation4 + $0x120] sm:$0xff]  ;;  %v9030_v5 = vpack.c.bf16 %v3288_v7, %v3284_v48  ;;  %v9066_v48 = vpack.c.bf16 %v3312_v56, %v3308_v33  ;;  %v9068_v7 = vpack.c.bf16 %v3314_v24, %v3310_v13  ;;  %v3495_v24 = vld [vmem:[#allocation6 + $0x50] sm:$0xff] }
 0x6f8   :  { %v3005_v57 = vmul.f32 %v7677_v58, %v8901_v17  ;;  %v7679_v61 = vpop.eup %7678  ;;  %v3259_v17 = vld [vmem:[#allocation4 + $0x40] sm:$0xff]  ;;  %v9032_v58 = vpack.c.bf16 %v3290_v19, %v3286_v54  ;;  %v9036_v44 = vpack.c.bf16 %v3287_v35, %v3283_v23  ;;  %v3309_v19 = vld [vmem:[#allocation4 + $0x1d0] sm:$0xff]  ;;  %v9098_v56 = vpack.c.bf16 %v3500_v42, %v3496_v45  ;;  %v3510_v45 = vld [vmem:[#allocation6 + $0xc8] sm:$0xff] }
 0x6f9   :  { %v8998_v37 = vpack.c.bf16 %v3263_v52, %v3259_v17  ;;  %v3297_v17 = vld [vmem:[#allocation4 + $0x170] sm:$0xff]  ;;  %v3300_v52 = vld [vmem:[#allocation4 + $0x188] sm:$0xff]  ;;  %v3311_v54 = vld [vmem:[#allocation4 + $0x1e0] sm:$0xff] }
 0x6fa   :  { %v8981_v50 = vadd.f32 %v3006_v51, %v3005_v57  ;;  %v3285_v51 = vld [vmem:[#allocation4 + $0x110] sm:$0xff]  ;;  %v3292_v57 = vld [vmem:[#allocation4 + $0x148] sm:$0xff]  ;;  %v9054_v55 = vpack.c.bf16 %v3304_v12, %v3300_v52  ;;  %v9072_v35 = vpack.c.bf16 %v3311_v54, %v3307_v38  ;;  %v3497_v33 = vld [vmem:[#allocation6 + $0x60] sm:$0xff] }
 0x6fb   :  { %v9038_v49 = vpack.c.bf16 %v3289_v26, %v3285_v51  ;;  %v9042_v39 = vpack.c.bf16 %v3296_v15, %v3292_v57  ;;  %v3313_v23 = vld [vmem:[#allocation4 + $0x1f0] sm:$0xff]  ;;  %v3486_v26 = vld [vmem:[#allocation6 + $0x8] sm:$0xff]  ;;  %v3488_v15 = vld [vmem:[#allocation6 + $0x18] sm:$0xff]  ;;  %v9100_v13 = vpack.c.bf16 %v3497_v33, %v3493_v0 }
 0x6fc   :  { %7680 = vtanh.f32 %v8981_v50  ;;  %v9074_v51 = vpack.c.bf16 %v3313_v23, %v3309_v19  ;;  %v3490_v57 = vld [vmem:[#allocation6 + $0x28] sm:$0xff]  ;;  %v3487_v52 = vld [vmem:[#allocation6 + $0x10] sm:$0xff]  ;;  %v3512_v0 = vld [vmem:[#allocation6 + $0xd8] sm:$0xff] }
 0x6fd   :  { %v3491_v12 = vld [vmem:[#allocation6 + $0x30] sm:$0xff]  ;;  %v3502_v19 = vld [vmem:[#allocation6 + $0x88] sm:$0xff] }
 0x6fe   :  { %v3499_v38 = vld [vmem:[#allocation6 + $0x70] sm:$0xff]  ;;  %v3506_v23 = vld [vmem:[#allocation6 + $0xa8] sm:$0xff] }
 0x6ff   :  { %v9103_v54 = vpack.c.bf16 %v3499_v38, %v3495_v24  ;;  %v3514_v42 = vld [vmem:[#allocation6 + $0xe8] sm:$0xff]  ;;  %v3516_v24 = vld [vmem:[#allocation6 + $0xf8] sm:$0xff]  ;;  %v3509_v38 = vld [vmem:[#allocation6 + $0xc0] sm:$0xff] }
 0x700   :  { %v9120_v33 = vpack.c.bf16 %v3514_v42, %v3510_v45  ;;  %v3520_v45 = vld [vmem:[#allocation6 + $0x118] sm:$0xff] }
 0x702   :  { %9964 = vst [vmem:[#allocation14_spill] sm:$0xff] %v9120_v33 }
 0x706   :  { %v7681_v60 = vpop.eup %7680 }
 0x707   :  { %v8988_v63 = vmul.f32 %v7681_v60, %v7679_v61  ;;  %v9044_v61 = vpack.c.bf16 %v3298_v31, %v3294_v32  ;;  %v3293_v60 = vld [vmem:[#allocation4 + $0x150] sm:$0xff]  ;;  %v9084_v32 = vpack.c.bf16 %v3490_v57, %v3486_v26  ;;  %v3492_v31 = vld [vmem:[#allocation6 + $0x38] sm:$0xff]  ;;  %v9108_v57 = vpack.c.bf16 %v3506_v23, %v3502_v19  ;;  %v3513_v19 = vld [vmem:[#allocation6 + $0xe0] sm:$0xff] }
 0x708   :  { %v9050_v27 = vpack.c.bf16 %v3297_v17, %v3293_v60  ;;  %v9086_v60 = vpack.c.bf16 %v3492_v31, %v3488_v15  ;;  %v9088_v17 = vpack.c.bf16 %v3489_v6, %v3485_v8  ;;  %v3504_v26 = vld [vmem:[#allocation6 + $0x98] sm:$0xff]  ;;  %v3501_v31 = vld [vmem:[#allocation6 + $0x80] sm:$0xff]  ;;  %v9122_v23 = vpack.c.bf16 %v3516_v24, %v3512_v0 }
 0x709   :  { %3161 = vmatmul.mubr.f32.vlgmr.msra.gmra.mrb[26].mxu0 %v8988_v63  ;;  %3232 = vmatmul.mubr.f32.vlgmr.msra.gmra.mrb[26].mxu1 %v8988_v63  ;;  %v3508_v15 = vld [vmem:[#allocation6 + $0xb8] sm:$0xff]  ;;  %v3505_v8 = vld [vmem:[#allocation6 + $0xa0] sm:$0xff] }
 0x70a   :  { %6661 = vmatpush1.bf16.msra.mxu0 %v8984_v36  ;;  %6693 = vmatpush1.bf16.msra.mxu1 %v8986_v28  ;;  %v9110_v6 = vpack.c.bf16 %v3508_v15, %v3504_v26  ;;  %9965 = vst [vmem:[#allocation15_spill] sm:$0xff] %v9122_v23  ;;  %v9124_v26 = vpack.c.bf16 %v3513_v19, %v3509_v38  ;;  %v3511_v15 = vld [vmem:[#allocation6 + $0xd0] sm:$0xff]  ;;  %v3524_v0 = vld [vmem:[#allocation6 + $0x138] sm:$0xff]  ;;  %v3517_v24 = vld [vmem:[#allocation6 + $0x100] sm:$0xff] }
 0x70b   :  { %6663 = vmatprep.subr.bf16.mxu0 %v8990_v29  ;;  %6695 = vmatprep.subr.bf16.mxu1 %v8992_v34  ;;  %v3521_v38 = vld [vmem:[#allocation6 + $0x120] sm:$0xff]  ;;  %v9134_v19 = vpack.c.bf16 %v3524_v0, %v3520_v45  ;;  %v3532_v45 = vld [vmem:[#allocation6 + $0x178] sm:$0xff] }
 0x70c   :  { %3379 = vmatprep.mubr.f32.mxu0 %v9863_v53  ;;  %3450 = vmatprep.mubr.f32.mxu1 %v9863_v53  ;;  %9961 = vst [vmem:[#allocation11_spill] sm:$0xff] %v9110_v6  ;;  %9966 = vst [vmem:[#allocation16_spill] sm:$0xff] %v9124_v26  ;;  %v3525_v0 = vld [vmem:[#allocation6 + $0x140] sm:$0xff] }
 0x70d   :  { %9969 = vst [vmem:[#allocation19_spill] sm:$0xff] %v9134_v19 }
 0x70e   :  { %6665 = vmatpush1.bf16.msra.mxu0 %v8998_v37  ;;  %6697 = vmatpush1.bf16.msra.mxu1 %v9000_v62 }
 0x70f   :  { %6667 = vmatprep.subr.bf16.mxu0 %v9004_v47  ;;  %6699 = vmatprep.subr.bf16.mxu1 %v9006_v2 }
 0x712   :  { %6669 = vmatpush1.bf16.msra.mxu0 %v9012_v10  ;;  %6701 = vmatpush1.bf16.msra.mxu1 %v9014_v25 }
 0x713   :  { %6671 = vmatprep.subr.bf16.mxu0 %v9018_v59  ;;  %6703 = vmatprep.subr.bf16.mxu1 %v9020_v21 }
 0x716   :  { %6673 = vmatpush1.bf16.msra.mxu0 %v9024_v1  ;;  %6705 = vmatpush1.bf16.msra.mxu1 %v9026_v46 }
 0x717   :  { %6675 = vmatprep.subr.bf16.mxu0 %v9030_v5  ;;  %6707 = vmatprep.subr.bf16.mxu1 %v9032_v58 }
 0x71a   :  { %6677 = vmatpush1.bf16.msra.mxu0 %v9036_v44  ;;  %6709 = vmatpush1.bf16.msra.mxu1 %v9038_v49 }
 0x71b   :  { %6679 = vmatprep.subr.bf16.mxu0 %v9042_v39  ;;  %6711 = vmatprep.subr.bf16.mxu1 %v9044_v61 }
 0x71e   :  { %6681 = vmatpush1.bf16.msra.mxu0 %v9048_v41  ;;  %6713 = vmatpush1.bf16.msra.mxu1 %v9050_v27 }
 0x71f   :  { %6683 = vmatprep.subr.bf16.mxu0 %v9054_v55  ;;  %6715 = vmatprep.subr.bf16.mxu1 %v9056_v16 }
 0x722   :  { %6685 = vmatpush1.bf16.msra.mxu0 %v9060_v30  ;;  %6717 = vmatpush1.bf16.msra.mxu1 %v9062_v43 }
 0x723   :  { %6687 = vmatprep.subr.bf16.mxu0 %v9066_v48  ;;  %6719 = vmatprep.subr.bf16.mxu1 %v9068_v7 }
 0x726   :  { %6689 = vmatpush1.bf16.msra.mxu0 %v9072_v35  ;;  %6721 = vmatpush1.bf16.msra.mxu1 %v9074_v51 }
 0x727   :  { %6723 = vmatprep.subr.bf16.mxu0 %v9084_v32  ;;  %6755 = vmatprep.subr.bf16.mxu1 %v9086_v60 }
 0x729   :  { %3380 = vmatmul.mubr.f32.vlgmr.msra.gmra.mrb[12].mxu0 %v8988_v63  ;;  %3451 = vmatmul.mubr.f32.vlgmr.msra.gmra.mrb[12].mxu1 %v8988_v63  ;;  %v9091_v63 = vpack.c.bf16 %v3491_v12, %v3487_v52  ;;  %v9112_v52 = vpack.c.bf16 %v3505_v8, %v3501_v31  ;;  %v3503_v12 = vld [vmem:[#allocation6 + $0x90] sm:$0xff] }
 0x72a   :  { %3635 = vmatprep.mubr.f32.mxu0 %v9863_v53  ;;  %3706 = vmatprep.mubr.f32.mxu1 %v9863_v53  ;;  %v9115_v40 = vpack.c.bf16 %v3507_v18, %v3503_v12  ;;  %v3515_v31 = vld [vmem:[#allocation6 + $0xf0] sm:$0xff]  ;;  %v3518_v12 = vld [vmem:[#allocation6 + $0x108] sm:$0xff] }
 0x72b   :  { %6725 = vmatpush1.bf16.msra.mxu0 %v9088_v17  ;;  %6757 = vmatpush1.bf16.msra.mxu1 %v9091_v63  ;;  %9962 = vst [vmem:[#allocation12_spill] sm:$0xff] %v9112_v52  ;;  %v9127_v8 = vpack.c.bf16 %v3515_v31, %v3511_v15  ;;  %v3522_v18 = vld [vmem:[#allocation6 + $0x128] sm:$0xff]  ;;  %v3519_v15 = vld [vmem:[#allocation6 + $0x110] sm:$0xff] }
 0x72c   :  { %6727 = vmatprep.subr.bf16.mxu0 %v9096_v14  ;;  %6759 = vmatprep.subr.bf16.mxu1 %v9098_v56  ;;  %9963 = vst [vmem:[#allocation13_spill] sm:$0xff] %v9115_v40  ;;  %v9132_v42 = vpack.c.bf16 %v3522_v18, %v3518_v12  ;;  %v3523_v31 = vld [vmem:[#allocation6 + $0x130] sm:$0xff]  ;;  %v3530_v12 = vld [vmem:[#allocation6 + $0x168] sm:$0xff]  ;;  %v3528_v18 = vld [vmem:[#allocation6 + $0x158] sm:$0xff] }
 0x72d   :  { %9967 = vst [vmem:[#allocation17_spill] sm:$0xff] %v9127_v8 }
 0x72e   :  { %9968 = vst [vmem:[#allocation18_spill] sm:$0xff] %v9132_v42 }
 0x72f   :  { %6729 = vmatpush1.bf16.msra.mxu0 %v9100_v13  ;;  %6761 = vmatpush1.bf16.msra.mxu1 %v9103_v54 }
 0x730   :  { %6731 = vmatprep.subr.bf16.mxu0 %v9108_v57  ;;  %6763 = vmatprep.subr.bf16.mxu1 %v9110_v6  ;;  %v3540_v6 = vld [vmem:[#allocation6 + $0x1b8] sm:$0xff] }
 0x733   :  { %6733 = vmatpush1.bf16.msra.mxu0 %v9112_v52  ;;  %6765 = vmatpush1.bf16.msra.mxu1 %v9115_v40  ;;  %v9136_v40 = vpack.c.bf16 %v3521_v38, %v3517_v24  ;;  %v3529_v24 = vld [vmem:[#allocation6 + $0x160] sm:$0xff]  ;;  %v9146_v38 = vpack.c.bf16 %v3532_v45, %v3528_v18  ;;  %v3536_v52 = vld [vmem:[#allocation6 + $0x198] sm:$0xff] }
 0x734   :  { %6735 = vmatprep.subr.bf16.mxu0 %v9120_v33  ;;  %6767 = vmatprep.subr.bf16.mxu1 %v9122_v23  ;;  %v9139_v23 = vpack.c.bf16 %v3523_v31, %v3519_v15  ;;  %v9148_v33 = vpack.c.bf16 %v3529_v24, %v3525_v0  ;;  %v3527_v15 = vld [vmem:[#allocation6 + $0x150] sm:$0xff]  ;;  %v3533_v18 = vld [vmem:[#allocation6 + $0x180] sm:$0xff] }
 0x735   :  { %9970 = vst [vmem:[#allocation20_spill] sm:$0xff] %v9136_v40  ;;  %9973 = vst [vmem:[#allocation23_spill] sm:$0xff] %v9146_v38  ;;  %v3531_v31 = vld [vmem:[#allocation6 + $0x170] sm:$0xff]  ;;  %v3537_v45 = vld [vmem:[#allocation6 + $0x1a0] sm:$0xff] }
 0x736   :  { %9971 = vst [vmem:[#allocation21_spill] sm:$0xff] %v9139_v23  ;;  %9974 = vst [vmem:[#allocation24_spill] sm:$0xff] %v9148_v33  ;;  %v3535_v0 = vld [vmem:[#allocation6 + $0x190] sm:$0xff]  ;;  %v9160_v24 = vpack.c.bf16 %v3537_v45, %v3533_v18 }
 0x737   :  { %6737 = vmatpush1.bf16.msra.mxu0 %v9124_v26  ;;  %6769 = vmatpush1.bf16.msra.mxu1 %v9127_v8  ;;  %v3526_v8 = vld [vmem:[#allocation6 + $0x148] sm:$0xff]  ;;  %v3547_v18 = vld [vmem:[#allocation6 + $0x1f0] sm:$0xff] }
 0x738   :  { %6739 = vmatprep.subr.bf16.mxu0 %v9132_v42  ;;  %6771 = vmatprep.subr.bf16.mxu1 %v9134_v19  ;;  %v9144_v26 = vpack.c.bf16 %v3530_v12, %v3526_v8  ;;  %v3534_v42 = vld [vmem:[#allocation6 + $0x188] sm:$0xff]  ;;  %v9157_v12 = vpack.c.bf16 %v3540_v6, %v3536_v52  ;;  %v3544_v6 = vld [vmem:[#allocation6 + $0x1d8] sm:$0xff] }
 0x739   :  { %v3538_v19 = vld [vmem:[#allocation6 + $0x1a8] sm:$0xff]  ;;  %v3548_v52 = vld [vmem:[#allocation6 + $0x1f8] sm:$0xff] }
 0x73a   :  { %9972 = vst [vmem:[#allocation22_spill] sm:$0xff] %v9144_v26  ;;  %v9155_v8 = vpack.c.bf16 %v3538_v19, %v3534_v42  ;;  %v3541_v19 = vld [vmem:[#allocation6 + $0x1c0] sm:$0xff] }
 0x73b   :  { %6741 = vmatpush1.bf16.msra.mxu0 %v9136_v40  ;;  %6773 = vmatpush1.bf16.msra.mxu1 %v9139_v23  ;;  %v9151_v40 = vpack.c.bf16 %v3531_v31, %v3527_v15  ;;  %v3539_v15 = vld [vmem:[#allocation6 + $0x1b0] sm:$0xff]  ;;  %v3542_v31 = vld [vmem:[#allocation6 + $0x1c8] sm:$0xff]  ;;  %v3545_v23 = vld [vmem:[#allocation6 + $0x1e0] sm:$0xff] }
 0x73c   :  { %6743 = vmatprep.subr.bf16.mxu0 %v9144_v26  ;;  %6775 = vmatprep.subr.bf16.mxu1 %v9146_v38  ;;  %v3546_v26 = vld [vmem:[#allocation6 + $0x1e8] sm:$0xff]  ;;  %v9164_v38 = vpack.c.bf16 %v3539_v15, %v3535_v0  ;;  %v9171_v45 = vpack.c.bf16 %v3545_v23, %v3541_v19 }
 0x73d   :  { %9975 = vst [vmem:[#allocation25_spill] sm:$0xff] %v9151_v40  ;;  %v9166_v42 = vpack.c.bf16 %v3546_v26, %v3542_v31 }
 0x73e   :  { %9978 = vst [vmem:[#allocation32_spill] sm:$0xff] %v9171_v45 }
 0x73f   :  { %6745 = vmatpush1.bf16.msra.mxu0 %v9148_v33  ;;  %6777 = vmatpush1.bf16.msra.mxu1 %v9151_v40  ;;  %9976 = vst [vmem:[#allocation26_spill] sm:$0xff] %v9166_v42  ;;  %v9168_v33 = vpack.c.bf16 %v3548_v52, %v3544_v6  ;;  %v3543_v40 = vld [vmem:[#allocation6 + $0x1d0] sm:$0xff] }
 0x740   :  { %6747 = vmatprep.subr.bf16.mxu0 %v9155_v8  ;;  %6779 = vmatprep.subr.bf16.mxu1 %v9157_v12  ;;  %v9175_v0 = vpack.c.bf16 %v3547_v18, %v3543_v40 }
 0x741   :  { %9977 = vst [vmem:[#allocation30_spill] sm:$0xff] %v9168_v33 }
 0x742   :  { %9979 = vst [vmem:[#allocation34_spill] sm:$0xff] %v9175_v0 }
 0x743   :  { %6749 = vmatpush1.bf16.msra.mxu0 %v9160_v24  ;;  %6781 = vmatpush1.bf16.msra.mxu1 %v9164_v38 }
 0x744   :  { %6751 = vmatprep.subr.bf16.mxu0 %v9166_v42  ;;  %6783 = vmatprep.subr.bf16.mxu1 %v9168_v33 }
 0x747   :  { %6753 = vmatpush1.bf16.msra.mxu0 %v9171_v45  ;;  %6785 = vmatpush1.bf16.msra.mxu1 %v9175_v0 }
 0x748   :  { %6787 = vmatprep.subr.bf16.mxu0 %v8970_v11  ;;  %6819 = vmatprep.subr.bf16.mxu1 %v8972_v9 }
 0x7fc   :  { %v3381_v26 = vpop.f32.mrb[12].mxu0  ;;  %v3452_v15 = vpop.f32.mrb[12].mxu1 }
 0x7fd   :  { %v7462_v23 = vadd.f32 %v3381_v26, %v9960_v22  ;;  %v3383_v31 = vpop.f32.mrb[13].mxu0  ;;  %v3454_v6 = vpop.f32.mrb[13].mxu1  ;;  %v7478_v0 = vadd.f32 %v3452_v15, %v8326_v3 }
 0x7fe   :  { %v7463_v52 = vadd.f32 %v3383_v31, %v9881_v4  ;;  %v7479_v18 = vadd.f32 %v3454_v6, %v9882_v20 }
 0x7ff   :  { %v5799_v40 = vmul.f32 -1.442695, %v7462_v23 }
 0x800   :  { %v5800_v19 = vmul.f32 -1.442695, %v7463_v52  ;;  %v5801_v45 = vmul.f32 -1.442695, %v7479_v18 }
 0x801   :  { %7682 = vpow2.f32 %v5799_v40 }
 0x802   :  { %7684 = vpow2.f32 %v5800_v19 }
 0x803   :  { %7686 = vpow2.f32 %v5801_v45 }
 0x804   :  { %7688 = vtanh.f32 %v7478_v0  ;;  %v4202_v0 = vld [vmem:[#allocation8 + $0x20] sm:$0xff] }
 0x80b   :  { %v7683_v11 = vpop.eup %7682 }
 0x80c   :  { %v7685_v33 = vpop.eup %7684  ;;  %v3464_v9 = vadd.f32 1.0, %v7683_v11  ;;  %v4200_v11 = vld [vmem:[#allocation8 + $0x10] sm:$0xff] }
 0x80d   :  { %v3470_v42 = vadd.f32 1.0, %v7685_v33  ;;  %v7687_v26 = vpop.eup %7686 }
 0x80e   :  { %7690 = vrcp.f32 %v3464_v9  ;;  %v7689_v22 = vpop.eup %7688  ;;  %v3477_v40 = vadd.f32 1.0, %v7687_v26  ;;  %v4204_v9 = vld [vmem:[#allocation8 + $0x30] sm:$0xff]  ;;  %v4207_v26 = vld [vmem:[#allocation8 + $0x48] sm:$0xff] }
 0x80f   :  { %7692 = vrcp.f32 %v3470_v42 }
 0x810   :  { %7694 = vrcp.f32 %v3477_v40 }
 0x818   :  { %v7691_v31 = vpop.eup %7690 }
 0x819   :  { %v7693_v23 = vpop.eup %7692  ;;  %v3481_v52 = vmul.f32 %v7691_v31, %v7689_v22  ;;  %v9980_v22 = vld [vmem:[#allocation11_spill] sm:$0xff]  ;;  %v4211_v31 = vld [vmem:[#allocation8 + $0x68] sm:$0xff] }
 0x81a   :  { %v3480_v19 = vmul.f32 %v7693_v23, %v8981_v50  ;;  %v7695_v15 = vpop.eup %7694  ;;  %v9981_v50 = vld [vmem:[#allocation12_spill] sm:$0xff]  ;;  %v4209_v23 = vld [vmem:[#allocation8 + $0x58] sm:$0xff] }
 0x81c   :  { %v9187_v6 = vadd.f32 %v3481_v52, %v3480_v19  ;;  %v4213_v52 = vld [vmem:[#allocation8 + $0x78] sm:$0xff] }
 0x81e   :  { %7696 = vtanh.f32 %v9187_v6 }
 0x828   :  { %v7697_v18 = vpop.eup %7696 }
 0x829   :  { %v3484_v45 = vmul.f32 %v7697_v18, %v7695_v15  ;;  %v9269_v18 = vpack.c.bf16 %v4204_v9, %v4200_v11 }
 0x82b   :  { %3636 = vmatmul.mubr.f32.vlgmr.msra.gmra.mrb[28].mxu0 %v3484_v45  ;;  %3707 = vmatmul.mubr.f32.vlgmr.msra.gmra.mrb[28].mxu1 %v3484_v45 }
 0x82c   :  { %6789 = vmatpush1.bf16.msra.mxu0 %v8984_v36  ;;  %6821 = vmatpush1.bf16.msra.mxu1 %v8986_v28  ;;  %v9982_v36 = vld [vmem:[#allocation13_spill] sm:$0xff]  ;;  %v9983_v28 = vld [vmem:[#allocation14_spill] sm:$0xff] }
 0x82d   :  { %6791 = vmatprep.subr.bf16.mxu0 %v8990_v29  ;;  %6823 = vmatprep.subr.bf16.mxu1 %v8992_v34  ;;  %v9984_v29 = vld [vmem:[#allocation15_spill] sm:$0xff]  ;;  %v9985_v34 = vld [vmem:[#allocation16_spill] sm:$0xff] }
 0x82e   :  { %3854 = vmatprep.mubr.f32.mxu0 %v9863_v53  ;;  %3925 = vmatprep.mubr.f32.mxu1 %v9863_v53 }
 0x830   :  { %6793 = vmatpush1.bf16.msra.mxu0 %v8998_v37  ;;  %6825 = vmatpush1.bf16.msra.mxu1 %v9000_v62  ;;  %v9986_v37 = vld [vmem:[#allocation17_spill] sm:$0xff]  ;;  %v9987_v62 = vld [vmem:[#allocation18_spill] sm:$0xff] }
 0x831   :  { %6795 = vmatprep.subr.bf16.mxu0 %v9004_v47  ;;  %6827 = vmatprep.subr.bf16.mxu1 %v9006_v2  ;;  %v9988_v47 = vld [vmem:[#allocation19_spill] sm:$0xff]  ;;  %v9989_v2 = vld [vmem:[#allocation20_spill] sm:$0xff] }
 0x834   :  { %6797 = vmatpush1.bf16.msra.mxu0 %v9012_v10  ;;  %6829 = vmatpush1.bf16.msra.mxu1 %v9014_v25  ;;  %v9990_v10 = vld [vmem:[#allocation21_spill] sm:$0xff]  ;;  %v9991_v25 = vld [vmem:[#allocation22_spill] sm:$0xff] }
 0x835   :  { %6799 = vmatprep.subr.bf16.mxu0 %v9018_v59  ;;  %6831 = vmatprep.subr.bf16.mxu1 %v9020_v21  ;;  %v9992_v59 = vld [vmem:[#allocation23_spill] sm:$0xff]  ;;  %v9993_v21 = vld [vmem:[#allocation24_spill] sm:$0xff] }
 0x838   :  { %6801 = vmatpush1.bf16.msra.mxu0 %v9024_v1  ;;  %6833 = vmatpush1.bf16.msra.mxu1 %v9026_v46  ;;  %v9994_v1 = vld [vmem:[#allocation25_spill] sm:$0xff]  ;;  %v9995_v46 = vld [vmem:[#allocation26_spill] sm:$0xff] }
 0x839   :  { %6803 = vmatprep.subr.bf16.mxu0 %v9030_v5  ;;  %6835 = vmatprep.subr.bf16.mxu1 %v9032_v58  ;;  %v9996_v5 = vld [vmem:[#allocation30_spill] sm:$0xff]  ;;  %v9997_v58 = vld [vmem:[#allocation32_spill] sm:$0xff] }
 0x83c   :  { %6805 = vmatpush1.bf16.msra.mxu0 %v9036_v44  ;;  %6837 = vmatpush1.bf16.msra.mxu1 %v9038_v49  ;;  %v9998_v44 = vld [vmem:[#allocation34_spill] sm:$0xff]  ;;  %v4199_v49 = vld [vmem:[#allocation8 + $0x8] sm:$0xff] }
 0x83d   :  { %6807 = vmatprep.subr.bf16.mxu0 %v9042_v39  ;;  %6839 = vmatprep.subr.bf16.mxu1 %v9044_v61  ;;  %v4203_v39 = vld [vmem:[#allocation8 + $0x28] sm:$0xff]  ;;  %v4201_v61 = vld [vmem:[#allocation8 + $0x18] sm:$0xff] }
 0x840   :  { %6809 = vmatpush1.bf16.msra.mxu0 %v9048_v41  ;;  %6841 = vmatpush1.bf16.msra.mxu1 %v9050_v27  ;;  %v9256_v41 = vpack.c.bf16 %v4203_v39, %v4199_v49  ;;  %v4205_v27 = vld [vmem:[#allocation8 + $0x38] sm:$0xff] }
 0x841   :  { %6811 = vmatprep.subr.bf16.mxu0 %v9054_v55  ;;  %6843 = vmatprep.subr.bf16.mxu1 %v9056_v16  ;;  %v9258_v55 = vpack.c.bf16 %v4205_v27, %v4201_v61  ;;  %v4225_v49 = vld [vmem:[#allocation8 + $0xd8] sm:$0xff] }
 0x842   :  { %v4229_v39 = vld [vmem:[#allocation8 + $0xf8] sm:$0xff] }
 0x844   :  { %6813 = vmatpush1.bf16.msra.mxu0 %v9060_v30  ;;  %6845 = vmatpush1.bf16.msra.mxu1 %v9062_v43  ;;  %v9999_v43 = vld [vmem:[#allocation29_spill] sm:$0xff] }
 0x845   :  { %6815 = vmatprep.subr.bf16.mxu0 %v9066_v48  ;;  %6847 = vmatprep.subr.bf16.mxu1 %v9068_v7 }
 0x848   :  { %6817 = vmatpush1.bf16.msra.mxu0 %v9072_v35  ;;  %6849 = vmatpush1.bf16.msra.mxu1 %v9074_v51 }
 0x849   :  { %6851 = vmatprep.subr.bf16.mxu0 %v9084_v32  ;;  %6883 = vmatprep.subr.bf16.mxu1 %v9086_v60 }
 0x84b   :  { %3855 = vmatmul.mubr.f32.vlgmr.msra.gmra.mrb[14].mxu0 %v3484_v45  ;;  %3926 = vmatmul.mubr.f32.vlgmr.msra.gmra.mrb[14].mxu1 %v3484_v45  ;;  %v4206_v45 = vld [vmem:[#allocation8 + $0x40] sm:$0xff] }
 0x84c   :  { %6853 = vmatpush1.bf16.msra.mxu0 %v9088_v17  ;;  %6885 = vmatpush1.bf16.msra.mxu1 %v9091_v63 }
 0x84d   :  { %6855 = vmatprep.subr.bf16.mxu0 %v9096_v14  ;;  %6887 = vmatprep.subr.bf16.mxu1 %v9098_v56 }
 0x84e   :  { %4110 = vmatprep.mubr.f32.mxu0 %v9863_v53  ;;  %4181 = vmatprep.mubr.f32.mxu1 %v9863_v53 }
 0x850   :  { %6857 = vmatpush1.bf16.msra.mxu0 %v9100_v13  ;;  %6889 = vmatpush1.bf16.msra.mxu1 %v9103_v54 }
 0x851   :  { %6859 = vmatprep.subr.bf16.mxu0 %v9108_v57  ;;  %6891 = vmatprep.subr.bf16.mxu1 %v9980_v22  ;;  %v4210_v22 = vld [vmem:[#allocation8 + $0x60] sm:$0xff] }
 0x854   :  { %6861 = vmatpush1.bf16.msra.mxu0 %v9981_v50  ;;  %6893 = vmatpush1.bf16.msra.mxu1 %v9982_v36  ;;  %v9271_v50 = vpack.c.bf16 %v4211_v31, %v4207_v26  ;;  %v9273_v36 = vpack.c.bf16 %v4213_v52, %v4209_v23  ;;  %v4240_v26 = vld [vmem:[#allocation8 + $0x150] sm:$0xff]  ;;  %v4247_v23 = vld [vmem:[#allocation8 + $0x188] sm:$0xff] }
 0x855   :  { %6863 = vmatprep.subr.bf16.mxu0 %v9983_v28  ;;  %6895 = vmatprep.subr.bf16.mxu1 %v9984_v29  ;;  %v4208_v28 = vld [vmem:[#allocation8 + $0x50] sm:$0xff]  ;;  %v4251_v52 = vld [vmem:[#allocation8 + $0x1a8] sm:$0xff] }
 0x856   :  { %v4212_v29 = vld [vmem:[#allocation8 + $0x70] sm:$0xff] }
 0x857   :  { %v4244_v31 = vld [vmem:[#allocation8 + $0x170] sm:$0xff] }
 0x858   :  { %6865 = vmatpush1.bf16.msra.mxu0 %v9985_v34  ;;  %6897 = vmatpush1.bf16.msra.mxu1 %v9986_v37  ;;  %v4215_v34 = vld [vmem:[#allocation8 + $0x88] sm:$0xff] }
 0x859   :  { %6867 = vmatprep.subr.bf16.mxu0 %v9987_v62  ;;  %6899 = vmatprep.subr.bf16.mxu1 %v9988_v47  ;;  %v4219_v37 = vld [vmem:[#allocation8 + $0xa8] sm:$0xff]  ;;  %v4217_v62 = vld [vmem:[#allocation8 + $0x98] sm:$0xff] }
 0x85a   :  { %v4221_v47 = vld [vmem:[#allocation8 + $0xb8] sm:$0xff] }
 0x85c   :  { %6869 = vmatpush1.bf16.msra.mxu0 %v9989_v2  ;;  %6901 = vmatpush1.bf16.msra.mxu1 %v9990_v10  ;;  %v9277_v2 = vpack.c.bf16 %v4210_v22, %v4206_v45  ;;  %v9279_v10 = vpack.c.bf16 %v4212_v29, %v4208_v28  ;;  %v9329_v22 = vpack.c.bf16 %v4244_v31, %v4240_v26  ;;  %v4250_v28 = vld [vmem:[#allocation8 + $0x1a0] sm:$0xff] }
 0x85d   :  { %6871 = vmatprep.subr.bf16.mxu0 %v9991_v25  ;;  %6903 = vmatprep.subr.bf16.mxu1 %v9992_v59  ;;  %v4214_v25 = vld [vmem:[#allocation8 + $0x80] sm:$0xff]  ;;  %v9333_v29 = vpack.c.bf16 %v4251_v52, %v4247_v23  ;;  %v10003_v52 = vld [vmem:[#allocation33_spill] sm:$0xff] }
 0x85e   :  { %v4218_v59 = vld [vmem:[#allocation8 + $0xa0] sm:$0xff] }
 0x85f   :  { %v9291_v61 = vpack.c.bf16 %v4218_v59, %v4214_v25  ;;  %v4259_v25 = vld [vmem:[#allocation8 + $0x1e8] sm:$0xff]  ;;  %v4257_v59 = vld [vmem:[#allocation8 + $0x1d8] sm:$0xff]  ;;  %v10002_v26 = vld [vmem:[#allocation31_spill] sm:$0xff] }
 0x860   :  { %6873 = vmatpush1.bf16.msra.mxu0 %v9993_v21  ;;  %6905 = vmatpush1.bf16.msra.mxu1 %v9994_v1  ;;  %v9283_v21 = vpack.c.bf16 %v4219_v37, %v4215_v34  ;;  %v9285_v1 = vpack.c.bf16 %v4221_v47, %v4217_v62  ;;  %v4248_v37 = vld [vmem:[#allocation8 + $0x190] sm:$0xff]  ;;  %v4255_v47 = vld [vmem:[#allocation8 + $0x1c8] sm:$0xff] }
 0x861   :  { %6875 = vmatprep.subr.bf16.mxu0 %v9155_v8  ;;  %6907 = vmatprep.subr.bf16.mxu1 %v9157_v12  ;;  %v4252_v62 = vld [vmem:[#allocation8 + $0x1b0] sm:$0xff] }
 0x864   :  { %6877 = vmatpush1.bf16.msra.mxu0 %v9160_v24  ;;  %6909 = vmatpush1.bf16.msra.mxu1 %v9164_v38 }
 0x865   :  { %6879 = vmatprep.subr.bf16.mxu0 %v9995_v46  ;;  %6911 = vmatprep.subr.bf16.mxu1 %v9996_v5  ;;  %v4216_v46 = vld [vmem:[#allocation8 + $0x90] sm:$0xff] }
 0x866   :  { %v4220_v5 = vld [vmem:[#allocation8 + $0xb0] sm:$0xff] }
 0x867   :  { %v9293_v27 = vpack.c.bf16 %v4220_v5, %v4216_v46  ;;  %v4261_v46 = vld [vmem:[#allocation8 + $0x1f8] sm:$0xff] }
 0x868   :  { %6881 = vmatpush1.bf16.msra.mxu0 %v9997_v58  ;;  %6913 = vmatpush1.bf16.msra.mxu1 %v9998_v44  ;;  %v4223_v58 = vld [vmem:[#allocation8 + $0xc8] sm:$0xff] }
 0x869   :  { %6915 = vmatprep.subr.bf16.mxu0 %v9256_v41  ;;  %6947 = vmatprep.subr.bf16.mxu1 %v9258_v55  ;;  %v4227_v44 = vld [vmem:[#allocation8 + $0xe8] sm:$0xff] }
 0x91e   :  { %v3856_v16 = vpop.f32.mrb[14].mxu0  ;;  %v3927_v30 = vpop.f32.mrb[14].mxu1 }
 0x91f   :  { %v7464_v48 = vadd.f32 %v3856_v16, %v9999_v43  ;;  %v3858_v7 = vpop.f32.mrb[15].mxu0  ;;  %v3929_v35 = vpop.f32.mrb[15].mxu1  ;;  %v7480_v14 = vadd.f32 %v3927_v30, %v8326_v3  ;;  %v4198_v3 = vld [vmem:[#allocation8] sm:$0xff]  ;;  %v9297_v43 = vpack.c.bf16 %v4227_v44, %v4223_v58  ;;  %v9341_v58 = vpack.c.bf16 %v4252_v62, %v4248_v37 }
 0x920   :  { %v7465_v51 = vadd.f32 %v3858_v7, %v9881_v4  ;;  %v7481_v17 = vadd.f32 %v3929_v35, %v9882_v20  ;;  %v9267_v15 = vpack.c.bf16 %v4202_v0, %v4198_v3  ;;  %v4222_v16 = vld [vmem:[#allocation8 + $0xc0] sm:$0xff]  ;;  %v4224_v7 = vld [vmem:[#allocation8 + $0xd0] sm:$0xff] }
 0x921   :  { %v5802_v32 = vmul.f32 -1.442695, %v7464_v48  ;;  %v4226_v30 = vld [vmem:[#allocation8 + $0xe0] sm:$0xff]  ;;  %v9299_v48 = vpack.c.bf16 %v4229_v39, %v4225_v49  ;;  %v4228_v35 = vld [vmem:[#allocation8 + $0xf0] sm:$0xff]  ;;  %v9345_v49 = vpack.c.bf16 %v4259_v25, %v4255_v47  ;;  %v9347_v39 = vpack.c.bf16 %v4261_v46, %v4257_v59 }
 0x922   :  { %v5803_v60 = vmul.f32 -1.442695, %v7465_v51  ;;  %v5804_v63 = vmul.f32 -1.442695, %v7481_v17  ;;  %v4231_v51 = vld [vmem:[#allocation8 + $0x108] sm:$0xff]  ;;  %v4237_v17 = vld [vmem:[#allocation8 + $0x138] sm:$0xff] }
 0x923   :  { %7698 = vpow2.f32 %v5802_v32  ;;  %v4235_v32 = vld [vmem:[#allocation8 + $0x128] sm:$0xff]  ;;  %v4238_v3 = vld [vmem:[#allocation8 + $0x140] sm:$0xff] }
 0x924   :  { %7700 = vpow2.f32 %v5803_v60  ;;  %v4233_v60 = vld [vmem:[#allocation8 + $0x118] sm:$0xff]  ;;  %v4242_v0 = vld [vmem:[#allocation8 + $0x160] sm:$0xff] }
 0x925   :  { %7702 = vpow2.f32 %v5804_v63  ;;  %v9303_v63 = vpack.c.bf16 %v4226_v30, %v4222_v16  ;;  %v9327_v45 = vpack.c.bf16 %v4242_v0, %v4238_v3  ;;  %v4254_v44 = vld [vmem:[#allocation8 + $0x1c0] sm:$0xff]  ;;  %v4256_v30 = vld [vmem:[#allocation8 + $0x1d0] sm:$0xff] }
 0x926   :  { %7704 = vtanh.f32 %v7480_v14  ;;  %v9305_v14 = vpack.c.bf16 %v4228_v35, %v4224_v7  ;;  %v4258_v16 = vld [vmem:[#allocation8 + $0x1e0] sm:$0xff]  ;;  %v4260_v7 = vld [vmem:[#allocation8 + $0x1f0] sm:$0xff] }
 0x927   :  { %v9351_v35 = vpack.c.bf16 %v4258_v16, %v4254_v44 }
 0x92d   :  { %v7699_v56 = vpop.eup %7698 }
 0x92e   :  { %v7701_v13 = vpop.eup %7700  ;;  %v3939_v54 = vadd.f32 1.0, %v7699_v56  ;;  %v4230_v56 = vld [vmem:[#allocation8 + $0x100] sm:$0xff] }
 0x92f   :  { %v3945_v57 = vadd.f32 1.0, %v7701_v13  ;;  %v7703_v33 = vpop.eup %7702  ;;  %v4234_v13 = vld [vmem:[#allocation8 + $0x120] sm:$0xff] }
 0x930   :  { %7706 = vrcp.f32 %v3939_v54  ;;  %v7705_v38 = vpop.eup %7704  ;;  %v3952_v24 = vadd.f32 1.0, %v7703_v33  ;;  %v9309_v54 = vpack.c.bf16 %v4235_v32, %v4231_v51  ;;  %v4232_v33 = vld [vmem:[#allocation8 + $0x110] sm:$0xff]  ;;  %v9353_v51 = vpack.c.bf16 %v4260_v7, %v4256_v30  ;;  %v699_v32 = vld [vmem:[%s9744_s6] sm:$0xf] }
 0x931   :  { %7708 = vrcp.f32 %v3945_v57  ;;  %v9311_v57 = vpack.c.bf16 %v4237_v17, %v4233_v60  ;;  %v10000_v60 = vld [vmem:[#allocation27_spill] sm:$0xff]  ;;  %v716_v31 = vrot.slane %v699_v32, %v10002_v26 }
 0x932   :  { %7710 = vrcp.f32 %v3952_v24  ;;  %v4245_v24 = vld [vmem:[#allocation8 + $0x178] sm:$0xff]  ;;  %v704_v17 = vrot.slane %v699_v32, %v10000_v60 }
 0x93a   :  { %v7707_v4 = vpop.eup %7706 }
 0x93b   :  { %v7709_v8 = vpop.eup %7708  ;;  %v3956_v12 = vmul.f32 %v7707_v4, %v7705_v38  ;;  %v4236_v38 = vld [vmem:[#allocation8 + $0x130] sm:$0xff]  ;;  %v4239_v4 = vld [vmem:[#allocation8 + $0x148] sm:$0xff] }
 0x93c   :  { %v3955_v42 = vmul.f32 %v7709_v8, %v9187_v6  ;;  %v7711_v40 = vpop.eup %7710  ;;  %v4243_v8 = vld [vmem:[#allocation8 + $0x168] sm:$0xff] }
 0x93d   :  { %v9321_v11 = vpack.c.bf16 %v4243_v8, %v4239_v4 }
 0x93e   :  { %v3957_v20 = vadd.f32 %v3956_v12, %v3955_v42  ;;  %v4241_v12 = vld [vmem:[#allocation8 + $0x158] sm:$0xff]  ;;  %v9315_v42 = vpack.c.bf16 %v4234_v13, %v4230_v56  ;;  %v10001_v56 = vld [vmem:[#allocation28_spill] sm:$0xff] }
 0x93f   :  { %v9323_v9 = vpack.c.bf16 %v4245_v24, %v4241_v12  ;;  %v708_v13 = vrot.slane %v699_v32, %v10001_v56 }
 0x940   :  { %7712 = vtanh.f32 %v3957_v20  ;;  %v9317_v20 = vpack.c.bf16 %v4236_v38, %v4232_v33 }
 0x94a   :  { %v7713_v19 = vpop.eup %7712 }
 0x94b   :  { %v3959_v6 = vmul.f32 %v7713_v19, %v7711_v40  ;;  %v4249_v40 = vld [vmem:[#allocation8 + $0x198] sm:$0xff] }
 0x94c   :  { %v4253_v19 = vld [vmem:[#allocation8 + $0x1b8] sm:$0xff] }
 0x94d   :  { %4111 = vmatmul.mubr.f32.vlgmr.msra.gmra.mrb[30].mxu0 %v3959_v6  ;;  %4182 = vmatmul.mubr.f32.vlgmr.msra.gmra.mrb[30].mxu1 %v3959_v6  ;;  %v4246_v6 = vld [vmem:[#allocation8 + $0x180] sm:$0xff]  ;;  %v9335_v34 = vpack.c.bf16 %v4253_v19, %v4249_v40  ;;  %v712_v40 = vrot.slane %v699_v32, %v10003_v52 }
 0x94e   :  { %6917 = vmatpush1.bf16.msra.mxu0 %v9267_v15  ;;  %6949 = vmatpush1.bf16.msra.mxu1 %v9269_v18  ;;  %v9339_v5 = vpack.c.bf16 %v4250_v28, %v4246_v6 }
 0x94f   :  { %6919 = vmatprep.subr.bf16.mxu0 %v9271_v50  ;;  %6951 = vmatprep.subr.bf16.mxu1 %v9273_v36 }
 0x950   :  { %4326 = vmatprep.mubr.f32.mxu0 %v9863_v53  ;;  %4397 = vmatprep.mubr.f32.mxu1 %v9863_v53 }
 0x952   :  { %6921 = vmatpush1.bf16.msra.mxu0 %v9277_v2  ;;  %6953 = vmatpush1.bf16.msra.mxu1 %v9279_v10 }
 0x953   :  { %6923 = vmatprep.subr.bf16.mxu0 %v9283_v21  ;;  %6955 = vmatprep.subr.bf16.mxu1 %v9285_v1 }
 0x956   :  { %6925 = vmatpush1.bf16.msra.mxu0 %v9291_v61  ;;  %6957 = vmatpush1.bf16.msra.mxu1 %v9293_v27 }
 0x957   :  { %6927 = vmatprep.subr.bf16.mxu0 %v9297_v43  ;;  %6959 = vmatprep.subr.bf16.mxu1 %v9299_v48 }
 0x95a   :  { %6929 = vmatpush1.bf16.msra.mxu0 %v9303_v63  ;;  %6961 = vmatpush1.bf16.msra.mxu1 %v9305_v14 }
 0x95b   :  { %6931 = vmatprep.subr.bf16.mxu0 %v9309_v54  ;;  %6963 = vmatprep.subr.bf16.mxu1 %v9311_v57 }
 0x95e   :  { %6933 = vmatpush1.bf16.msra.mxu0 %v9315_v42  ;;  %6965 = vmatpush1.bf16.msra.mxu1 %v9317_v20 }
 0x95f   :  { %6935 = vmatprep.subr.bf16.mxu0 %v9321_v11  ;;  %6967 = vmatprep.subr.bf16.mxu1 %v9323_v9 }
 0x962   :  { %6937 = vmatpush1.bf16.msra.mxu0 %v9327_v45  ;;  %6969 = vmatpush1.bf16.msra.mxu1 %v9329_v22 }
 0x963   :  { %6939 = vmatprep.subr.bf16.mxu0 %v9333_v29  ;;  %6971 = vmatprep.subr.bf16.mxu1 %v9335_v34 }
 0x966   :  { %6941 = vmatpush1.bf16.msra.mxu0 %v9339_v5  ;;  %6973 = vmatpush1.bf16.msra.mxu1 %v9341_v58 }
 0x967   :  { %6943 = vmatprep.subr.bf16.mxu0 %v9345_v49  ;;  %6975 = vmatprep.subr.bf16.mxu1 %v9347_v39 }
 0x96a   :  { %6945 = vmatpush1.bf16.msra.mxu0 %v9351_v35  ;;  %6977 = vmatpush1.bf16.msra.mxu1 %v9353_v51 }
 0x96b   :  { %6979 = vmatprep.subr.bf16.mxu0 %v9256_v41  ;;  %7011 = vmatprep.subr.bf16.mxu1 %v9258_v55 }
 0x96d   :  { %4327 = vmatmul.mubr.f32.vlgmr.msra.gmra.mrb[16].mxu0 %v9863_v53  ;;  %4398 = vmatmul.mubr.f32.vlgmr.msra.gmra.mrb[16].mxu1 %v9863_v53 }
 0x96e   :  { %6981 = vmatpush1.bf16.msra.mxu0 %v9267_v15  ;;  %7013 = vmatpush1.bf16.msra.mxu1 %v9269_v18 }
 0x96f   :  { %6983 = vmatprep.subr.bf16.mxu0 %v9271_v50  ;;  %7015 = vmatprep.subr.bf16.mxu1 %v9273_v36 }
 0x970   :  { %4500 = vmatprep.mubr.f32.mxu0 %v9863_v53  ;;  %4571 = vmatprep.mubr.f32.mxu1 %v9863_v53 }
 0x972   :  { %6985 = vmatpush1.bf16.msra.mxu0 %v9277_v2  ;;  %7017 = vmatpush1.bf16.msra.mxu1 %v9279_v10 }
 0x973   :  { %6987 = vmatprep.subr.bf16.mxu0 %v9283_v21  ;;  %7019 = vmatprep.subr.bf16.mxu1 %v9285_v1 }
 0x976   :  { %6989 = vmatpush1.bf16.msra.mxu0 %v9291_v61  ;;  %7021 = vmatpush1.bf16.msra.mxu1 %v9293_v27 }
 0x977   :  { %6991 = vmatprep.subr.bf16.mxu0 %v9297_v43  ;;  %7023 = vmatprep.subr.bf16.mxu1 %v9299_v48 }
 0x97a   :  { %6993 = vmatpush1.bf16.msra.mxu0 %v9303_v63  ;;  %7025 = vmatpush1.bf16.msra.mxu1 %v9305_v14 }
 0x97b   :  { %6995 = vmatprep.subr.bf16.mxu0 %v9309_v54  ;;  %7027 = vmatprep.subr.bf16.mxu1 %v9311_v57 }
 0x97e   :  { %6997 = vmatpush1.bf16.msra.mxu0 %v9315_v42  ;;  %7029 = vmatpush1.bf16.msra.mxu1 %v9317_v20 }
 0x97f   :  { %6999 = vmatprep.subr.bf16.mxu0 %v9321_v11  ;;  %7031 = vmatprep.subr.bf16.mxu1 %v9323_v9 }
 0x982   :  { %7001 = vmatpush1.bf16.msra.mxu0 %v9327_v45  ;;  %7033 = vmatpush1.bf16.msra.mxu1 %v9329_v22 }
 0x983   :  { %7003 = vmatprep.subr.bf16.mxu0 %v9333_v29  ;;  %7035 = vmatprep.subr.bf16.mxu1 %v9335_v34 }
 0x986   :  { %7005 = vmatpush1.bf16.msra.mxu0 %v9339_v5  ;;  %7037 = vmatpush1.bf16.msra.mxu1 %v9341_v58 }
 0x987   :  { %7007 = vmatprep.subr.bf16.mxu0 %v9345_v49  ;;  %7039 = vmatprep.subr.bf16.mxu1 %v9347_v39 }
 0x98a   :  { %7009 = vmatpush1.bf16.msra.mxu0 %v9351_v35  ;;  %7041 = vmatpush1.bf16.msra.mxu1 %v9353_v51 }
 0x98b   :  { %7043 = vmatprep.subr.bf16.mxu0 %v9256_v41  ;;  %7075 = vmatprep.subr.bf16.mxu1 %v9258_v55 }
 0xa40   :  { %v4328_v33 = vpop.f32.mrb[16].mxu0  ;;  %v4399_v38 = vpop.f32.mrb[16].mxu1 }
 0xa41   :  { %v7482_v4 = vadd.f32 %v4328_v33, %v704_v17  ;;  %v4330_v8 = vpop.f32.mrb[17].mxu0  ;;  %v4401_v12 = vpop.f32.mrb[17].mxu1  ;;  %v7484_v6 = vadd.f32 %v4399_v38, %v712_v40  ;;  %v1174_v38 = vld [vmem:[%s9744_s6] sm:$0xf] }
 0xa42   :  { %v7483_v24 = vadd.f32 %v4330_v8, %v708_v13  ;;  %v7485_v23 = vadd.f32 %v4401_v12, %v716_v31  ;;  %v1183_v8 = vrot.slane %v1174_v38, %v10001_v56 }
 0xa43   :  { %v5805_v3 = vmul.f32 -1.442695, %v7482_v4  ;;  %v1179_v4 = vrot.slane %v1174_v38, %v10000_v60 }
 0xa44   :  { %v5806_v0 = vmul.f32 -1.442695, %v7483_v24  ;;  %v5807_v19 = vmul.f32 -1.442695, %v7485_v23 }
 0xa45   :  { %7714 = vpow2.f32 %v5805_v3 }
 0xa46   :  { %7716 = vpow2.f32 %v5806_v0 }
 0xa47   :  { %7718 = vpow2.f32 %v5807_v19 }
 0xa48   :  { %7720 = vtanh.f32 %v7484_v6  ;;  %v1191_v6 = vrot.slane %v1174_v38, %v10002_v26 }
 0xa4f   :  { %v7715_v28 = vpop.eup %7714 }
 0xa50   :  { %v7717_v37 = vpop.eup %7716  ;;  %v4411_v62 = vadd.f32 1.0, %v7715_v28 }
 0xa51   :  { %v4417_v47 = vadd.f32 1.0, %v7717_v37  ;;  %v7719_v25 = vpop.eup %7718  ;;  %v1187_v37 = vrot.slane %v1174_v38, %v10003_v52 }
 0xa52   :  { %7722 = vrcp.f32 %v4411_v62  ;;  %v7721_v59 = vpop.eup %7720  ;;  %v4424_v30 = vadd.f32 1.0, %v7719_v25 }
 0xa53   :  { %7724 = vrcp.f32 %v4417_v47 }
 0xa54   :  { %7726 = vrcp.f32 %v4424_v30 }
 0xa5c   :  { %v7723_v46 = vpop.eup %7722 }
 0xa5d   :  { %v7725_v44 = vpop.eup %7724  ;;  %v4428_v16 = vmul.f32 %v7723_v46, %v7721_v59 }
 0xa5e   :  { %v4427_v7 = vmul.f32 0.0, %v7725_v44  ;;  %v7727_v32 = vpop.eup %7726 }
 0xa60   :  { %v9404_v17 = vadd.f32 %v4428_v16, %v4427_v7 }
 0xa62   :  { %7728 = vtanh.f32 %v9404_v17 }
 0xa6c   :  { %v7729_v13 = vpop.eup %7728 }
 0xa6d   :  { %v4431_v33 = vmul.f32 %v7729_v13, %v7727_v32 }
 0xa6f   :  { %4501 = vmatmul.mubr.f32.vlgmr.msra.gmra.mrb[18].mxu0 %v4431_v33  ;;  %4572 = vmatmul.mubr.f32.vlgmr.msra.gmra.mrb[18].mxu1 %v4431_v33 }
 0xa70   :  { %7045 = vmatpush1.bf16.msra.mxu0 %v9267_v15  ;;  %7077 = vmatpush1.bf16.msra.mxu1 %v9269_v18 }
 0xa71   :  { %7047 = vmatprep.subr.bf16.mxu0 %v9271_v50  ;;  %7079 = vmatprep.subr.bf16.mxu1 %v9273_v36 }
 0xa72   :  { %4674 = vmatprep.mubr.f32.mxu0 %v9863_v53  ;;  %4745 = vmatprep.mubr.f32.mxu1 %v9863_v53 }
 0xa74   :  { %7049 = vmatpush1.bf16.msra.mxu0 %v9277_v2  ;;  %7081 = vmatpush1.bf16.msra.mxu1 %v9279_v10 }
 0xa75   :  { %7051 = vmatprep.subr.bf16.mxu0 %v9283_v21  ;;  %7083 = vmatprep.subr.bf16.mxu1 %v9285_v1 }
 0xa78   :  { %7053 = vmatpush1.bf16.msra.mxu0 %v9291_v61  ;;  %7085 = vmatpush1.bf16.msra.mxu1 %v9293_v27 }
 0xa79   :  { %7055 = vmatprep.subr.bf16.mxu0 %v9297_v43  ;;  %7087 = vmatprep.subr.bf16.mxu1 %v9299_v48 }
 0xa7c   :  { %7057 = vmatpush1.bf16.msra.mxu0 %v9303_v63  ;;  %7089 = vmatpush1.bf16.msra.mxu1 %v9305_v14 }
 0xa7d   :  { %7059 = vmatprep.subr.bf16.mxu0 %v9309_v54  ;;  %7091 = vmatprep.subr.bf16.mxu1 %v9311_v57 }
 0xa80   :  { %7061 = vmatpush1.bf16.msra.mxu0 %v9315_v42  ;;  %7093 = vmatpush1.bf16.msra.mxu1 %v9317_v20 }
 0xa81   :  { %7063 = vmatprep.subr.bf16.mxu0 %v9321_v11  ;;  %7095 = vmatprep.subr.bf16.mxu1 %v9323_v9 }
 0xa84   :  { %7065 = vmatpush1.bf16.msra.mxu0 %v9327_v45  ;;  %7097 = vmatpush1.bf16.msra.mxu1 %v9329_v22 }
 0xa85   :  { %7067 = vmatprep.subr.bf16.mxu0 %v9333_v29  ;;  %7099 = vmatprep.subr.bf16.mxu1 %v9335_v34 }
 0xa88   :  { %7069 = vmatpush1.bf16.msra.mxu0 %v9339_v5  ;;  %7101 = vmatpush1.bf16.msra.mxu1 %v9341_v58 }
 0xa89   :  { %7071 = vmatprep.subr.bf16.mxu0 %v9345_v49  ;;  %7103 = vmatprep.subr.bf16.mxu1 %v9347_v39 }
 0xa8c   :  { %7073 = vmatpush1.bf16.msra.mxu0 %v9351_v35  ;;  %7105 = vmatpush1.bf16.msra.mxu1 %v9353_v51 }
 0xa8d   :  { %7107 = vmatprep.subr.bf16.mxu0 %v9256_v41  ;;  %7139 = vmatprep.subr.bf16.mxu1 %v9258_v55 }
 0xb42   :  { %v4502_v12 = vpop.f32.mrb[18].mxu0  ;;  %v4573_v24 = vpop.f32.mrb[18].mxu1 }
 0xb43   :  { %v7486_v3 = vadd.f32 %v4502_v12, %v1179_v4  ;;  %v4504_v0 = vpop.f32.mrb[19].mxu0  ;;  %v4575_v31 = vpop.f32.mrb[19].mxu1  ;;  %v7488_v47 = vadd.f32 %v4573_v24, %v1187_v37 }
 0xb44   :  { %v7487_v23 = vadd.f32 %v4504_v0, %v1183_v8  ;;  %v7489_v28 = vadd.f32 %v4575_v31, %v1191_v6 }
 0xb45   :  { %v5808_v40 = vmul.f32 -1.442695, %v7486_v3 }
 0xb46   :  { %v5809_v19 = vmul.f32 -1.442695, %v7487_v23  ;;  %v5810_v62 = vmul.f32 -1.442695, %v7489_v28 }
 0xb47   :  { %7730 = vpow2.f32 %v5808_v40 }
 0xb48   :  { %7732 = vpow2.f32 %v5809_v19 }
 0xb49   :  { %7734 = vpow2.f32 %v5810_v62 }
 0xb4a   :  { %7736 = vtanh.f32 %v7488_v47 }
 0xb51   :  { %v7731_v25 = vpop.eup %7730 }
 0xb52   :  { %v7733_v59 = vpop.eup %7732  ;;  %v4585_v46 = vadd.f32 1.0, %v7731_v25 }
 0xb53   :  { %v4591_v44 = vadd.f32 1.0, %v7733_v59  ;;  %v7735_v16 = vpop.eup %7734 }
 0xb54   :  { %7738 = vrcp.f32 %v4585_v46  ;;  %v7737_v30 = vpop.eup %7736  ;;  %v4598_v33 = vadd.f32 1.0, %v7735_v16 }
 0xb55   :  { %7740 = vrcp.f32 %v4591_v44 }
 0xb56   :  { %7742 = vrcp.f32 %v4598_v33 }
 0xb5e   :  { %v7739_v7 = vpop.eup %7738 }
 0xb5f   :  { %v7741_v32 = vpop.eup %7740  ;;  %v4602_v13 = vmul.f32 %v7739_v7, %v7737_v30 }
 0xb60   :  { %v4601_v4 = vmul.f32 %v7741_v32, %v9404_v17  ;;  %v7743_v38 = vpop.eup %7742  ;;  %v1649_v17 = vld [vmem:[%s9744_s6] sm:$0xf] }
 0xb61   :  { %v1654_v3 = vrot.slane %v1649_v17, %v10000_v60  ;;  %v1658_v0 = vrot.slane %v1649_v17, %v10001_v56  ;;  %v1666_v47 = vrot.slane %v1649_v17, %v10002_v26  ;;  %v1662_v59 = vrot.slane %v1649_v17, %v10003_v52 }
 0xb62   :  { %v9449_v8 = vadd.f32 %v4602_v13, %v4601_v4 }
 0xb64   :  { %7744 = vtanh.f32 %v9449_v8 }
 0xb6e   :  { %v7745_v12 = vpop.eup %7744 }
 0xb6f   :  { %v4605_v24 = vmul.f32 %v7745_v12, %v7743_v38 }
 0xb71   :  { %4675 = vmatmul.mubr.f32.vlgmr.msra.gmra.mrb[20].mxu0 %v4605_v24  ;;  %4746 = vmatmul.mubr.f32.vlgmr.msra.gmra.mrb[20].mxu1 %v4605_v24 }
 0xb72   :  { %7109 = vmatpush1.bf16.msra.mxu0 %v9267_v15  ;;  %7141 = vmatpush1.bf16.msra.mxu1 %v9269_v18 }
 0xb73   :  { %7111 = vmatprep.subr.bf16.mxu0 %v9271_v50  ;;  %7143 = vmatprep.subr.bf16.mxu1 %v9273_v36 }
 0xb74   :  { %4848 = vmatprep.mubr.f32.mxu0 %v9863_v53  ;;  %4919 = vmatprep.mubr.f32.mxu1 %v9863_v53 }
 0xb76   :  { %7113 = vmatpush1.bf16.msra.mxu0 %v9277_v2  ;;  %7145 = vmatpush1.bf16.msra.mxu1 %v9279_v10 }
 0xb77   :  { %7115 = vmatprep.subr.bf16.mxu0 %v9283_v21  ;;  %7147 = vmatprep.subr.bf16.mxu1 %v9285_v1 }
 0xb7a   :  { %7117 = vmatpush1.bf16.msra.mxu0 %v9291_v61  ;;  %7149 = vmatpush1.bf16.msra.mxu1 %v9293_v27 }
 0xb7b   :  { %7119 = vmatprep.subr.bf16.mxu0 %v9297_v43  ;;  %7151 = vmatprep.subr.bf16.mxu1 %v9299_v48 }
 0xb7e   :  { %7121 = vmatpush1.bf16.msra.mxu0 %v9303_v63  ;;  %7153 = vmatpush1.bf16.msra.mxu1 %v9305_v14 }
 0xb7f   :  { %7123 = vmatprep.subr.bf16.mxu0 %v9309_v54  ;;  %7155 = vmatprep.subr.bf16.mxu1 %v9311_v57 }
 0xb82   :  { %7125 = vmatpush1.bf16.msra.mxu0 %v9315_v42  ;;  %7157 = vmatpush1.bf16.msra.mxu1 %v9317_v20 }
 0xb83   :  { %7127 = vmatprep.subr.bf16.mxu0 %v9321_v11  ;;  %7159 = vmatprep.subr.bf16.mxu1 %v9323_v9 }
 0xb86   :  { %7129 = vmatpush1.bf16.msra.mxu0 %v9327_v45  ;;  %7161 = vmatpush1.bf16.msra.mxu1 %v9329_v22 }
 0xb87   :  { %7131 = vmatprep.subr.bf16.mxu0 %v9333_v29  ;;  %7163 = vmatprep.subr.bf16.mxu1 %v9335_v34 }
 0xb8a   :  { %7133 = vmatpush1.bf16.msra.mxu0 %v9339_v5  ;;  %7165 = vmatpush1.bf16.msra.mxu1 %v9341_v58 }
 0xb8b   :  { %7135 = vmatprep.subr.bf16.mxu0 %v9345_v49  ;;  %7167 = vmatprep.subr.bf16.mxu1 %v9347_v39 }
 0xb8e   :  { %7137 = vmatpush1.bf16.msra.mxu0 %v9351_v35  ;;  %7169 = vmatpush1.bf16.msra.mxu1 %v9353_v51 }
 0xb8f   :  { %7171 = vmatprep.subr.bf16.mxu0 %v9256_v41  ;;  %7203 = vmatprep.subr.bf16.mxu1 %v9258_v55 }
 0xc44   :  { %v4676_v31 = vpop.f32.mrb[20].mxu0  ;;  %v4747_v23 = vpop.f32.mrb[20].mxu1 }
 0xc45   :  { %v7490_v40 = vadd.f32 %v4676_v31, %v1654_v3  ;;  %v4678_v19 = vpop.f32.mrb[21].mxu0  ;;  %v4749_v6 = vpop.f32.mrb[21].mxu1  ;;  %v7492_v44 = vadd.f32 %v4747_v23, %v1662_v59 }
 0xc46   :  { %v7491_v28 = vadd.f32 %v4678_v19, %v1658_v0  ;;  %v7493_v25 = vadd.f32 %v4749_v6, %v1666_v47 }
 0xc47   :  { %v5811_v37 = vmul.f32 -1.442695, %v7490_v40 }
 0xc48   :  { %v5812_v62 = vmul.f32 -1.442695, %v7491_v28  ;;  %v5813_v46 = vmul.f32 -1.442695, %v7493_v25 }
 0xc49   :  { %7746 = vpow2.f32 %v5811_v37 }
 0xc4a   :  { %7748 = vpow2.f32 %v5812_v62 }
 0xc4b   :  { %7750 = vpow2.f32 %v5813_v46 }
 0xc4c   :  { %7752 = vtanh.f32 %v7492_v44 }
 0xc53   :  { %v7747_v16 = vpop.eup %7746 }
 0xc54   :  { %v7749_v30 = vpop.eup %7748  ;;  %v4759_v7 = vadd.f32 1.0, %v7747_v16 }
 0xc55   :  { %v4765_v32 = vadd.f32 1.0, %v7749_v30  ;;  %v7751_v13 = vpop.eup %7750 }
 0xc56   :  { %7754 = vrcp.f32 %v4759_v7  ;;  %v7753_v33 = vpop.eup %7752  ;;  %v4772_v24 = vadd.f32 1.0, %v7751_v13 }
 0xc57   :  { %7756 = vrcp.f32 %v4765_v32 }
 0xc58   :  { %7758 = vrcp.f32 %v4772_v24 }
 0xc60   :  { %v7755_v4 = vpop.eup %7754 }
 0xc61   :  { %v7757_v38 = vpop.eup %7756  ;;  %v4776_v12 = vmul.f32 %v7755_v4, %v7753_v33 }
 0xc62   :  { %v4775_v3 = vmul.f32 %v7757_v38, %v9449_v8  ;;  %v7759_v17 = vpop.eup %7758  ;;  %v2124_v8 = vld [vmem:[%s9744_s6] sm:$0xf] }
 0xc63   :  { %v2129_v40 = vrot.slane %v2124_v8, %v10000_v60  ;;  %v2133_v19 = vrot.slane %v2124_v8, %v10001_v56  ;;  %v2141_v44 = vrot.slane %v2124_v8, %v10002_v26  ;;  %v2137_v30 = vrot.slane %v2124_v8, %v10003_v52 }
 0xc64   :  { %v9494_v0 = vadd.f32 %v4776_v12, %v4775_v3 }
 0xc66   :  { %7760 = vtanh.f32 %v9494_v0 }
 0xc70   :  { %v7761_v31 = vpop.eup %7760 }
 0xc71   :  { %v4779_v23 = vmul.f32 %v7761_v31, %v7759_v17 }
 0xc73   :  { %4849 = vmatmul.mubr.f32.vlgmr.msra.gmra.mrb[22].mxu0 %v4779_v23  ;;  %4920 = vmatmul.mubr.f32.vlgmr.msra.gmra.mrb[22].mxu1 %v4779_v23 }
 0xc74   :  { %7173 = vmatpush1.bf16.msra.mxu0 %v9267_v15  ;;  %7205 = vmatpush1.bf16.msra.mxu1 %v9269_v18 }
 0xc75   :  { %7175 = vmatprep.subr.bf16.mxu0 %v9271_v50  ;;  %7207 = vmatprep.subr.bf16.mxu1 %v9273_v36 }
 0xc76   :  { %5022 = vmatprep.mubr.f32.mxu0 %v9863_v53  ;;  %5093 = vmatprep.mubr.f32.mxu1 %v9863_v53 }
 0xc78   :  { %7177 = vmatpush1.bf16.msra.mxu0 %v9277_v2  ;;  %7209 = vmatpush1.bf16.msra.mxu1 %v9279_v10 }
 0xc79   :  { %7179 = vmatprep.subr.bf16.mxu0 %v9283_v21  ;;  %7211 = vmatprep.subr.bf16.mxu1 %v9285_v1 }
 0xc7c   :  { %7181 = vmatpush1.bf16.msra.mxu0 %v9291_v61  ;;  %7213 = vmatpush1.bf16.msra.mxu1 %v9293_v27 }
 0xc7d   :  { %7183 = vmatprep.subr.bf16.mxu0 %v9297_v43  ;;  %7215 = vmatprep.subr.bf16.mxu1 %v9299_v48 }
 0xc80   :  { %7185 = vmatpush1.bf16.msra.mxu0 %v9303_v63  ;;  %7217 = vmatpush1.bf16.msra.mxu1 %v9305_v14 }
 0xc81   :  { %7187 = vmatprep.subr.bf16.mxu0 %v9309_v54  ;;  %7219 = vmatprep.subr.bf16.mxu1 %v9311_v57 }
 0xc84   :  { %7189 = vmatpush1.bf16.msra.mxu0 %v9315_v42  ;;  %7221 = vmatpush1.bf16.msra.mxu1 %v9317_v20 }
 0xc85   :  { %7191 = vmatprep.subr.bf16.mxu0 %v9321_v11  ;;  %7223 = vmatprep.subr.bf16.mxu1 %v9323_v9 }
 0xc88   :  { %7193 = vmatpush1.bf16.msra.mxu0 %v9327_v45  ;;  %7225 = vmatpush1.bf16.msra.mxu1 %v9329_v22 }
 0xc89   :  { %7195 = vmatprep.subr.bf16.mxu0 %v9333_v29  ;;  %7227 = vmatprep.subr.bf16.mxu1 %v9335_v34 }
 0xc8c   :  { %7197 = vmatpush1.bf16.msra.mxu0 %v9339_v5  ;;  %7229 = vmatpush1.bf16.msra.mxu1 %v9341_v58 }
 0xc8d   :  { %7199 = vmatprep.subr.bf16.mxu0 %v9345_v49  ;;  %7231 = vmatprep.subr.bf16.mxu1 %v9347_v39 }
 0xc90   :  { %7201 = vmatpush1.bf16.msra.mxu0 %v9351_v35  ;;  %7233 = vmatpush1.bf16.msra.mxu1 %v9353_v51 }
 0xc91   :  { %7235 = vmatprep.subr.bf16.mxu0 %v9256_v41  ;;  %7267 = vmatprep.subr.bf16.mxu1 %v9258_v55 }
 0xd46   :  { %v4850_v6 = vpop.f32.mrb[22].mxu0  ;;  %v4921_v28 = vpop.f32.mrb[22].mxu1 }
 0xd47   :  { %v7494_v37 = vadd.f32 %v4850_v6, %v2129_v40  ;;  %v4852_v62 = vpop.f32.mrb[23].mxu0  ;;  %v4923_v47 = vpop.f32.mrb[23].mxu1  ;;  %v7496_v32 = vadd.f32 %v4921_v28, %v2137_v30 }
 0xd48   :  { %v7495_v25 = vadd.f32 %v4852_v62, %v2133_v19  ;;  %v7497_v16 = vadd.f32 %v4923_v47, %v2141_v44 }
 0xd49   :  { %v5814_v59 = vmul.f32 -1.442695, %v7494_v37 }
 0xd4a   :  { %v5815_v46 = vmul.f32 -1.442695, %v7495_v25  ;;  %v5816_v7 = vmul.f32 -1.442695, %v7497_v16 }
 0xd4b   :  { %7762 = vpow2.f32 %v5814_v59 }
 0xd4c   :  { %7764 = vpow2.f32 %v5815_v46 }
 0xd4d   :  { %7766 = vpow2.f32 %v5816_v7 }
 0xd4e   :  { %7768 = vtanh.f32 %v7496_v32 }
 0xd55   :  { %v7763_v13 = vpop.eup %7762 }
 0xd56   :  { %v7765_v33 = vpop.eup %7764  ;;  %v4933_v4 = vadd.f32 1.0, %v7763_v13 }
 0xd57   :  { %v4939_v38 = vadd.f32 1.0, %v7765_v33  ;;  %v7767_v12 = vpop.eup %7766 }
 0xd58   :  { %7770 = vrcp.f32 %v4933_v4  ;;  %v7769_v24 = vpop.eup %7768  ;;  %v4946_v23 = vadd.f32 1.0, %v7767_v12 }
 0xd59   :  { %7772 = vrcp.f32 %v4939_v38 }
 0xd5a   :  { %7774 = vrcp.f32 %v4946_v23 }
 0xd62   :  { %v7771_v3 = vpop.eup %7770 }
 0xd63   :  { %v7773_v17 = vpop.eup %7772  ;;  %v4950_v31 = vmul.f32 %v7771_v3, %v7769_v24 }
 0xd64   :  { %v4949_v40 = vmul.f32 %v7773_v17, %v9494_v0  ;;  %v7775_v8 = vpop.eup %7774  ;;  %v2599_v0 = vld [vmem:[%s9744_s6] sm:$0xf] }
 0xd65   :  { %v2604_v37 = vrot.slane %v2599_v0, %v10000_v60  ;;  %v2608_v62 = vrot.slane %v2599_v0, %v10001_v56  ;;  %v2616_v32 = vrot.slane %v2599_v0, %v10002_v26  ;;  %v2612_v33 = vrot.slane %v2599_v0, %v10003_v52 }
 0xd66   :  { %v9539_v19 = vadd.f32 %v4950_v31, %v4949_v40 }
 0xd68   :  { %7776 = vtanh.f32 %v9539_v19 }
 0xd72   :  { %v7777_v6 = vpop.eup %7776 }
 0xd73   :  { %v4953_v28 = vmul.f32 %v7777_v6, %v7775_v8 }
 0xd75   :  { %5023 = vmatmul.mubr.f32.vlgmr.msra.gmra.mrb[24].mxu0 %v4953_v28  ;;  %5094 = vmatmul.mubr.f32.vlgmr.msra.gmra.mrb[24].mxu1 %v4953_v28 }
 0xd76   :  { %7237 = vmatpush1.bf16.msra.mxu0 %v9267_v15  ;;  %7269 = vmatpush1.bf16.msra.mxu1 %v9269_v18 }
 0xd77   :  { %7239 = vmatprep.subr.bf16.mxu0 %v9271_v50  ;;  %7271 = vmatprep.subr.bf16.mxu1 %v9273_v36 }
 0xd78   :  { %5196 = vmatprep.mubr.f32.mxu0 %v9863_v53  ;;  %5267 = vmatprep.mubr.f32.mxu1 %v9863_v53 }
 0xd7a   :  { %7241 = vmatpush1.bf16.msra.mxu0 %v9277_v2  ;;  %7273 = vmatpush1.bf16.msra.mxu1 %v9279_v10 }
 0xd7b   :  { %7243 = vmatprep.subr.bf16.mxu0 %v9283_v21  ;;  %7275 = vmatprep.subr.bf16.mxu1 %v9285_v1 }
 0xd7e   :  { %7245 = vmatpush1.bf16.msra.mxu0 %v9291_v61  ;;  %7277 = vmatpush1.bf16.msra.mxu1 %v9293_v27 }
 0xd7f   :  { %7247 = vmatprep.subr.bf16.mxu0 %v9297_v43  ;;  %7279 = vmatprep.subr.bf16.mxu1 %v9299_v48 }
 0xd82   :  { %7249 = vmatpush1.bf16.msra.mxu0 %v9303_v63  ;;  %7281 = vmatpush1.bf16.msra.mxu1 %v9305_v14 }
 0xd83   :  { %7251 = vmatprep.subr.bf16.mxu0 %v9309_v54  ;;  %7283 = vmatprep.subr.bf16.mxu1 %v9311_v57 }
 0xd86   :  { %7253 = vmatpush1.bf16.msra.mxu0 %v9315_v42  ;;  %7285 = vmatpush1.bf16.msra.mxu1 %v9317_v20 }
 0xd87   :  { %7255 = vmatprep.subr.bf16.mxu0 %v9321_v11  ;;  %7287 = vmatprep.subr.bf16.mxu1 %v9323_v9 }
 0xd8a   :  { %7257 = vmatpush1.bf16.msra.mxu0 %v9327_v45  ;;  %7289 = vmatpush1.bf16.msra.mxu1 %v9329_v22 }
 0xd8b   :  { %7259 = vmatprep.subr.bf16.mxu0 %v9333_v29  ;;  %7291 = vmatprep.subr.bf16.mxu1 %v9335_v34 }
 0xd8e   :  { %7261 = vmatpush1.bf16.msra.mxu0 %v9339_v5  ;;  %7293 = vmatpush1.bf16.msra.mxu1 %v9341_v58 }
 0xd8f   :  { %7263 = vmatprep.subr.bf16.mxu0 %v9345_v49  ;;  %7295 = vmatprep.subr.bf16.mxu1 %v9347_v39 }
 0xd92   :  { %7265 = vmatpush1.bf16.msra.mxu0 %v9351_v35  ;;  %7297 = vmatpush1.bf16.msra.mxu1 %v9353_v51 }
 0xd93   :  { %7299 = vmatprep.subr.bf16.mxu0 %v9256_v41  ;;  %7331 = vmatprep.subr.bf16.mxu1 %v9258_v55 }
 0xe48   :  { %v5024_v47 = vpop.f32.mrb[24].mxu0  ;;  %v5095_v25 = vpop.f32.mrb[24].mxu1 }
 0xe49   :  { %v7498_v59 = vadd.f32 %v5024_v47, %v2604_v37  ;;  %v5026_v46 = vpop.f32.mrb[25].mxu0  ;;  %v5097_v44 = vpop.f32.mrb[25].mxu1  ;;  %v7500_v38 = vadd.f32 %v5095_v25, %v2612_v33 }
 0xe4a   :  { %v7499_v16 = vadd.f32 %v5026_v46, %v2608_v62  ;;  %v7501_v13 = vadd.f32 %v5097_v44, %v2616_v32 }
 0xe4b   :  { %v5817_v30 = vmul.f32 -1.442695, %v7498_v59 }
 0xe4c   :  { %v5818_v7 = vmul.f32 -1.442695, %v7499_v16  ;;  %v5819_v4 = vmul.f32 -1.442695, %v7501_v13 }
 0xe4d   :  { %7778 = vpow2.f32 %v5817_v30 }
 0xe4e   :  { %7780 = vpow2.f32 %v5818_v7 }
 0xe4f   :  { %7782 = vpow2.f32 %v5819_v4 }
 0xe50   :  { %7784 = vtanh.f32 %v7500_v38 }
 0xe57   :  { %v7779_v12 = vpop.eup %7778 }
 0xe58   :  { %v7781_v24 = vpop.eup %7780  ;;  %v5107_v3 = vadd.f32 1.0, %v7779_v12 }
 0xe59   :  { %v5113_v17 = vadd.f32 1.0, %v7781_v24  ;;  %v7783_v31 = vpop.eup %7782 }
 0xe5a   :  { %7786 = vrcp.f32 %v5107_v3  ;;  %v7785_v23 = vpop.eup %7784  ;;  %v5120_v28 = vadd.f32 1.0, %v7783_v31 }
 0xe5b   :  { %7788 = vrcp.f32 %v5113_v17 }
 0xe5c   :  { %7790 = vrcp.f32 %v5120_v28 }
 0xe64   :  { %v7787_v40 = vpop.eup %7786 }
 0xe65   :  { %v7789_v8 = vpop.eup %7788  ;;  %v5124_v6 = vmul.f32 %v7787_v40, %v7785_v23 }
 0xe66   :  { %v5123_v37 = vmul.f32 %v7789_v8, %v9539_v19  ;;  %v7791_v0 = vpop.eup %7790  ;;  %v3074_v19 = vld [vmem:[%s9744_s6] sm:$0xf] }
 0xe67   :  { %v3079_v59 = vrot.slane %v3074_v19, %v10000_v60  ;;  %v3083_v46 = vrot.slane %v3074_v19, %v10001_v56  ;;  %v3087_v38 = vrot.slane %v3074_v19, %v10003_v52 }
 0xe68   :  { %v9584_v62 = vadd.f32 %v5124_v6, %v5123_v37 }
 0xe6a   :  { %7792 = vtanh.f32 %v9584_v62 }
 0xe74   :  { %v7793_v47 = vpop.eup %7792 }
 0xe75   :  { %v5127_v25 = vmul.f32 %v7793_v47, %v7791_v0 }
 0xe77   :  { %5197 = vmatmul.mubr.f32.vlgmr.msra.gmra.mrb[26].mxu0 %v5127_v25  ;;  %5268 = vmatmul.mubr.f32.vlgmr.msra.gmra.mrb[26].mxu1 %v5127_v25 }
 0xe78   :  { %7301 = vmatpush1.bf16.msra.mxu0 %v9267_v15  ;;  %7333 = vmatpush1.bf16.msra.mxu1 %v9269_v18 }
 0xe79   :  { %7303 = vmatprep.subr.bf16.mxu0 %v9271_v50  ;;  %7335 = vmatprep.subr.bf16.mxu1 %v9273_v36 }
 0xe7a   :  { %5370 = vmatprep.mubr.f32.mxu0 %v9863_v53  ;;  %5441 = vmatprep.mubr.f32.mxu1 %v9863_v53 }
 0xe7c   :  { %7305 = vmatpush1.bf16.msra.mxu0 %v9277_v2  ;;  %7337 = vmatpush1.bf16.msra.mxu1 %v9279_v10 }
 0xe7d   :  { %7307 = vmatprep.subr.bf16.mxu0 %v9283_v21  ;;  %7339 = vmatprep.subr.bf16.mxu1 %v9285_v1 }
 0xe80   :  { %7309 = vmatpush1.bf16.msra.mxu0 %v9291_v61  ;;  %7341 = vmatpush1.bf16.msra.mxu1 %v9293_v27 }
 0xe81   :  { %7311 = vmatprep.subr.bf16.mxu0 %v9297_v43  ;;  %7343 = vmatprep.subr.bf16.mxu1 %v9299_v48 }
 0xe84   :  { %7313 = vmatpush1.bf16.msra.mxu0 %v9303_v63  ;;  %7345 = vmatpush1.bf16.msra.mxu1 %v9305_v14 }
 0xe85   :  { %7315 = vmatprep.subr.bf16.mxu0 %v9309_v54  ;;  %7347 = vmatprep.subr.bf16.mxu1 %v9311_v57 }
 0xe88   :  { %7317 = vmatpush1.bf16.msra.mxu0 %v9315_v42  ;;  %7349 = vmatpush1.bf16.msra.mxu1 %v9317_v20 }
 0xe89   :  { %7319 = vmatprep.subr.bf16.mxu0 %v9321_v11  ;;  %7351 = vmatprep.subr.bf16.mxu1 %v9323_v9 }
 0xe8c   :  { %7321 = vmatpush1.bf16.msra.mxu0 %v9327_v45  ;;  %7353 = vmatpush1.bf16.msra.mxu1 %v9329_v22 }
 0xe8d   :  { %7323 = vmatprep.subr.bf16.mxu0 %v9333_v29  ;;  %7355 = vmatprep.subr.bf16.mxu1 %v9335_v34 }
 0xe90   :  { %7325 = vmatpush1.bf16.msra.mxu0 %v9339_v5  ;;  %7357 = vmatpush1.bf16.msra.mxu1 %v9341_v58 }
 0xe91   :  { %7327 = vmatprep.subr.bf16.mxu0 %v9345_v49  ;;  %7359 = vmatprep.subr.bf16.mxu1 %v9347_v39 }
 0xe94   :  { %7329 = vmatpush1.bf16.msra.mxu0 %v9351_v35  ;;  %7361 = vmatpush1.bf16.msra.mxu1 %v9353_v51 }
 0xe95   :  { %7363 = vmatprep.subr.bf16.mxu0 %v9256_v41  ;;  %7395 = vmatprep.subr.bf16.mxu1 %v9258_v55  ;;  %v3091_v41 = vrot.slane %v3074_v19, %v10002_v26 }
 0xf4a   :  { %v5198_v44 = vpop.f32.mrb[26].mxu0  ;;  %v5269_v16 = vpop.f32.mrb[26].mxu1 }
 0xf4b   :  { %v7502_v30 = vadd.f32 %v5198_v44, %v3079_v59  ;;  %v5200_v7 = vpop.f32.mrb[27].mxu0  ;;  %v5271_v32 = vpop.f32.mrb[27].mxu1  ;;  %v7504_v24 = vadd.f32 %v5269_v16, %v3087_v38  ;;  %v5650_v44 = vld [vmem:[%s9745_s7] sm:$0xff]  ;;  %v5651_v16 = vld [vmem:[%s9745_s7 + $0x8] sm:$0xff]  ;;  %v5656_v38 = vld [vmem:[%s9745_s7 + $0x30] sm:$0xff] }
 0xf4c   :  { %v7503_v13 = vadd.f32 %v5200_v7, %v3083_v46  ;;  %v7505_v55 = vadd.f32 %v5271_v32, %v3091_v41  ;;  %v7918_v7 = vmov 0.0|0.0   ;;  %v5652_v32 = vld [vmem:[%s9745_s7 + $0x10] sm:$0xff]  ;;  %v5655_v41 = vld [vmem:[%s9745_s7 + $0x28] sm:$0xff] }
 0xf4d   :  { %v5820_v33 = vmul.f32 -1.442695, %v7502_v30  ;;  %v7427_v30 = vpack.c.bf16 %v5651_v16, %v5650_v44 }
 0xf4e   :  { %v5821_v4 = vmul.f32 -1.442695, %v7503_v13  ;;  %v5822_v12 = vmul.f32 -1.442695, %v7505_v55  ;;  %v5653_v13 = vld [vmem:[%s9745_s7 + $0x18] sm:$0xff] }
 0xf4f   :  { %7794 = vpow2.f32 %v5820_v33  ;;  %v7430_v33 = vpack.c.bf16 %v5653_v13, %v5652_v32 }
 0xf50   :  { %7796 = vpow2.f32 %v5821_v4  ;;  %v5654_v4 = vld [vmem:[%s9745_s7 + $0x20] sm:$0xff] }
 0xf51   :  { %7798 = vpow2.f32 %v5822_v12  ;;  %v7433_v55 = vpack.c.bf16 %v5655_v41, %v5654_v4  ;;  %v5657_v12 = vld [vmem:[%s9745_s7 + $0x38] sm:$0xff] }
 0xf52   :  { %7800 = vtanh.f32 %v7504_v24  ;;  %v7436_v24 = vpack.c.bf16 %v5657_v12, %v5656_v38 }
 0xf59   :  { %v7795_v3 = vpop.eup %7794 }
 0xf5a   :  { %v7797_v17 = vpop.eup %7796  ;;  %v5281_v31 = vadd.f32 1.0, %v7795_v3  ;;  %v5658_v3 = vld [vmem:[%s9745_s7 + $0x40] sm:$0xff] }
 0xf5b   :  { %v5287_v23 = vadd.f32 1.0, %v7797_v17  ;;  %v7799_v40 = vpop.eup %7798  ;;  %v5659_v17 = vld [vmem:[%s9745_s7 + $0x48] sm:$0xff] }
 0xf5c   :  { %7802 = vrcp.f32 %v5281_v31  ;;  %v7801_v8 = vpop.eup %7800  ;;  %v5294_v0 = vadd.f32 1.0, %v7799_v40  ;;  %v7439_v31 = vpack.c.bf16 %v5659_v17, %v5658_v3  ;;  %v5661_v40 = vld [vmem:[%s9745_s7 + $0x58] sm:$0xff] }
 0xf5d   :  { %7804 = vrcp.f32 %v5287_v23  ;;  %v5660_v23 = vld [vmem:[%s9745_s7 + $0x50] sm:$0xff] }
 0xf5e   :  { %7806 = vrcp.f32 %v5294_v0  ;;  %v5664_v0 = vld [vmem:[%s9745_s7 + $0x70] sm:$0xff] }
 0xf66   :  { %v7803_v6 = vpop.eup %7802 }
 0xf67   :  { %v7805_v28 = vpop.eup %7804  ;;  %v5298_v37 = vmul.f32 %v7803_v6, %v7801_v8  ;;  %v5662_v8 = vld [vmem:[%s9745_s7 + $0x60] sm:$0xff]  ;;  %v7442_v6 = vpack.c.bf16 %v5661_v40, %v5660_v23 }
 0xf68   :  { %v5297_v47 = vmul.f32 %v7805_v28, %v9584_v62  ;;  %v7807_v19 = vpop.eup %7806  ;;  %v5663_v28 = vld [vmem:[%s9745_s7 + $0x68] sm:$0xff] }
 0xf6a   :  { %v9629_v25 = vadd.f32 %v5298_v37, %v5297_v47  ;;  %v7445_v37 = vpack.c.bf16 %v5663_v28, %v5662_v8  ;;  %v5665_v47 = vld [vmem:[%s9745_s7 + $0x78] sm:$0xff] }
 0xf6c   :  { %7808 = vtanh.f32 %v9629_v25 }
 0xf76   :  { %v7809_v59 = vpop.eup %7808 }
 0xf77   :  { %v5301_v46 = vmul.f32 %v7809_v59, %v7807_v19  ;;  %v4024_v19 = vld [vmem:[%s9744_s6] sm:$0xf] }
 0xf78   :  { %v4033_v59 = vrot.slane %v4024_v19, %v10001_v56 }
 0xf79   :  { %5371 = vmatmul.mubr.f32.vlgmr.msra.gmra.mrb[28].mxu0 %v5301_v46  ;;  %5442 = vmatmul.mubr.f32.vlgmr.msra.gmra.mrb[28].mxu1 %v5301_v46 }
 0xf7a   :  { %7365 = vmatpush1.bf16.msra.mxu0 %v9267_v15  ;;  %7397 = vmatpush1.bf16.msra.mxu1 %v9269_v18  ;;  %v3549_v15 = vld [vmem:[%s9744_s6] sm:$0xf] }
 0xf7b   :  { %7367 = vmatprep.subr.bf16.mxu0 %v9271_v50  ;;  %7399 = vmatprep.subr.bf16.mxu1 %v9273_v36  ;;  %v3554_v18 = vrot.slane %v3549_v15, %v10000_v60  ;;  %v3558_v50 = vrot.slane %v3549_v15, %v10001_v56 }
 0xf7c   :  { %5544 = vmatprep.mubr.f32.mxu0 %v9863_v53  ;;  %5615 = vmatprep.mubr.f32.mxu1 %v9863_v53 }
 0xf7e   :  { %7369 = vmatpush1.bf16.msra.mxu0 %v9277_v2  ;;  %7401 = vmatpush1.bf16.msra.mxu1 %v9279_v10 }
 0xf7f   :  { %7371 = vmatprep.subr.bf16.mxu0 %v9283_v21  ;;  %7403 = vmatprep.subr.bf16.mxu1 %v9285_v1 }
 0xf82   :  { %7373 = vmatpush1.bf16.msra.mxu0 %v9291_v61  ;;  %7405 = vmatpush1.bf16.msra.mxu1 %v9293_v27 }
 0xf83   :  { %7375 = vmatprep.subr.bf16.mxu0 %v9297_v43  ;;  %7407 = vmatprep.subr.bf16.mxu1 %v9299_v48  ;;  %v3566_v48 = vrot.slane %v3549_v15, %v10002_v26 }
 0xf86   :  { %7377 = vmatpush1.bf16.msra.mxu0 %v9303_v63  ;;  %7409 = vmatpush1.bf16.msra.mxu1 %v9305_v14  ;;  %v3562_v14 = vrot.slane %v3549_v15, %v10003_v52 }
 0xf87   :  { %7379 = vmatprep.subr.bf16.mxu0 %v9309_v54  ;;  %7411 = vmatprep.subr.bf16.mxu1 %v9311_v57 }
 0xf8a   :  { %7381 = vmatpush1.bf16.msra.mxu0 %v9315_v42  ;;  %7413 = vmatpush1.bf16.msra.mxu1 %v9317_v20 }
 0xf8b   :  { %7383 = vmatprep.subr.bf16.mxu0 %v9321_v11  ;;  %7415 = vmatprep.subr.bf16.mxu1 %v9323_v9 }
 0xf8e   :  { %7385 = vmatpush1.bf16.msra.mxu0 %v9327_v45  ;;  %7417 = vmatpush1.bf16.msra.mxu1 %v9329_v22 }
 0xf8f   :  { %7387 = vmatprep.subr.bf16.mxu0 %v9333_v29  ;;  %7419 = vmatprep.subr.bf16.mxu1 %v9335_v34 }
 0xf92   :  { %7389 = vmatpush1.bf16.msra.mxu0 %v9339_v5  ;;  %7421 = vmatpush1.bf16.msra.mxu1 %v9341_v58 }
 0xf93   :  { %7391 = vmatprep.subr.bf16.mxu0 %v9345_v49  ;;  %7423 = vmatprep.subr.bf16.mxu1 %v9347_v39 }
 0xf96   :  { %7393 = vmatpush1.bf16.msra.mxu0 %v9351_v35  ;;  %7425 = vmatpush1.bf16.msra.mxu1 %v9353_v51 }
 0xf97   :  { %7426 = vmatprep.subr.bf16.mxu0 %v7918_v7 }
0x104c   :  { %v5372_v36 = vpop.f32.mrb[28].mxu0  ;;  %v5443_v2 = vpop.f32.mrb[28].mxu1 }
0x104d   :  { %v7506_v10 = vadd.f32 %v5372_v36, %v3554_v18  ;;  %v5374_v21 = vpop.f32.mrb[29].mxu0  ;;  %v5445_v1 = vpop.f32.mrb[29].mxu1  ;;  %v7508_v57 = vadd.f32 %v5443_v2, %v3562_v14 }
0x104e   :  { %v7507_v61 = vadd.f32 %v5374_v21, %v3558_v50  ;;  %v7509_v63 = vadd.f32 %v5445_v1, %v3566_v48  ;;  %v4041_v1 = vrot.slane %v4024_v19, %v10002_v26 }
0x104f   :  { %v5823_v27 = vmul.f32 -1.442695, %v7506_v10 }
0x1050   :  { %v5824_v43 = vmul.f32 -1.442695, %v7507_v61  ;;  %v5825_v54 = vmul.f32 -1.442695, %v7509_v63 }
0x1051   :  { %7810 = vpow2.f32 %v5823_v27  ;;  %v4037_v27 = vrot.slane %v4024_v19, %v10003_v52 }
0x1052   :  { %7812 = vpow2.f32 %v5824_v43 }
0x1053   :  { %7814 = vpow2.f32 %v5825_v54 }
0x1054   :  { %7816 = vtanh.f32 %v7508_v57 }
0x105b   :  { %v7811_v42 = vpop.eup %7810 }
0x105c   :  { %v7813_v20 = vpop.eup %7812  ;;  %v5455_v11 = vadd.f32 1.0, %v7811_v42 }
0x105d   :  { %v5461_v9 = vadd.f32 1.0, %v7813_v20  ;;  %v7815_v45 = vpop.eup %7814 }
0x105e   :  { %7818 = vrcp.f32 %v5455_v11  ;;  %v7817_v22 = vpop.eup %7816  ;;  %v5468_v58 = vadd.f32 1.0, %v7815_v45 }
0x105f   :  { %7820 = vrcp.f32 %v5461_v9 }
0x1060   :  { %7822 = vrcp.f32 %v5468_v58 }
0x1068   :  { %v7819_v29 = vpop.eup %7818 }
0x1069   :  { %v7821_v34 = vpop.eup %7820  ;;  %v5472_v5 = vmul.f32 %v7819_v29, %v7817_v22 }
0x106a   :  { %v5471_v49 = vmul.f32 %v7821_v34, %v9629_v25  ;;  %v7823_v35 = vpop.eup %7822  ;;  %v7448_v25 = vpack.c.bf16 %v5665_v47, %v5664_v0  ;;  %v5829_v34 = vld [vmem:[%s9746_s8] ss:$0 sm:$0xff] }
0x106c   :  { %v9672_v39 = vadd.f32 %v5472_v5, %v5471_v49 }
0x106e   :  { %7824 = vtanh.f32 %v9672_v39 }
0x1078   :  { %v7825_v51 = vpop.eup %7824 }
0x1079   :  { %v5475_v62 = vmul.f32 %v7825_v51, %v7823_v35 }
0x107b   :  { %5545 = vmatmul.mubr.f32.vlgmr.msra.gmra.mrb[30].mxu0 %v5475_v62  ;;  %5616 = vmatmul.mubr.f32.vlgmr.msra.gmra.mrb[30].mxu1 %v5475_v62 }
0x107c   :  { %7428 = vmatpush3.bf16.msra.mxu0 %v7427_v30  ;;  %5879 = vmatprep.mubr.msk.f32.mxu0 %vm7919_vm1, %v9863_v53  ;;  %v4029_v53 = vrot.slane %v4024_v19, %v10000_v60 }
0x107d   :  { %7429 = vmatprep.subr.bf16.mxu0 %v7918_v7 }
0x1080   :  { %7431 = vmatpush3.bf16.msra.mxu0 %v7430_v33 }
0x1081   :  { %7432 = vmatprep.subr.bf16.mxu0 %v7918_v7 }
0x1084   :  { %7434 = vmatpush3.bf16.msra.mxu0 %v7433_v55 }
0x1085   :  { %7435 = vmatprep.subr.bf16.mxu0 %v7918_v7 }
0x1088   :  { %7437 = vmatpush3.bf16.msra.mxu0 %v7436_v24 }
0x1089   :  { %7438 = vmatprep.subr.bf16.mxu0 %v7918_v7 }
0x108c   :  { %7440 = vmatpush3.bf16.msra.mxu0 %v7439_v31 }
0x108d   :  { %7441 = vmatprep.subr.bf16.mxu0 %v7918_v7 }
0x1090   :  { %7443 = vmatpush3.bf16.msra.mxu0 %v7442_v6 }
0x1091   :  { %7444 = vmatprep.subr.bf16.mxu0 %v7918_v7 }
0x1094   :  { %7446 = vmatpush3.bf16.msra.mxu0 %v7445_v37 }
0x1095   :  { %7447 = vmatprep.subr.bf16.mxu0 %v7918_v7 }
0x1098   :  { %7449 = vmatpush3.bf16.msra.mxu0 %v7448_v25 }
0x114e   :  { %v5546_v46 = vpop.f32.mrb[30].mxu0  ;;  %v5617_v15 = vpop.f32.mrb[30].mxu1 }
0x114f   :  { %v7510_v18 = vadd.f32 %v5546_v46, %v4029_v53  ;;  %v5548_v50 = vpop.f32.mrb[31].mxu0  ;;  %v5619_v36 = vpop.f32.mrb[31].mxu1  ;;  %v7512_v48 = vadd.f32 %v5617_v15, %v4037_v27 }
0x1150   :  { %v7511_v2 = vadd.f32 %v5548_v50, %v4033_v59  ;;  %v7513_v61 = vadd.f32 %v5619_v36, %v4041_v1 }
0x1151   :  { %v5826_v10 = vmul.f32 -1.442695, %v7510_v18 }
0x1152   :  { %v5827_v21 = vmul.f32 -1.442695, %v7511_v2  ;;  %v5828_v43 = vmul.f32 -1.442695, %v7513_v61 }
0x1153   :  { %7826 = vpow2.f32 %v5826_v10 }
0x1154   :  { %7828 = vpow2.f32 %v5827_v21 }
0x1155   :  { %7830 = vpow2.f32 %v5828_v43 }
0x1156   :  { %7832 = vtanh.f32 %v7512_v48 }
0x115d   :  { %v7827_v60 = vpop.eup %7826 }
0x115e   :  { %v7829_v63 = vpop.eup %7828  ;;  %v5629_v56 = vadd.f32 1.0, %v7827_v60 }
0x115f   :  { %v5635_v14 = vadd.f32 1.0, %v7829_v63  ;;  %v7831_v54 = vpop.eup %7830 }
0x1160   :  { %7834 = vrcp.f32 %v5629_v56  ;;  %v7833_v57 = vpop.eup %7832  ;;  %v5642_v11 = vadd.f32 1.0, %v7831_v54 }
0x1161   :  { %7836 = vrcp.f32 %v5635_v14 }
0x1162   :  { %7838 = vrcp.f32 %v5642_v11 }
0x116a   :  { %v7835_v42 = vpop.eup %7834 }
0x116b   :  { %v7837_v20 = vpop.eup %7836  ;;  %v5646_v26 = vmul.f32 %v7835_v42, %v7833_v57 }
0x116c   :  { %v5645_v9 = vmul.f32 %v7837_v20, %v9672_v39  ;;  %v7839_v52 = vpop.eup %7838 }
0x116e   :  { %v5647_v45 = vadd.f32 %v5646_v26, %v5645_v9 }
0x1170   :  { %7840 = vtanh.f32 %v5647_v45 }
0x117a   :  { %v7841_v22 = vpop.eup %7840 }
0x117b   :  { %v5649_v29 = vmul.f32 %v7841_v22, %v7839_v52 }
0x117d   :  { %5880 = vmatmul.mubr.f32.vlgmr.msra.gmra.mrb[32].mxu0 %v5649_v29 }
0x1250   :  { %v5739_v5 = vpop.f32.mrb[32].mxu0 }
0x1251   :  { %v5740_v58 = vadd.f32 %v5829_v34, %v5739_v5  ;;  %v5881_v49 = vpop.f32.mrb[33].mxu0 }
0x1253   :  { %5744 = vst.msk [vmem:[%s9747_s9] sm:$0xff] %vm5743_vm2, %v5740_v58 }
0x1254   :  { %5749 = vsyncpa [#allocation5], 1 }
0x1255   :  { %5750 = vsyncpa [#allocation7], 1 }

</bundles_post_ra>
